<compile_context>
chip_gen: v7x
topology: tpu7x:2x2x1
jax: 0.10.0
libtpu: 0.0.40
codegen_flags: <defaults>
</compile_context>

<pallas_src>
import functools

import jax
import jax.numpy as jnp
from jax import lax
from jax.experimental import pallas as pl
from jax.experimental.pallas import tpu as pltpu


def _convlstm_kernel(x_ref, h_ref, c_ref, w_ref, gp_ref,
                     h_out_ref, c_out_ref,
                     comb_ref, patch_ref,
                     *, H, W, KH, KW, Cin, hidden, ph, pw):
    """One batch element per grid step.

    x_ref     : (1, H, W, Cin)            f32 input slice
    h_ref     : (1, H, W, hidden)         f32 current hidden state
    c_ref     : (1, H, W, hidden)         f32 current cell state
    w_ref     : (KH*KW*Ctot, 4*hidden)    bf16 conv weights (im2col layout,
                                          g-gate columns pre-scaled by 2)
    gp_ref    : (3, 4*hidden)             f32 [bias(pre-scaled) | post_mul | post_add]
    outputs   : h_next, c_next            (1, H, W, hidden) f32
    comb_ref  : (H+KH-1, W+KW-1, Ctot)    f32 VMEM scratch (padded concat)
    patch_ref : (H*W, KH*KW*Ctot)         bf16 VMEM scratch (im2col patches)
    """
    Ctot = Cin + hidden

    # --- fused concat([x, h], channel) + zero "same" padding, all in VMEM ---
    # Re-zeroed every grid step (a few vreg stores) so this stays correct when
    # the parallel batch axis is split across TensorCores (per-core scratch).
    comb_ref[...] = jnp.zeros_like(comb_ref)
    comb_ref[ph:ph + H, pw:pw + W, :Cin] = x_ref[0]
    comb_ref[ph:ph + H, pw:pw + W, Cin:] = h_ref[0]

    # --- im2col: lane-concatenate the KH*KW shifted windows per output pixel ---
    # KH*KW plain shifted-window stores (static offsets, fully unrolled); the
    # MXU then sees one matmul with K = KH*KW*Ctot instead of KH*KW tiny pushes.
    for di in range(KH):
        for dj in range(KW):
            t = di * KW + dj
            win = comb_ref[di:di + H, dj:dj + W, :]              # (H, W, Ctot) f32
            patch_ref[:, t * Ctot:(t + 1) * Ctot] = (
                win.reshape(H * W, Ctot).astype(patch_ref.dtype))

    # --- single MXU matmul, bf16 operands, f32 accumulation ---
    acc = jnp.dot(patch_ref[...], w_ref[...],
                  preferred_element_type=jnp.float32)            # (H*W, 4*hidden)
    acc = acc + gp_ref[0:1, :]                                   # bias (g cols already x2)

    # --- gates: ONE wide sigmoid over i|f|o|g (tanh(x) = 2*sigmoid(2x) - 1) ---
    sg = jax.nn.sigmoid(acc)                                     # one EUP pass, 128 lanes
    gates = sg * gp_ref[1:2, :] + gp_ref[2:3, :]                 # ifo: y ; g: 2y - 1
    i = gates[:, 0 * hidden:1 * hidden]
    f = gates[:, 1 * hidden:2 * hidden]
    o = gates[:, 2 * hidden:3 * hidden]
    g = gates[:, 3 * hidden:]

    # --- LSTM state update (f32, v5e-safe) ---
    c_cur = c_ref[0].reshape(H * W, hidden)
    c_next = f * c_cur + i * g
    h_next = o * jnp.tanh(c_next)

    c_out_ref[0] = c_next.reshape(H, W, hidden)
    h_out_ref[0] = h_next.reshape(H, W, hidden)


def conv_lstm_cell(x, h_cur, c_cur, w, b, kernel_size):
    """x: (B,H,W,Cin); h_cur/c_cur: (B,H,W,Chid); w: (KH,KW,Cin+Chid,4*Chid); b: (4*Chid,)."""
    B, H, W, Cin = x.shape
    hidden = h_cur.shape[-1]
    KH, KW = kernel_size
    # PyTorch's padding = k//2 only equals "same" padding for odd kernels.
    assert KH % 2 == 1 and KW % 2 == 1, "only odd kernel sizes are supported"
    ph, pw = KH // 2, KW // 2
    Ctot = Cin + hidden
    Hp, Wp = H + KH - 1, W + KW - 1
    K = KH * KW * Ctot
    N = 4 * hidden

    # Fold the g-gate's x2 pre-scale (for tanh(x) = 2*sigmoid(2x) - 1) into the
    # weights and bias; exact power-of-two scale -> no bf16 precision loss.
    pre = jnp.concatenate([jnp.ones((3 * hidden,), jnp.float32),
                           jnp.full((hidden,), 2.0, jnp.float32)])
    post_mul = pre                                                 # ifo: 1, g: 2
    post_add = jnp.concatenate([jnp.zeros((3 * hidden,), jnp.float32),
                                jnp.full((hidden,), -1.0, jnp.float32)])

    # im2col weight layout: flat K index = (di*KW + dj)*Ctot + c  (row-major HWIO).
    w2d = (w.reshape(K, N) * pre[None, :]).astype(jnp.bfloat16)
    gate_params = jnp.stack([b.astype(jnp.float32) * pre, post_mul, post_add])  # (3, N)

    kernel = functools.partial(
        _convlstm_kernel, H=H, W=W, KH=KH, KW=KW,
        Cin=Cin, hidden=hidden, ph=ph, pw=pw)

    h_next, c_next = pl.pallas_call(
        kernel,
        out_shape=(
            jax.ShapeDtypeStruct((B, H, W, hidden), jnp.float32),
            jax.ShapeDtypeStruct((B, H, W, hidden), jnp.float32),
        ),
        grid_spec=pltpu.PrefetchScalarGridSpec(
            num_scalar_prefetch=0,
            grid=(B,),
            in_specs=[
                pl.BlockSpec((1, H, W, Cin), lambda bi: (bi, 0, 0, 0)),
                pl.BlockSpec((1, H, W, hidden), lambda bi: (bi, 0, 0, 0)),
                pl.BlockSpec((1, H, W, hidden), lambda bi: (bi, 0, 0, 0)),
                pl.BlockSpec((K, N), lambda bi: (0, 0)),
                pl.BlockSpec((3, N), lambda bi: (0, 0)),
            ],
            out_specs=[
                pl.BlockSpec((1, H, W, hidden), lambda bi: (bi, 0, 0, 0)),
                pl.BlockSpec((1, H, W, hidden), lambda bi: (bi, 0, 0, 0)),
            ],
            scratch_shapes=[
                pltpu.VMEM((Hp, Wp, Ctot), jnp.float32),       # padded concat
                pltpu.VMEM((H * W, K), jnp.bfloat16),          # im2col patches
            ],
        ),
        compiler_params=pltpu.CompilerParams(
            dimension_semantics=("parallel",),
            vmem_limit_bytes=32 * 1024 * 1024,
        ),
    )(x, h_cur, c_cur, w2d, gate_params)
    return h_next, c_next


def _reference(x, h_cur, c_cur, w, b):
    """Pure-JAX f32 reference mirroring the PyTorch module (NHWC)."""
    hidden = h_cur.shape[-1]
    combined = jnp.concatenate([x, h_cur], axis=-1)
    conv = lax.conv_general_dilated(
        combined, w, window_strides=(1, 1), padding="SAME",
        dimension_numbers=("NHWC", "HWIO", "NHWC"))
    conv = conv + b[None, None, None, :]
    cc_i, cc_f, cc_o, cc_g = jnp.split(conv, 4, axis=-1)
    i = jax.nn.sigmoid(cc_i)
    f = jax.nn.sigmoid(cc_f)
    o = jax.nn.sigmoid(cc_o)
    g = jnp.tanh(cc_g)
    c_next = f * c_cur + i * g
    h_next = o * jnp.tanh(c_next)
    return h_next, c_next


if __name__ == "__main__":
    # Small shapes consistent with the module's forward.
    B, Cin, hidden, H, W = 2, 4, 32, 16, 16
    kernel_size = (3, 3)
    Ctot = Cin + hidden

    key = jax.random.PRNGKey(0)
    kx, kh, kc, kw, kb = jax.random.split(key, 5)
    x = jax.random.normal(kx, (B, H, W, Cin), jnp.float32)
    h_cur = jax.random.normal(kh, (B, H, W, hidden), jnp.float32)
    c_cur = jax.random.normal(kc, (B, H, W, hidden), jnp.float32)

    # Deterministic parameter init (Conv2d(in=Cin+hidden, out=4*hidden, k=3, pad=1, bias=True)).
    fan_in = Ctot * kernel_size[0] * kernel_size[1]
    bound = 1.0 / (fan_in ** 0.5)
    w = jax.random.uniform(kw, (kernel_size[0], kernel_size[1], Ctot, 4 * hidden),
                           jnp.float32, -bound, bound)
    b = jax.random.uniform(kb, (4 * hidden,), jnp.float32, -bound, bound)

    h_next, c_next = conv_lstm_cell(x, h_cur, c_cur, w, b, kernel_size)
    jax.block_until_ready((h_next, c_next))

    h_ref, c_ref = _reference(x, h_cur, c_cur, w, b)
    assert h_next.shape == (B, H, W, hidden) and c_next.shape == (B, H, W, hidden)
    # bf16 MXU operands with f32 accumulation -> tolerance loosened vs. pure f32.
    assert jnp.allclose(h_next, h_ref, atol=2e-2, rtol=2e-2)
    assert jnp.allclose(c_next, c_ref, atol=2e-2, rtol=2e-2)

    print("KERNEL_OK")
</pallas_src>

<mosaic_0001>
module attributes {stable_mosaic.version = 11 : i64} {
  func.func @_convlstm_kernel(%arg0: i32, %arg1: memref<1x16x16x4xf32, #tpu.memory_space<vmem>>, %arg2: memref<1x16x16x32xf32, #tpu.memory_space<vmem>>, %arg3: memref<1x16x16x32xf32, #tpu.memory_space<vmem>>, %arg4: memref<324x128xbf16, #tpu.memory_space<vmem>>, %arg5: memref<3x128xf32, #tpu.memory_space<vmem>>, %arg6: memref<1x16x16x32xf32, #tpu.memory_space<vmem>>, %arg7: memref<1x16x16x32xf32, #tpu.memory_space<vmem>>, %arg8: memref<18x18x36xf32, #tpu.memory_space<vmem>>, %arg9: memref<256x324xbf16, #tpu.memory_space<vmem>>) attributes {dimension_semantics = [#tpu.dimension_semantics<parallel>], iteration_bounds = array<i64: 2>, scalar_prefetch = 0 : i64, scratch_operands = 2 : i64, tpu.core_type = #tpu.core_type<tc>, window_params = [{transform_indices = @transform_0, window_bounds = array<i64: 1, 16, 16, 4>}, {transform_indices = @transform_1, window_bounds = array<i64: 1, 16, 16, 32>}, {transform_indices = @transform_2, window_bounds = array<i64: 1, 16, 16, 32>}, {pipeline_mode = #tpu.pipeline_mode<synchronous>, transform_indices = @transform_3, window_bounds = array<i64: 324, 128>}, {pipeline_mode = #tpu.pipeline_mode<synchronous>, transform_indices = @transform_4, window_bounds = array<i64: 3, 128>}, {transform_indices = @transform_5, window_bounds = array<i64: 1, 16, 16, 32>}, {transform_indices = @transform_6, window_bounds = array<i64: 1, 16, 16, 32>}]} {
    %cst = arith.constant 0.000000e+00 : f32
    %0 = vector.broadcast %cst : f32 to vector<18x18x36xf32>
    %c0 = arith.constant 0 : index
    %c0_0 = arith.constant 0 : index
    %c0_1 = arith.constant 0 : index
    %1 = vector.load %arg8[%c0, %c0_0, %c0_1] : memref<18x18x36xf32, #tpu.memory_space<vmem>>, vector<18x18x36xf32>
    tpu.vector_store %arg8[%c0, %c0_0, %c0_1], %0 {strides = array<i32>} : memref<18x18x36xf32, #tpu.memory_space<vmem>>, vector<18x18x36xf32>,
    %c0_2 = arith.constant 0 : index
    %c0_3 = arith.constant 0 : index
    %c0_4 = arith.constant 0 : index
    %c0_5 = arith.constant 0 : index
    %2 = vector.load %arg1[%c0_2, %c0_3, %c0_4, %c0_5] : memref<1x16x16x4xf32, #tpu.memory_space<vmem>>, vector<1x16x16x4xf32>
    %3 = vector.shape_cast %2 : vector<1x16x16x4xf32> to vector<16x16x4xf32>
    %c1 = arith.constant 1 : index
    %c1_6 = arith.constant 1 : index
    %c0_7 = arith.constant 0 : index
    %4 = vector.load %arg8[%c1, %c1_6, %c0_7] : memref<18x18x36xf32, #tpu.memory_space<vmem>>, vector<16x16x4xf32>
    tpu.vector_store %arg8[%c1, %c1_6, %c0_7], %3 {strides = array<i32>} : memref<18x18x36xf32, #tpu.memory_space<vmem>>, vector<16x16x4xf32>,
    %c0_8 = arith.constant 0 : index
    %c0_9 = arith.constant 0 : index
    %c0_10 = arith.constant 0 : index
    %c0_11 = arith.constant 0 : index
    %5 = vector.load %arg2[%c0_8, %c0_9, %c0_10, %c0_11] : memref<1x16x16x32xf32, #tpu.memory_space<vmem>>, vector<1x16x16x32xf32>
    %6 = vector.shape_cast %5 : vector<1x16x16x32xf32> to vector<16x16x32xf32>
    %c1_12 = arith.constant 1 : index
    %c1_13 = arith.constant 1 : index
    %c4 = arith.constant 4 : index
    %7 = vector.load %arg8[%c1_12, %c1_13, %c4] : memref<18x18x36xf32, #tpu.memory_space<vmem>>, vector<16x16x32xf32>
    tpu.vector_store %arg8[%c1_12, %c1_13, %c4], %6 {strides = array<i32>} : memref<18x18x36xf32, #tpu.memory_space<vmem>>, vector<16x16x32xf32>,
    %c0_14 = arith.constant 0 : index
    %c0_15 = arith.constant 0 : index
    %c0_16 = arith.constant 0 : index
    %8 = vector.load %arg8[%c0_14, %c0_15, %c0_16] : memref<18x18x36xf32, #tpu.memory_space<vmem>>, vector<16x16x36xf32>
    %9 = vector.shape_cast %8 : vector<16x16x36xf32> to vector<256x36xf32>
    %10 = arith.truncf %9 : vector<256x36xf32> to vector<256x36xbf16>
    %c0_17 = arith.constant 0 : index
    %c0_18 = arith.constant 0 : index
    %11 = vector.load %arg9[%c0_17, %c0_18] : memref<256x324xbf16, #tpu.memory_space<vmem>>, vector<256x36xbf16>
    tpu.vector_store %arg9[%c0_17, %c0_18], %10 {strides = array<i32>} : memref<256x324xbf16, #tpu.memory_space<vmem>>, vector<256x36xbf16>,
    %c0_19 = arith.constant 0 : index
    %c1_20 = arith.constant 1 : index
    %c0_21 = arith.constant 0 : index
    %12 = vector.load %arg8[%c0_19, %c1_20, %c0_21] : memref<18x18x36xf32, #tpu.memory_space<vmem>>, vector<16x16x36xf32>
    %13 = vector.shape_cast %12 : vector<16x16x36xf32> to vector<256x36xf32>
    %14 = arith.truncf %13 : vector<256x36xf32> to vector<256x36xbf16>
    %c0_22 = arith.constant 0 : index
    %c36 = arith.constant 36 : index
    %15 = vector.load %arg9[%c0_22, %c36] : memref<256x324xbf16, #tpu.memory_space<vmem>>, vector<256x36xbf16>
    tpu.vector_store %arg9[%c0_22, %c36], %14 {strides = array<i32>} : memref<256x324xbf16, #tpu.memory_space<vmem>>, vector<256x36xbf16>,
    %c0_23 = arith.constant 0 : index
    %c2 = arith.constant 2 : index
    %c0_24 = arith.constant 0 : index
    %16 = vector.load %arg8[%c0_23, %c2, %c0_24] : memref<18x18x36xf32, #tpu.memory_space<vmem>>, vector<16x16x36xf32>
    %17 = vector.shape_cast %16 : vector<16x16x36xf32> to vector<256x36xf32>
    %18 = arith.truncf %17 : vector<256x36xf32> to vector<256x36xbf16>
    %c0_25 = arith.constant 0 : index
    %c72 = arith.constant 72 : index
    %19 = vector.load %arg9[%c0_25, %c72] : memref<256x324xbf16, #tpu.memory_space<vmem>>, vector<256x36xbf16>
    tpu.vector_store %arg9[%c0_25, %c72], %18 {strides = array<i32>} : memref<256x324xbf16, #tpu.memory_space<vmem>>, vector<256x36xbf16>,
    %c1_26 = arith.constant 1 : index
    %c0_27 = arith.constant 0 : index
    %c0_28 = arith.constant 0 : index
    %20 = vector.load %arg8[%c1_26, %c0_27, %c0_28] : memref<18x18x36xf32, #tpu.memory_space<vmem>>, vector<16x16x36xf32>
    %21 = vector.shape_cast %20 : vector<16x16x36xf32> to vector<256x36xf32>
    %22 = arith.truncf %21 : vector<256x36xf32> to vector<256x36xbf16>
    %c0_29 = arith.constant 0 : index
    %c108 = arith.constant 108 : index
    %23 = vector.load %arg9[%c0_29, %c108] : memref<256x324xbf16, #tpu.memory_space<vmem>>, vector<256x36xbf16>
    tpu.vector_store %arg9[%c0_29, %c108], %22 {strides = array<i32>} : memref<256x324xbf16, #tpu.memory_space<vmem>>, vector<256x36xbf16>,
    %c1_30 = arith.constant 1 : index
    %c1_31 = arith.constant 1 : index
    %c0_32 = arith.constant 0 : index
    %24 = vector.load %arg8[%c1_30, %c1_31, %c0_32] : memref<18x18x36xf32, #tpu.memory_space<vmem>>, vector<16x16x36xf32>
    %25 = vector.shape_cast %24 : vector<16x16x36xf32> to vector<256x36xf32>
    %26 = arith.truncf %25 : vector<256x36xf32> to vector<256x36xbf16>
    %c0_33 = arith.constant 0 : index
    %c144 = arith.constant 144 : index
    %27 = vector.load %arg9[%c0_33, %c144] : memref<256x324xbf16, #tpu.memory_space<vmem>>, vector<256x36xbf16>
    tpu.vector_store %arg9[%c0_33, %c144], %26 {strides = array<i32>} : memref<256x324xbf16, #tpu.memory_space<vmem>>, vector<256x36xbf16>,
    %c1_34 = arith.constant 1 : index
    %c2_35 = arith.constant 2 : index
    %c0_36 = arith.constant 0 : index
    %28 = vector.load %arg8[%c1_34, %c2_35, %c0_36] : memref<18x18x36xf32, #tpu.memory_space<vmem>>, vector<16x16x36xf32>
    %29 = vector.shape_cast %28 : vector<16x16x36xf32> to vector<256x36xf32>
    %30 = arith.truncf %29 : vector<256x36xf32> to vector<256x36xbf16>
    %c0_37 = arith.constant 0 : index
    %c180 = arith.constant 180 : index
    %31 = vector.load %arg9[%c0_37, %c180] : memref<256x324xbf16, #tpu.memory_space<vmem>>, vector<256x36xbf16>
    tpu.vector_store %arg9[%c0_37, %c180], %30 {strides = array<i32>} : memref<256x324xbf16, #tpu.memory_space<vmem>>, vector<256x36xbf16>,
    %c2_38 = arith.constant 2 : index
    %c0_39 = arith.constant 0 : index
    %c0_40 = arith.constant 0 : index
    %32 = vector.load %arg8[%c2_38, %c0_39, %c0_40] : memref<18x18x36xf32, #tpu.memory_space<vmem>>, vector<16x16x36xf32>
    %33 = vector.shape_cast %32 : vector<16x16x36xf32> to vector<256x36xf32>
    %34 = arith.truncf %33 : vector<256x36xf32> to vector<256x36xbf16>
    %c0_41 = arith.constant 0 : index
    %c216 = arith.constant 216 : index
    %35 = vector.load %arg9[%c0_41, %c216] : memref<256x324xbf16, #tpu.memory_space<vmem>>, vector<256x36xbf16>
    tpu.vector_store %arg9[%c0_41, %c216], %34 {strides = array<i32>} : memref<256x324xbf16, #tpu.memory_space<vmem>>, vector<256x36xbf16>,
    %c2_42 = arith.constant 2 : index
    %c1_43 = arith.constant 1 : index
    %c0_44 = arith.constant 0 : index
    %36 = vector.load %arg8[%c2_42, %c1_43, %c0_44] : memref<18x18x36xf32, #tpu.memory_space<vmem>>, vector<16x16x36xf32>
    %37 = vector.shape_cast %36 : vector<16x16x36xf32> to vector<256x36xf32>
    %38 = arith.truncf %37 : vector<256x36xf32> to vector<256x36xbf16>
    %c0_45 = arith.constant 0 : index
    %c252 = arith.constant 252 : index
    %39 = vector.load %arg9[%c0_45, %c252] : memref<256x324xbf16, #tpu.memory_space<vmem>>, vector<256x36xbf16>
    tpu.vector_store %arg9[%c0_45, %c252], %38 {strides = array<i32>} : memref<256x324xbf16, #tpu.memory_space<vmem>>, vector<256x36xbf16>,
    %c2_46 = arith.constant 2 : index
    %c2_47 = arith.constant 2 : index
    %c0_48 = arith.constant 0 : index
    %40 = vector.load %arg8[%c2_46, %c2_47, %c0_48] : memref<18x18x36xf32, #tpu.memory_space<vmem>>, vector<16x16x36xf32>
    %41 = vector.shape_cast %40 : vector<16x16x36xf32> to vector<256x36xf32>
    %42 = arith.truncf %41 : vector<256x36xf32> to vector<256x36xbf16>
    %c0_49 = arith.constant 0 : index
    %c288 = arith.constant 288 : index
    %43 = vector.load %arg9[%c0_49, %c288] : memref<256x324xbf16, #tpu.memory_space<vmem>>, vector<256x36xbf16>
    tpu.vector_store %arg9[%c0_49, %c288], %42 {strides = array<i32>} : memref<256x324xbf16, #tpu.memory_space<vmem>>, vector<256x36xbf16>,
    %c0_50 = arith.constant 0 : index
    %c0_51 = arith.constant 0 : index
    %44 = vector.load %arg9[%c0_50, %c0_51] : memref<256x324xbf16, #tpu.memory_space<vmem>>, vector<256x324xbf16>
    %c0_52 = arith.constant 0 : index
    %c0_53 = arith.constant 0 : index
    %45 = vector.load %arg4[%c0_52, %c0_53] : memref<324x128xbf16, #tpu.memory_space<vmem>>, vector<324x128xbf16>
    %cst_54 = arith.constant dense<0.000000e+00> : vector<256x128xf32>
    %46 = tpu.matmul %44, %45, %cst_54 {dimension_numbers = #tpu.dot_dimension_numbers<[1], [0], [0], [1], [0, 0, 1, 1], [], []>} : vector<256x324xbf16>, vector<324x128xbf16>, vector<256x128xf32> -> vector<256x128xf32>
    %c0_55 = arith.constant 0 : index
    %c0_56 = arith.constant 0 : index
    %47 = vector.load %arg5[%c0_55, %c0_56] : memref<3x128xf32, #tpu.memory_space<vmem>>, vector<1x128xf32>
    %48 = vector.broadcast %47 : vector<1x128xf32> to vector<256x128xf32>
    %49 = arith.addf %46, %48 : vector<256x128xf32>
    %50 = arith.negf %49 : vector<256x128xf32>
    %51 = math.exp %50 : vector<256x128xf32>
    %cst_57 = arith.constant 1.000000e+00 : f32
    %52 = vector.broadcast %cst_57 : f32 to vector<256x128xf32>
    %53 = arith.addf %52, %51 : vector<256x128xf32>
    %54 = arith.divf %52, %53 : vector<256x128xf32>
    %c1_58 = arith.constant 1 : index
    %c0_59 = arith.constant 0 : index
    %55 = vector.load %arg5[%c1_58, %c0_59] : memref<3x128xf32, #tpu.memory_space<vmem>>, vector<1x128xf32>
    %56 = vector.broadcast %55 : vector<1x128xf32> to vector<256x128xf32>
    %57 = arith.mulf %54, %56 : vector<256x128xf32>
    %c2_60 = arith.constant 2 : index
    %c0_61 = arith.constant 0 : index
    %58 = vector.load %arg5[%c2_60, %c0_61] : memref<3x128xf32, #tpu.memory_space<vmem>>, vector<1x128xf32>
    %59 = vector.broadcast %58 : vector<1x128xf32> to vector<256x128xf32>
    %60 = arith.addf %57, %59 : vector<256x128xf32>
    %61 = vector.extract_strided_slice %60 {offsets = [0, 0], sizes = [256, 32], strides = [1, 1]} : vector<256x128xf32> to vector<256x32xf32>
    %62 = vector.extract_strided_slice %60 {offsets = [0, 32], sizes = [256, 32], strides = [1, 1]} : vector<256x128xf32> to vector<256x32xf32>
    %63 = vector.extract_strided_slice %60 {offsets = [0, 64], sizes = [256, 32], strides = [1, 1]} : vector<256x128xf32> to vector<256x32xf32>
    %64 = vector.extract_strided_slice %60 {offsets = [0, 96], sizes = [256, 32], strides = [1, 1]} : vector<256x128xf32> to vector<256x32xf32>
    %c0_62 = arith.constant 0 : index
    %c0_63 = arith.constant 0 : index
    %c0_64 = arith.constant 0 : index
    %c0_65 = arith.constant 0 : index
    %65 = vector.load %arg3[%c0_62, %c0_63, %c0_64, %c0_65] : memref<1x16x16x32xf32, #tpu.memory_space<vmem>>, vector<1x16x16x32xf32>
    %66 = vector.shape_cast %65 : vector<1x16x16x32xf32> to vector<16x16x32xf32>
    %67 = vector.shape_cast %66 : vector<16x16x32xf32> to vector<256x32xf32>
    %68 = arith.mulf %62, %67 : vector<256x32xf32>
    %69 = arith.mulf %61, %64 : vector<256x32xf32>
    %70 = arith.addf %68, %69 : vector<256x32xf32>
    %71 = math.tanh %70 : vector<256x32xf32>
    %72 = arith.mulf %63, %71 : vector<256x32xf32>
    %73 = vector.shape_cast %70 : vector<256x32xf32> to vector<16x16x32xf32>
    %c0_66 = arith.constant 0 : index
    %c0_67 = arith.constant 0 : index
    %c0_68 = arith.constant 0 : index
    %c0_69 = arith.constant 0 : index
    %74 = vector.load %arg7[%c0_66, %c0_67, %c0_68, %c0_69] : memref<1x16x16x32xf32, #tpu.memory_space<vmem>>, vector<1x16x16x32xf32>
    %75 = vector.shape_cast %74 : vector<1x16x16x32xf32> to vector<16x16x32xf32>
    %76 = vector.shape_cast %73 : vector<16x16x32xf32> to vector<1x16x16x32xf32>
    tpu.vector_store %arg7[%c0_66, %c0_67, %c0_68, %c0_69], %76 {strides = array<i32>} : memref<1x16x16x32xf32, #tpu.memory_space<vmem>>, vector<1x16x16x32xf32>,
    %77 = vector.shape_cast %72 : vector<256x32xf32> to vector<16x16x32xf32>
    %c0_70 = arith.constant 0 : index
    %c0_71 = arith.constant 0 : index
    %c0_72 = arith.constant 0 : index
    %c0_73 = arith.constant 0 : index
    %78 = vector.load %arg6[%c0_70, %c0_71, %c0_72, %c0_73] : memref<1x16x16x32xf32, #tpu.memory_space<vmem>>, vector<1x16x16x32xf32>
    %79 = vector.shape_cast %78 : vector<1x16x16x32xf32> to vector<16x16x32xf32>
    %80 = vector.shape_cast %77 : vector<16x16x32xf32> to vector<1x16x16x32xf32>
    tpu.vector_store %arg6[%c0_70, %c0_71, %c0_72, %c0_73], %80 {strides = array<i32>} : memref<1x16x16x32xf32, #tpu.memory_space<vmem>>, vector<1x16x16x32xf32>,
    return
  }
  func.func @transform_0(%arg0: i32) -> (i32, i32, i32, i32) {
    %c0_i32 = arith.constant 0 : i32
    %c0_i32_0 = arith.constant 0 : i32
    %c0_i32_1 = arith.constant 0 : i32
    %c0_i32_2 = arith.constant 0 : i32
    return %arg0, %c0_i32, %c0_i32_0, %c0_i32_1 : i32, i32, i32, i32
  }
  func.func @transform_1(%arg0: i32) -> (i32, i32, i32, i32) {
    %c0_i32 = arith.constant 0 : i32
    %c0_i32_0 = arith.constant 0 : i32
    %c0_i32_1 = arith.constant 0 : i32
    %c0_i32_2 = arith.constant 0 : i32
    return %arg0, %c0_i32, %c0_i32_0, %c0_i32_1 : i32, i32, i32, i32
  }
  func.func @transform_2(%arg0: i32) -> (i32, i32, i32, i32) {
    %c0_i32 = arith.constant 0 : i32
    %c0_i32_0 = arith.constant 0 : i32
    %c0_i32_1 = arith.constant 0 : i32
    %c0_i32_2 = arith.constant 0 : i32
    return %arg0, %c0_i32, %c0_i32_0, %c0_i32_1 : i32, i32, i32, i32
  }
  func.func @transform_3(%arg0: i32) -> (i32, i32) {
    %c0_i32 = arith.constant 0 : i32
    %c0_i32_0 = arith.constant 0 : i32
    %c0_i32_1 = arith.constant 0 : i32
    return %c0_i32, %c0_i32_0 : i32, i32
  }
  func.func @transform_4(%arg0: i32) -> (i32, i32) {
    %c0_i32 = arith.constant 0 : i32
    %c0_i32_0 = arith.constant 0 : i32
    %c0_i32_1 = arith.constant 0 : i32
    return %c0_i32, %c0_i32_0 : i32, i32
  }
  func.func @transform_5(%arg0: i32) -> (i32, i32, i32, i32) {
    %c0_i32 = arith.constant 0 : i32
    %c0_i32_0 = arith.constant 0 : i32
    %c0_i32_1 = arith.constant 0 : i32
    %c0_i32_2 = arith.constant 0 : i32
    return %arg0, %c0_i32, %c0_i32_0, %c0_i32_1 : i32, i32, i32, i32
  }
  func.func @transform_6(%arg0: i32) -> (i32, i32, i32, i32) {
    %c0_i32 = arith.constant 0 : i32
    %c0_i32_0 = arith.constant 0 : i32
    %c0_i32_1 = arith.constant 0 : i32
    %c0_i32_2 = arith.constant 0 : i32
    return %arg0, %c0_i32, %c0_i32_0, %c0_i32_1 : i32, i32, i32, i32
  }
}

</mosaic_0001>

<bundles_post_ra>
// kernel: tpu_custom_call.1
= control target key start
LH: loop header
LB: loop body
LE: loop exit
PB: predicated region body
PF: predicated region fallthrough
CT: control target
= control target key end

     0   :  { %12 = vsyncpa [#allocation5], 0  ;;  %s6415_s0 = inlined_call_operand.vmem [shape: f32[2,16,16,4], index: 0, kind: input, shape index: {}]   ;;  %s6416_s1 = inlined_call_operand.vmem [shape: f32[2,16,16,32], index: 1, kind: input, shape index: {}]   ;;  %s6417_s2 = inlined_call_operand.hbm [shape: f32[2,16,16,32], index: 2, kind: input, shape index: {}]   ;;  %s6418_s3 = inlined_call_operand.hbm [shape: bf16[324,128], index: 3, kind: input, shape index: {}]   ;;  %s6419_s4 = inlined_call_operand.vmem [shape: f32[3,128], index: 4, kind: input, shape index: {}]   ;;  %s6420_s5 = inlined_call_operand.hbm [shape: f32[2,16,16,32], index: 5, kind: output, shape index: {0}]   ;;  %s6421_s6 = inlined_call_operand.hbm [shape: f32[2,16,16,32], index: 6, kind: output, shape index: {1}]  }
   0x1   :  { %14 = vsyncpa [#allocation5 + $0x1], 0 }
   0x2   :  { %15 = vsyncpa [#allocation8], 0 }
   0x3   :  { %16 = vsyncpa [#allocation6], 0 }
   0x4   :  { %18 = vsyncpa [#allocation6 + $0x1], 0 }
   0x5   :  { %19 = vsyncpa [#allocation11], 0 }
   0x6   :  { %21 = vsyncpa [#allocation11 + $0x1], 0  ;;  %s4644_s21 = smov 0   ;;  %s4646_s22 = smov 0  }
   0x7   :  { %s4648_s23 = smov 0   ;;  %s4650_s24 = smov 0  }
   0x8 LB: > { %s4665_s25 = sadd.s32 4294967295, %s4585_s24   ;;  %s3839_s26 = sadd.s32 4294967294, %s4585_s24   ;;  %s4585_s24 = sphi %s4650_s24, %s6465_s24   ;;  %s4581_s23 = sphi %s4648_s23, %s6464_s23   ;;  %s4577_s22 = sphi %s4646_s22, %s6463_s22   ;;  %s4573_s21 = sphi %s4644_s21, %s6462_s21  }
   0x9   : > { %p99_p0 = scmp.ne.s32.totalorder %s4577_s22, %s4573_s21  ;;  %p6422_p1 = scmp.eq.s32.totalorder %s4665_s25, 0 }
   0xa   : > { %p171_p3 = scmp.eq.s32.totalorder %s3839_s26, 1  ;;  %p3840_p5 = scmp.ge.s32.totalorder %s4585_s24, 1 }
   0xb   : > { %p4674_p4 = por %p6422_p1, %p99_p0  ;;  %p204_p7 = scmp.lt.s32.totalorder %s4585_s24, 3 }
   0xc   : > { %p4679_p6 = por %p171_p3, %p99_p0  ;;  %s4587_s30 = smov [#allocation7]  }
   0xd   : > { %s6425_s27 = scalar_select %p4674_p4, 1, 0 }
   0xe   : > { %s6426_s28 = scalar_select %p4679_p6, 1, 0 }
   0xf   : > { %p4684_p8 = pnand %p3840_p5, %p204_p7  ;;  %s216_s7 = sshll.u32 %s4587_s30, 4  ;;  %s4688_s7 = int_to_ptr.vmem [resolvable:$true] %s216_s7 }
  0x10   : > { %s4700_s9 = sadd.s32 1, %s4585_s24   ;;  %s86_s10 = sadd.s32 1, %s4581_s23 }
  0x11   : > { %s6427_s29 = scalar_select %p4684_p8, 1, 0 }
  0x12   : > { %p4142_p9 = pneg %p4684_p8  ;;  %s83_s11 = ssub.s32 %s4585_s24, %s4700_s9 }
  0x13   : > { %s4425_s14 = scalar_lea.hbm %s6418_s3, 2624 }
  0x14   : > { %p4695_p11 = pnand %p4142_p9, %p6422_p1  ;;  %p4426_p12 = scmp.ne.s32.totalorder %s6418_s3, %s4425_s14 }
  0x15   : > { %p4432_p5 = scmp.lt.u32.totalorder %s4425_s14, %s6418_s3 }
  0x16   : > { %p4427_p13 = pneg %p4695_p11 }
  0x18   : > { %p4428_p0 = pnand %p4427_p13, %p4426_p12 }
  0x1a   : > { %p4429_p3 = pneg %p4428_p0 }
  0x1c   : > { %p4434_p7 = pnand %p4432_p5, %p4429_p3 }
  0x1e   : > { %4437 = shalt.err (!%p4434_p7)
}
  0x1f   : > { %s4438_s19 = scalar_lea.vmem %s4688_s7, 2624  ;;  %p4446_p2 = scmp.lt.s32.totalorder %s4688_s7, %s4688_s7 }
  0x20   : > { %p4439_p9 = scmp.ne.s32.totalorder %s4688_s7, %s4438_s19  ;;  %p4447_p6 = scmp.lt.s32.totalorder %s4438_s19, %s4438_s19 }
  0x22   : > { %p4441_p10 = pnand %p4439_p9, %p4427_p13  ;;  %p4448_p4 = por %p4447_p6, %p4446_p2 }
  0x24   : > { %p4442_p1 = pneg %p4441_p10 }
  0x26   : > { %p4449_p8 = pnand %p4448_p4, %p4442_p1 }
  0x28   : > { %4452 = shalt.err (!%p4449_p8)
}
  0x29   : > { %s4588_s20 = smov 64   ;;  %s4589_s26 = smov 4  }
  0x2a   : > { %4145 = dma.hbm_to_vmem [thread:$0]  (!%p4695_p11), %s6418_s3, 2624, %s4688_s7, [#allocation8], %s4588_s20, %s4588_s20, %s4589_s26  }
  0x2b   : > { %p84_p2 = scmp.eq.s32.totalorder %s83_s11, 0  ;;  %p93_p1 = scmp.ne.s32.totalorder %s4581_s23, %s4577_s22 }
  0x2c   : > { %p94_p4 = scmp.eq.s32.totalorder %s4585_s24, 0  ;;  %p4158_p6 = scmp.lt.s32.totalorder %s4585_s24, 2 }
  0x2d   : > { %s4731_s13 = scalar_select %p84_p2, %s4581_s23, %s86_s10  }
  0x2e   : > { %p95_p8 = por %p94_p4, %p93_p1  ;;  %p6429_p10 = scmp.eq.s32.totalorder %s4665_s25, 1 }
  0x2f   : > { %s249_s15 = sand.u32 1, %s4581_s23   ;;  %s3935_s16 = sshll.u32 %s4585_s24, 12 }
  0x30   : > { %p4735_p12 = por %p6429_p10, %p93_p1  ;;  %s3843_s17 = sshll.u32 %s249_s15, 8 }
  0x31   : > { %s4744_s19 = scalar_lea.hbm %s6417_s2, %s3935_s16  ;;  %s253_s7 = scalar_lea.vmem [#allocation4], %s3843_s17 }
  0x32   : > { %s260_s10 = sshll.u32 %s253_s7, 4  ;;  %p4746_p11 = pnand %p4158_p6, %p95_p8  ;;  %s4750_s10 = int_to_ptr.vmem [resolvable:$true] %s260_s10 }
  0x33   : > { %s4752_s20 = scalar_lea.sflag [#allocation5], %s249_s15  ;;  %s4453_s26 = scalar_lea.hbm %s4744_s19, 4096 }
  0x34   : > { %p4454_p13 = scmp.ne.s32.totalorder %s4744_s19, %s4453_s26  ;;  %p4455_p0 = pneg %p4746_p11 }
  0x35   : > { %s4458_s16 = scalar_lea.hbm %s6417_s2, 8192  ;;  %p4459_p7 = scmp.lt.u32.totalorder %s4744_s19, %s6417_s2 }
  0x36   : > { %p4456_p3 = pnand %p4455_p0, %p4454_p13  ;;  %p4460_p9 = scmp.lt.u32.totalorder %s4458_s16, %s4453_s26 }
  0x37   : > { %p4462_p1 = scmp.lt.u32.totalorder %s4453_s26, %s4744_s19 }
  0x38   : > { %p4457_p5 = pneg %p4456_p3  ;;  %p4461_p2 = por %p4460_p9, %p4459_p7 }
  0x3a   : > { %p4463_p4 = por %p4462_p1, %p4461_p2 }
  0x3c   : > { %p4464_p6 = pnand %p4463_p4, %p4457_p5 }
  0x3e   : > { %4467 = shalt.err (!%p4464_p6)
}
  0x3f   : > { %s4468_s15 = scalar_lea.vmem %s4750_s10, 4096  ;;  %s4590_s18 = smov [#allocation4]  }
  0x40   : > { %p4469_p8 = scmp.ne.s32.totalorder %s4750_s10, %s4468_s15  ;;  %s4473_s7 = sshll.u32 %s4590_s18, 4  ;;  %s4474_s7 = int_to_ptr.vmem [resolvable:$false] %s4473_s7 }
  0x41   : > { %s4475_s30 = scalar_lea.vmem %s4474_s7, 8192  ;;  %p4476_p3 = scmp.lt.s32.totalorder %s4750_s10, %s4474_s7 }
  0x42   : > { %p4471_p10 = pnand %p4469_p8, %p4455_p0  ;;  %p4477_p7 = scmp.lt.s32.totalorder %s4475_s30, %s4468_s15 }
  0x44   : > { %p4472_p13 = pneg %p4471_p10  ;;  %p4478_p9 = por %p4477_p7, %p4476_p3 }
  0x46   : > { %p4479_p2 = pnand %p4478_p9, %p4472_p13 }
  0x48   : > { %4482 = shalt.err (!%p4479_p2)
}
  0x49   : > { %s4591_s26 = smov 128   ;;  %s4592_s12 = smov 8  }
  0x4a   : > { %4149 = dma.hbm_to_vmem [thread:$0]  (!%p4746_p11), %s4744_s19, 4096, %s4750_s10, %s4752_s20, %s4591_s26, %s4591_s26, %s4592_s12  }
  0x4b   : > { %p6432_p0 = scmp.ne.s32.totalorder %s6427_s29, 0 }
  0x4d   : > { %272 = sbr.rel (%p6432_p0) target bundleno = 1382 (0x566), region = 40 }
  0x54   : > { %s4783_s16 = sand.u32 1, %s4577_s22   ;;  %p6433_p5 = scmp.ne.s32.totalorder %s6425_s27, 0 }
  0x55   : > { %s4786_s17 = sshll.u32 %s4783_s16, 8  ;;  %s275_s8 = scalar_lea.sflag [#allocation5], %s4783_s16 }
  0x56   : > { %s4790_s15 = scalar_lea.vmem [#allocation4], %s4786_s17 }
  0x57   : > { %4556 = dma.done.wait (%p6433_p5), %s275_s8, 4096  }
  0x58   : > { %4558 = vsyncadd (%p6433_p5), %s275_s8, 4294963200  ;;  %p6434_p11 = scmp.eq.s32.totalorder %s4665_s25, 0 }
  0x5a   : > { %4560 = dma.done.wait (%p6434_p11), [#allocation8], 2624   ;;  %p6435_p1 = pmov %p6434_p11 }
  0x5b   : > { %p326_p4 = scmp.lt.s32.totalorder %s4665_s25, 1  ;;  %vm337_vm0 = vcmask 293888   ;;  %v4593_v0 = vmov 0.0   ;;  %vm340_vm1 = vcmask 287744   ;;  %s4594_s20 = smov 4   ;;  %vm426_vm2 = vcmask 31744  }
  0x5c   : > { %4562 = vsyncadd (%p6435_p1), [#allocation8], 4294964672  ;;  %345 = vst.msk [vmem:[#allocation2 + $0x30] sm:$0xff] %vm337_vm0, %v4593_v0  ;;  %s4595_s26 = smov 36   ;;  %s4596_s12 = smov 72   ;;  %vm619_vm3 = vcmask 293920  }
  0x5d   : > { %346 = vst.msk [vmem:[#allocation2 + $0x38] sm:$0xff] %vm337_vm0, %v4593_v0  ;;  %338 = vst.msk [vmem:[#allocation2] sm:$0xff] %vm337_vm0, %v4593_v0  ;;  %s4840_s27 = scalar_select %p326_p4, %s4665_s25, 1  ;;  %vm828_vm4 = vcmask 589088   ;;  %vm957_vm5 = vcmask 884288   ;;  %vm1086_vm6 = vcmask 1048416  }
  0x5e   : > { %339 = vst.msk [vmem:[#allocation2 + $0x8] sm:$0xff] %vm337_vm0, %v4593_v0  ;;  %342 = vst.msk [vmem:[#allocation2 + $0x18] sm:$0xff] %vm337_vm0, %v4593_v0  ;;  %s4597_s8 = smov 108   ;;  %s4600_s19 = smov 124   ;;  %vm1088_vm7 = vcmask 130048   ;;  %vm1232_vm8 = vcmask 425088  }
  0x5f   : > { %343 = vst.msk [vmem:[#allocation2 + $0x20] sm:$0xff] %vm337_vm0, %v4593_v0  ;;  %348 = vst.msk [vmem:[#allocation2 + $0x48] sm:$0xff] %vm337_vm0, %v4593_v0  ;;  %s3936_s29 = sshll.u32 %s4840_s27, 8  ;;  %s4598_s27 = smov 16   ;;  %vm1361_vm9 = vcmask 720288   ;;  %vm1622_vm10 = vcmask 261120  }
  0x60   : > { %349 = vst.msk [vmem:[#allocation2 + $0x50] sm:$0xff] %vm337_vm0, %v4593_v0  ;;  %351 = vst.msk [vmem:[#allocation2 + $0x60] sm:$0xff] %vm337_vm0, %v4593_v0  ;;  %s4864_s11 = scalar_lea.vmem %s6416_s1, %s3936_s29  ;;  %s4879_s30 = scalar_lea.vmem %s6415_s0, %s3936_s29  ;;  %vm1491_vm11 = vcmask 1015488   ;;  %vm1620_vm12 = vcmask 1048544   ;;  %vm2049_vm13 = vcmask 1041408   ;;  %vm1766_vm14 = vcmask 556288  }
  0x61   : > { %352 = vst.msk [vmem:[#allocation2 + $0x68] sm:$0xff] %vm337_vm0, %v4593_v0  ;;  %354 = vst.msk [vmem:[#allocation2 + $0x78] sm:$0xff] %vm337_vm0, %v4593_v0  ;;  %v461_v1 = vld [vmem:[%s4864_s11 + $0x10] sm:$0xff]  ;;  %v459_v2 = vld [vmem:[%s4864_s11] sm:$0xff]  ;;  %s4599_s29 = smov 52   ;;  %s4601_s10 = smov 88  }
  0x62   : > { %355 = vst.msk [vmem:[#allocation2 + $0x80] sm:$0xff] %vm337_vm0, %v4593_v0  ;;  %357 = vst.msk [vmem:[#allocation2 + $0x90] sm:$0xff] %vm337_vm0, %v4593_v0  ;;  %527 = vrot.lane.b32.xlu1 %v461_v1, %s4594_s20  ;;  %523 = vrot.lane.b32.xlu0 %v459_v2, %s4594_s20  ;;  %v462_v3 = vld [vmem:[%s4864_s11 + $0x18] sm:$0xff]  ;;  %v460_v4 = vld [vmem:[%s4864_s11 + $0x8] sm:$0xff]  ;;  %vm2000_vm15 = vcmask 556032   ;;  %s3671_s18 = scalar_lea.sflag [#allocation11], %s4783_s16 }
  0x63   : > { %358 = vst.msk [vmem:[#allocation2 + $0x98] sm:$0xff] %vm337_vm0, %v4593_v0  ;;  %360 = vst.msk [vmem:[#allocation2 + $0xa8] sm:$0xff] %vm337_vm0, %v4593_v0  ;;  %v484_v5 = vld [vmem:[%s4864_s11 + $0xc8] sm:$0xff]  ;;  %v483_v6 = vld [vmem:[%s4864_s11 + $0xc0] sm:$0xff] }
  0x64   : > { %361 = vst.msk [vmem:[#allocation2 + $0xb0] sm:$0xff] %vm337_vm0, %v4593_v0  ;;  %363 = vst.msk [vmem:[#allocation2 + $0xc0] sm:$0xff] %vm337_vm0, %v4593_v0  ;;  %v482_v7 = vld [vmem:[%s4864_s11 + $0xb8] sm:$0xff]  ;;  %v481_v8 = vld [vmem:[%s4864_s11 + $0xb0] sm:$0xff] }
  0x65   : > { %364 = vst.msk [vmem:[#allocation2 + $0xc8] sm:$0xff] %vm337_vm0, %v4593_v0  ;;  %366 = vst.msk [vmem:[#allocation2 + $0xd8] sm:$0xff] %vm337_vm0, %v4593_v0  ;;  %v395_v9 = vld [vmem:[%s4879_s30 + $0x10] sm:$0xff]  ;;  %v393_v10 = vld [vmem:[%s4879_s30] sm:$0xff] }
  0x66   : > { %367 = vst.msk [vmem:[#allocation2 + $0xe0] sm:$0xff] %vm337_vm0, %v4593_v0  ;;  %369 = vst.msk [vmem:[#allocation2 + $0xf0] sm:$0xff] %vm337_vm0, %v4593_v0  ;;  %529 = vrot.lane.b32.xlu1 %v462_v3, %s4594_s20  ;;  %525 = vrot.lane.b32.xlu0 %v460_v4, %s4594_s20  ;;  %v396_v11 = vld [vmem:[%s4879_s30 + $0x18] sm:$0xff]  ;;  %v394_v13 = vld [vmem:[%s4879_s30 + $0x8] sm:$0xff] }
  0x67   : > { %370 = vst.msk [vmem:[#allocation2 + $0xf8] sm:$0xff] %vm337_vm0, %v4593_v0  ;;  %372 = vst.msk [vmem:[#allocation2 + $0x108] sm:$0xff] %vm337_vm0, %v4593_v0  ;;  %v486_v12 = vld [vmem:[%s4864_s11 + $0xd8] sm:$0xff]  ;;  %v418_v14 = vld [vmem:[%s4879_s30 + $0xc8] sm:$0xff] }
  0x68   : > { %373 = vst.msk [vmem:[#allocation2 + $0x110] sm:$0xff] %vm337_vm0, %v4593_v0  ;;  %375 = vst.msk [vmem:[#allocation2 + $0x120] sm:$0xff] %vm337_vm0, %v4593_v0  ;;  %v485_v15 = vld [vmem:[%s4864_s11 + $0xd0] sm:$0xff]  ;;  %v417_v16 = vld [vmem:[%s4879_s30 + $0xc0] sm:$0xff] }
  0x69   : > { %376 = vst.msk [vmem:[#allocation2 + $0x128] sm:$0xff] %vm337_vm0, %v4593_v0  ;;  %378 = vst.msk [vmem:[#allocation2 + $0x138] sm:$0xff] %vm337_vm0, %v4593_v0  ;;  %v416_v17 = vld [vmem:[%s4879_s30 + $0xb8] sm:$0xff]  ;;  %v415_v18 = vld [vmem:[%s4879_s30 + $0xb0] sm:$0xff] }
  0x6a   : > { %379 = vst.msk [vmem:[#allocation2 + $0x140] sm:$0xff] %vm337_vm0, %v4593_v0  ;;  %381 = vst.msk [vmem:[#allocation2 + $0x150] sm:$0xff] %vm337_vm0, %v4593_v0  ;;  %573 = vrot.lane.b32.xlu1 %v484_v5, %s4594_s20  ;;  %571 = vrot.lane.b32.xlu0 %v483_v6, %s4594_s20  ;;  %v420_v19 = vld [vmem:[%s4879_s30 + $0xd8] sm:$0xff]  ;;  %v419_v20 = vld [vmem:[%s4879_s30 + $0xd0] sm:$0xff] }
  0x6b   : > { %382 = vst.msk [vmem:[#allocation2 + $0x158] sm:$0xff] %vm337_vm0, %v4593_v0  ;;  %384 = vst.msk [vmem:[#allocation2 + $0x168] sm:$0xff] %vm337_vm0, %v4593_v0  ;;  %v464_v21 = vld [vmem:[%s4864_s11 + $0x28] sm:$0xff]  ;;  %v463_v22 = vld [vmem:[%s4864_s11 + $0x20] sm:$0xff] }
  0x6c   : > { %385 = vst.msk [vmem:[#allocation2 + $0x170] sm:$0xff] %vm337_vm0, %v4593_v0  ;;  %387 = vst.msk [vmem:[#allocation2 + $0x180] sm:$0xff] %vm337_vm0, %v4593_v0  ;;  %v488_v23 = vld [vmem:[%s4864_s11 + $0xe8] sm:$0xff]  ;;  %v487_v24 = vld [vmem:[%s4864_s11 + $0xe0] sm:$0xff] }
  0x6d   : > { %388 = vst.msk [vmem:[#allocation2 + $0x188] sm:$0xff] %vm337_vm0, %v4593_v0  ;;  %390 = vst.msk [vmem:[#allocation2 + $0x198] sm:$0xff] %vm337_vm0, %v4593_v0  ;;  %v398_v25 = vld [vmem:[%s4879_s30 + $0x28] sm:$0xff]  ;;  %v397_v26 = vld [vmem:[%s4879_s30 + $0x20] sm:$0xff] }
  0x6e   : > { %391 = vst.msk [vmem:[#allocation2 + $0x1a0] sm:$0xff] %vm337_vm0, %v4593_v0  ;;  %569 = vrot.lane.b32.xlu1 %v482_v7, %s4594_s20  ;;  %567 = vrot.lane.b32.xlu0 %v481_v8, %s4594_s20  ;;  %v466_v27 = vld [vmem:[%s4864_s11 + $0x38] sm:$0xff]  ;;  %v465_v28 = vld [vmem:[%s4864_s11 + $0x30] sm:$0xff]  ;;  %v716_v45 = vld [vmem:[#allocation2 + $0x1] sm:$0xff] }
  0x6f   : > { %341 = vst.msk [vmem:[#allocation2 + $0x10] sm:$0x3] %vm340_vm1, %v4593_v0  ;;  %344 = vst.msk [vmem:[#allocation2 + $0x28] sm:$0x3] %vm340_vm1, %v4593_v0  ;;  %v490_v29 = vld [vmem:[%s4864_s11 + $0xf8] sm:$0xff]  ;;  %v489_v30 = vld [vmem:[%s4864_s11 + $0xf0] sm:$0xff] }
  0x70   : > { %347 = vst.msk [vmem:[#allocation2 + $0x40] sm:$0x3] %vm340_vm1, %v4593_v0  ;;  %350 = vst.msk [vmem:[#allocation2 + $0x58] sm:$0x3] %vm340_vm1, %v4593_v0  ;;  %v422_v31 = vld [vmem:[%s4879_s30 + $0xe8] sm:$0xff]  ;;  %v421_v32 = vld [vmem:[%s4879_s30 + $0xe0] sm:$0xff] }
  0x71   : > { %353 = vst.msk [vmem:[#allocation2 + $0x70] sm:$0x3] %vm340_vm1, %v4593_v0  ;;  %356 = vst.msk [vmem:[#allocation2 + $0x88] sm:$0x3] %vm340_vm1, %v4593_v0  ;;  %v468_v33 = vld [vmem:[%s4864_s11 + $0x48] sm:$0xff]  ;;  %v467_v34 = vld [vmem:[%s4864_s11 + $0x40] sm:$0xff] }
  0x72   : > { %359 = vst.msk [vmem:[#allocation2 + $0xa0] sm:$0x3] %vm340_vm1, %v4593_v0  ;;  %362 = vst.msk [vmem:[#allocation2 + $0xb8] sm:$0x3] %vm340_vm1, %v4593_v0  ;;  %577 = vrot.lane.b32.xlu1 %v486_v12, %s4594_s20  ;;  %575 = vrot.lane.b32.xlu0 %v485_v15, %s4594_s20  ;;  %v470_v35 = vld [vmem:[%s4864_s11 + $0x58] sm:$0xff]  ;;  %v469_v36 = vld [vmem:[%s4864_s11 + $0x50] sm:$0xff] }
  0x73   : > { %365 = vst.msk [vmem:[#allocation2 + $0xd0] sm:$0x3] %vm340_vm1, %v4593_v0  ;;  %368 = vst.msk [vmem:[#allocation2 + $0xe8] sm:$0x3] %vm340_vm1, %v4593_v0  ;;  %v472_v37 = vld [vmem:[%s4864_s11 + $0x68] sm:$0xff]  ;;  %v471_v38 = vld [vmem:[%s4864_s11 + $0x60] sm:$0xff] }
  0x74   : > { %371 = vst.msk [vmem:[#allocation2 + $0x100] sm:$0x3] %vm340_vm1, %v4593_v0  ;;  %374 = vst.msk [vmem:[#allocation2 + $0x118] sm:$0x3] %vm340_vm1, %v4593_v0  ;;  %v474_v39 = vld [vmem:[%s4864_s11 + $0x78] sm:$0xff]  ;;  %v473_v40 = vld [vmem:[%s4864_s11 + $0x70] sm:$0xff] }
  0x75   : > { %377 = vst.msk [vmem:[#allocation2 + $0x130] sm:$0x3] %vm340_vm1, %v4593_v0  ;;  %380 = vst.msk [vmem:[#allocation2 + $0x148] sm:$0x3] %vm340_vm1, %v4593_v0  ;;  %v476_v41 = vld [vmem:[%s4864_s11 + $0x88] sm:$0xff]  ;;  %v475_v42 = vld [vmem:[%s4864_s11 + $0x80] sm:$0xff] }
  0x76   : > { %383 = vst.msk [vmem:[#allocation2 + $0x160] sm:$0x3] %vm340_vm1, %v4593_v0  ;;  %386 = vst.msk [vmem:[#allocation2 + $0x178] sm:$0x3] %vm340_vm1, %v4593_v0  ;;  %533 = vrot.lane.b32.xlu1 %v464_v21, %s4594_s20  ;;  %531 = vrot.lane.b32.xlu0 %v463_v22, %s4594_s20  ;;  %v400_v43 = vld [vmem:[%s4879_s30 + $0x38] sm:$0xff]  ;;  %v399_v44 = vld [vmem:[%s4879_s30 + $0x30] sm:$0xff] }
  0x77   : > { %389 = vst.msk [vmem:[#allocation2 + $0x190] sm:$0x3] %vm340_vm1, %v4593_v0  ;;  %392 = vst.msk [vmem:[#allocation2 + $0x1a8] sm:$0x3] %vm340_vm1, %v4593_v0  ;;  %v478_v46 = vld [vmem:[%s4864_s11 + $0x98] sm:$0xff]  ;;  %v717_v47 = vld [vmem:[#allocation2 + $0x9] sm:$0xff] }
  0x78   : > { %429 = vst.msk [vmem:[#allocation2 + $0x31] sm:$0xff] %vm426_vm2, %v395_v9  ;;  %427 = vst.msk [vmem:[#allocation2 + $0x19] sm:$0xff] %vm426_vm2, %v393_v10  ;;  %v477_v48 = vld [vmem:[%s4864_s11 + $0x90] sm:$0xff]  ;;  %v748_v49 = vpack.c.bf16 %v717_v47, %v716_v45  ;;  %v480_v50 = vld [vmem:[%s4864_s11 + $0xa8] sm:$0xff] }
  0x79   : > { %430 = vst.msk [vmem:[#allocation2 + $0x39] sm:$0xff] %vm426_vm2, %v396_v11  ;;  %428 = vst.msk [vmem:[#allocation2 + $0x21] sm:$0xff] %vm426_vm2, %v394_v13  ;;  %v424_v51 = vld [vmem:[%s4879_s30 + $0xf8] sm:$0xff]  ;;  %v423_v52 = vld [vmem:[%s4879_s30 + $0xf0] sm:$0xff] }
  0x7a   : > { %452 = vst.msk [vmem:[#allocation2 + $0x141] sm:$0xff] %vm426_vm2, %v418_v14  ;;  %451 = vst.msk [vmem:[#allocation2 + $0x139] sm:$0xff] %vm426_vm2, %v417_v16  ;;  %581 = vrot.lane.b32.xlu1 %v488_v23, %s4594_s20  ;;  %579 = vrot.lane.b32.xlu0 %v487_v24, %s4594_s20  ;;  %v479_v53 = vld [vmem:[%s4864_s11 + $0xa0] sm:$0xff]  ;;  %v846_v55 = vld [vmem:[#allocation2 + $0xa] sm:$0xff]  ;;  %s4602_s11 = smov 32  }
  0x7b   : > { %450 = vst.msk [vmem:[#allocation2 + $0x129] sm:$0xff] %vm426_vm2, %v416_v17  ;;  %449 = vst.msk [vmem:[#allocation2 + $0x121] sm:$0xff] %vm426_vm2, %v415_v18  ;;  %v845_v54 = vld [vmem:[#allocation2 + $0x2] sm:$0xff]  ;;  %v404_v59 = vld [vmem:[%s4879_s30 + $0x58] sm:$0xff] }
  0x7c   : > { %454 = vst.msk [vmem:[#allocation2 + $0x159] sm:$0xff] %vm426_vm2, %v420_v19  ;;  %453 = vst.msk [vmem:[#allocation2 + $0x151] sm:$0xff] %vm426_vm2, %v419_v20  ;;  %v877_v56 = vpack.c.bf16 %v846_v55, %v845_v54  ;;  %v402_v57 = vld [vmem:[%s4879_s30 + $0x48] sm:$0xff]  ;;  %v401_v58 = vld [vmem:[%s4879_s30 + $0x40] sm:$0xff] }
  0x7d   : > { %432 = vst.msk [vmem:[#allocation2 + $0x51] sm:$0xff] %vm426_vm2, %v398_v25  ;;  %431 = vst.msk [vmem:[#allocation2 + $0x49] sm:$0xff] %vm426_vm2, %v397_v26  ;;  %v406_v60 = vld [vmem:[%s4879_s30 + $0x68] sm:$0xff]  ;;  %v403_v61 = vld [vmem:[%s4879_s30 + $0x50] sm:$0xff] }
  0x7e   : > { %537 = vrot.lane.b32.xlu1 %v466_v27, %s4594_s20  ;;  %535 = vrot.lane.b32.xlu0 %v465_v28, %s4594_s20  ;;  %456 = vst.msk [vmem:[#allocation2 + $0x171] sm:$0xff] %vm426_vm2, %v422_v31  ;;  %455 = vst.msk [vmem:[#allocation2 + $0x169] sm:$0xff] %vm426_vm2, %v421_v32  ;;  %v408_v62 = vld [vmem:[%s4879_s30 + $0x78] sm:$0xff]  ;;  %v405_v63 = vld [vmem:[%s4879_s30 + $0x60] sm:$0xff] }
  0x7f   : > { %434 = vst.msk [vmem:[#allocation2 + $0x69] sm:$0xff] %vm426_vm2, %v400_v43  ;;  %433 = vst.msk [vmem:[#allocation2 + $0x61] sm:$0xff] %vm426_vm2, %v399_v44  ;;  %v410_v0 = vld [vmem:[%s4879_s30 + $0x88] sm:$0xff]  ;;  %v407_v1 = vld [vmem:[%s4879_s30 + $0x70] sm:$0xff] }
  0x80   : > { %458 = vst.msk [vmem:[#allocation2 + $0x189] sm:$0xff] %vm426_vm2, %v424_v51  ;;  %457 = vst.msk [vmem:[#allocation2 + $0x181] sm:$0xff] %vm426_vm2, %v423_v52  ;;  %v412_v2 = vld [vmem:[%s4879_s30 + $0x98] sm:$0xff]  ;;  %v409_v3 = vld [vmem:[%s4879_s30 + $0x80] sm:$0xff] }
  0x81   : > { %436 = vst.msk [vmem:[#allocation2 + $0x81] sm:$0xff] %vm426_vm2, %v402_v57  ;;  %435 = vst.msk [vmem:[#allocation2 + $0x79] sm:$0xff] %vm426_vm2, %v401_v58  ;;  %v4212_v4 = vld [vmem:[#allocation7 + $0x40] sm:$0xff]   ;;  %v653_v6 = vld [vmem:[#allocation2 + $0x8] sm:$0xff] }
  0x82   : > { %585 = vrot.lane.b32.xlu1 %v490_v29, %s4594_s20  ;;  %583 = vrot.lane.b32.xlu0 %v489_v30, %s4594_s20  ;;  %438 = vst.msk [vmem:[#allocation2 + $0x99] sm:$0xff] %vm426_vm2, %v404_v59  ;;  %440 = vst.msk [vmem:[#allocation2 + $0xb1] sm:$0xff] %vm426_vm2, %v406_v60  ;;  %v4213_v5 = vld [vmem:[#allocation7] sm:$0xff]   ;;  %v652_v7 = vld [vmem:[#allocation2] sm:$0xff] }
  0x83   : > { %437 = vst.msk [vmem:[#allocation2 + $0x91] sm:$0xff] %vm426_vm2, %v403_v61  ;;  %442 = vst.msk [vmem:[#allocation2 + $0xc9] sm:$0xff] %vm426_vm2, %v408_v62  ;;  %v411_v8 = vld [vmem:[%s4879_s30 + $0x90] sm:$0xff]  ;;  %3940 = vmatprep.subr.bf16.mxu0 %v4212_v4  ;;  %v684_v9 = vpack.c.bf16 %v653_v6, %v652_v7  ;;  %4115 = vmatprep.subr.bf16.mxu1 %v4212_v4  ;;  %v4214_v10 = vld [vmem:[#allocation7 + $0x48] sm:$0xff]  }
  0x84   : > { %439 = vst.msk [vmem:[#allocation2 + $0xa9] sm:$0xff] %vm426_vm2, %v405_v63  ;;  %444 = vst.msk [vmem:[#allocation2 + $0xe1] sm:$0xff] %vm426_vm2, %v410_v0  ;;  %3941 = vmatpush3.bf16.msra.mxu0 %v4213_v5  ;;  %4123 = vmatpush3.bf16.msra.mxu1 %v4213_v5  ;;  %v4215_v11 = vld [vmem:[#allocation7 + $0x8] sm:$0xff]   ;;  %v413_v12 = vld [vmem:[%s4879_s30 + $0xa0] sm:$0xff] }
  0x85   : > { %441 = vst.msk [vmem:[#allocation2 + $0xc1] sm:$0xff] %vm426_vm2, %v407_v1  ;;  %446 = vst.msk [vmem:[#allocation2 + $0xf9] sm:$0xff] %vm426_vm2, %v412_v2  ;;  %3942 = vmatprep.subr.bf16.mxu0 %v4214_v10  ;;  %4116 = vmatprep.subr.bf16.mxu1 %v4214_v10  ;;  %v4216_v13 = vld [vmem:[#allocation7 + $0x50] sm:$0xff]   ;;  %v414_v15 = vld [vmem:[%s4879_s30 + $0xa8] sm:$0xff]  ;;  %s4605_s30 = smov [#allocation10]  }
  0x86   : > { %541 = vrot.lane.b32.xlu1 %v468_v33, %s4594_s20  ;;  %539 = vrot.lane.b32.xlu0 %v467_v34, %s4594_s20  ;;  %443 = vst.msk [vmem:[#allocation2 + $0xd9] sm:$0xff] %vm426_vm2, %v409_v3  ;;  %445 = vst.msk [vmem:[#allocation2 + $0xf1] sm:$0xff] %vm426_vm2, %v411_v8  ;;  %v4217_v14 = vld [vmem:[#allocation7 + $0x10] sm:$0xff]   ;;  %v4218_v16 = vld [vmem:[#allocation7 + $0x58] sm:$0xff]  }
  0x87   : > { %700 = vst.msk [vmem:[#allocation3] sm:$0xff] %vm337_vm0, %v684_v9  ;;  %v4219_v17 = vld [vmem:[#allocation7 + $0x18] sm:$0xff]   ;;  %v4220_v20 = vld [vmem:[#allocation7 + $0x60] sm:$0xff]   ;;  %v4222_v24 = vld [vmem:[#allocation7 + $0x68] sm:$0xff]  }
  0x88   : > { %447 = vst.msk [vmem:[#allocation2 + $0x109] sm:$0xff] %vm426_vm2, %v413_v12  ;;  %3943 = vmatpush3.bf16.msra.mxu0 %v4215_v11  ;;  %4124 = vmatpush3.bf16.msra.mxu1 %v4215_v11  ;;  %448 = vst.msk [vmem:[#allocation2 + $0x111] sm:$0xff] %vm426_vm2, %v414_v15  ;;  %v4221_v21 = vld [vmem:[#allocation7 + $0x20] sm:$0xff]   ;;  %v4223_v25 = vld [vmem:[#allocation7 + $0x28] sm:$0xff]  }
  0x89   : > { %3944 = vmatprep.subr.bf16.mxu0 %v4216_v13  ;;  %4117 = vmatprep.subr.bf16.mxu1 %v4216_v13  ;;  %v4224_v30 = vld [vmem:[#allocation7 + $0x70] sm:$0xff]   ;;  %v4226_v44 = vld [vmem:[#allocation7 + $0x78] sm:$0xff]  }
  0x8a   : > { %545 = vrot.lane.b32.xlu1 %v470_v35, %s4594_s20  ;;  %543 = vrot.lane.b32.xlu0 %v469_v36, %s4594_s20  ;;  %v4225_v31 = vld [vmem:[#allocation7 + $0x30] sm:$0xff]   ;;  %v4227_v45 = vld [vmem:[#allocation7 + $0x38] sm:$0xff]  }
  0x8c   : > { %3945 = vmatpush3.bf16.msra.mxu0 %v4217_v14  ;;  %4125 = vmatpush3.bf16.msra.mxu1 %v4217_v14 }
  0x8d   : > { %3946 = vmatprep.subr.bf16.mxu0 %v4218_v16  ;;  %4118 = vmatprep.subr.bf16.mxu1 %v4218_v16 }
  0x8e   : > { %549 = vrot.lane.b32.xlu1 %v472_v37, %s4594_s20  ;;  %547 = vrot.lane.b32.xlu0 %v471_v38, %s4594_s20 }
  0x90   : > { %3947 = vmatpush3.bf16.msra.mxu0 %v4219_v17  ;;  %4126 = vmatpush3.bf16.msra.mxu1 %v4219_v17 }
  0x91   : > { %3948 = vmatprep.subr.bf16.mxu0 %v4220_v20  ;;  %4119 = vmatprep.subr.bf16.mxu1 %v4220_v20 }
  0x92   : > { %553 = vrot.lane.b32.xlu1 %v474_v39, %s4594_s20  ;;  %551 = vrot.lane.b32.xlu0 %v473_v40, %s4594_s20 }
  0x94   : > { %3949 = vmatpush3.bf16.msra.mxu0 %v4221_v21  ;;  %4127 = vmatpush3.bf16.msra.mxu1 %v4221_v21 }
  0x95   : > { %3950 = vmatprep.subr.bf16.mxu0 %v4222_v24  ;;  %4120 = vmatprep.subr.bf16.mxu1 %v4222_v24 }
  0x96   : > { %557 = vrot.lane.b32.xlu1 %v476_v41, %s4594_s20  ;;  %555 = vrot.lane.b32.xlu0 %v475_v42, %s4594_s20 }
  0x98   : > { %3951 = vmatpush3.bf16.msra.mxu0 %v4223_v25  ;;  %4128 = vmatpush3.bf16.msra.mxu1 %v4223_v25 }
  0x99   : > { %3952 = vmatprep.subr.bf16.mxu0 %v4224_v30  ;;  %4121 = vmatprep.subr.bf16.mxu1 %v4224_v30 }
  0x9a   : > { %561 = vrot.lane.b32.xlu1 %v478_v46, %s4594_s20  ;;  %559 = vrot.lane.b32.xlu0 %v477_v48, %s4594_s20 }
  0x9c   : > { %3953 = vmatpush3.bf16.msra.mxu0 %v4225_v31  ;;  %4129 = vmatpush3.bf16.msra.mxu1 %v4225_v31 }
  0x9d   : > { %3954 = vmatprep.subr.bf16.mxu0 %v4226_v44  ;;  %4122 = vmatprep.subr.bf16.mxu1 %v4226_v44 }
  0x9e   : > { %780 = vrot.lane.b32.xlu1 %v748_v49, %s4595_s26  ;;  %565 = vrot.lane.b32.xlu0 %v480_v50, %s4594_s20 }
  0xa0   : > { %3955 = vmatpush3.bf16.msra.mxu0 %v4227_v45  ;;  %4130 = vmatpush3.bf16.msra.mxu1 %v4227_v45 }
  0xa2   : > { %563 = vrot.lane.b32.xlu1 %v479_v53, %s4594_s20  ;;  %s6262_s20 = scalar_lea.vmem [#allocation9], %s4786_s17 }
  0xa6   : > { %909 = vrot.lane.b32.xlu1 %v877_v56, %s4596_s12 }
  0xd4   : > { %v528_v18 = vpop.permute.xlu1 %527  ;;  %v524_v19 = vpop.permute.xlu0 %523 }
  0xd5   : > { %622 = vst.msk [vmem:[#allocation2 + $0x31] sm:$0xff] %vm619_vm3, %v528_v18  ;;  %620 = vst.msk [vmem:[#allocation2 + $0x19] sm:$0xff] %vm619_vm3, %v524_v19 }
  0xd8   : > { %v530_v22 = vpop.permute.xlu1 %529  ;;  %v526_v23 = vpop.permute.xlu0 %525 }
  0xd9   : > { %623 = vst.msk [vmem:[#allocation2 + $0x39] sm:$0xff] %vm619_vm3, %v530_v22  ;;  %621 = vst.msk [vmem:[#allocation2 + $0x21] sm:$0xff] %vm619_vm3, %v526_v23 }
  0xdc   : > { %v574_v26 = vpop.permute.xlu1 %573  ;;  %v572_v27 = vpop.permute.xlu0 %571  ;;  %v974_v28 = vld [vmem:[#allocation2 + $0x18] sm:$0xff]  ;;  %v656_v36 = vld [vmem:[#allocation2 + $0x30] sm:$0xff] }
  0xdd   : > { %645 = vst.msk [vmem:[#allocation2 + $0x141] sm:$0xff] %vm619_vm3, %v574_v26  ;;  %644 = vst.msk [vmem:[#allocation2 + $0x139] sm:$0xff] %vm619_vm3, %v572_v27  ;;  %v1120_v29 = vld [vmem:[#allocation2 + $0x19] sm:$0xff]  ;;  %v1508_v40 = vld [vmem:[#allocation2 + $0x31] sm:$0xff] }
  0xde   : > { %v1379_v53 = vld [vmem:[#allocation2 + $0x30] sm:$0xff] }
  0xe0   : > { %v570_v32 = vpop.permute.xlu1 %569  ;;  %v568_v33 = vpop.permute.xlu0 %567  ;;  %v975_v34 = vld [vmem:[#allocation2 + $0x20] sm:$0xff]  ;;  %v657_v43 = vld [vmem:[#allocation2 + $0x38] sm:$0xff] }
  0xe1   : > { %v1121_v35 = vld [vmem:[#allocation2 + $0x21] sm:$0xff]  ;;  %643 = vst.msk [vmem:[#allocation2 + $0x129] sm:$0xff] %vm619_vm3, %v570_v32  ;;  %642 = vst.msk [vmem:[#allocation2 + $0x121] sm:$0xff] %vm619_vm3, %v568_v33  ;;  %v1006_v37 = vpack.c.bf16 %v975_v34, %v974_v28  ;;  %v1509_v42 = vld [vmem:[#allocation2 + $0x39] sm:$0xff]  ;;  %v686_v46 = vpack.c.bf16 %v657_v43, %v656_v36 }
  0xe2   : > { %v5010_v38 = vpack.c.bf16 %v1121_v35, %v1120_v29  ;;  %v1249_v39 = vld [vmem:[#allocation2 + $0x1a] sm:$0xff]  ;;  %v1250_v41 = vld [vmem:[#allocation2 + $0x22] sm:$0xff]  ;;  %v5020_v52 = vpack.c.bf16 %v1509_v42, %v1508_v40  ;;  %v1251_v44 = vld [vmem:[#allocation2 + $0x32] sm:$0xff] }
  0xe3   : > { %1038 = vrot.lane.b32.xlu0 %v1006_v37, %s4597_s8  ;;  %701 = vst.msk [vmem:[#allocation3 + $0x18] sm:$0xff] %vm337_vm0, %v1006_v37  ;;  %v5018_v51 = vpack.c.bf16 %v1250_v41, %v1249_v39  ;;  %702 = vst.msk [vmem:[#allocation3 + $0x30] sm:$0xff] %vm337_vm0, %v686_v46  ;;  %v1380_v54 = vld [vmem:[#allocation2 + $0x38] sm:$0xff] }
  0xe4   : > { %1184 = vrot.lane.b32.xlu1 %v5010_v38, %s4598_s27  ;;  %v578_v47 = vpop.permute.xlu1 %577  ;;  %v576_v48 = vpop.permute.xlu0 %575  ;;  %v1273_v49 = vld [vmem:[#allocation2 + $0x13a] sm:$0xff]  ;;  %v1274_v50 = vld [vmem:[#allocation2 + $0x142] sm:$0xff]  ;;  %v1411_v61 = vpack.c.bf16 %v1380_v54, %v1379_v53 }
  0xe5   : > { %647 = vst.msk [vmem:[#allocation2 + $0x159] sm:$0xff] %vm619_vm3, %v578_v47  ;;  %646 = vst.msk [vmem:[#allocation2 + $0x151] sm:$0xff] %vm619_vm3, %v576_v48  ;;  %v678_v55 = vld [vmem:[#allocation2 + $0x138] sm:$0xff]  ;;  %v679_v56 = vld [vmem:[#allocation2 + $0x140] sm:$0xff]  ;;  %v5027_v57 = vpack.c.bf16 %v1274_v50, %v1273_v49 }
  0xe6   : > { %v5029_v58 = vpack.c.bf16 %v679_v56, %v678_v55  ;;  %v998_v0 = vld [vmem:[#allocation2 + $0x138] sm:$0xff]  ;;  %v999_v1 = vld [vmem:[#allocation2 + $0x140] sm:$0xff] }
  0xe7   : > { %1313 = vrot.lane.b32.xlu0 %v5018_v51, %s4599_s29  ;;  %v1018_v7 = vpack.c.bf16 %v999_v1, %v998_v0  ;;  %v1144_v9 = vld [vmem:[#allocation2 + $0x139] sm:$0xff]  ;;  %v1145_v10 = vld [vmem:[#allocation2 + $0x141] sm:$0xff] }
  0xe8   : > { %1572 = vrot.lane.b32.xlu1 %v5020_v52, %s4600_s19  ;;  %v534_v59 = vpop.permute.xlu1 %533  ;;  %v532_v60 = vpop.permute.xlu0 %531  ;;  %v676_v62 = vld [vmem:[#allocation2 + $0x120] sm:$0xff]  ;;  %v677_v63 = vld [vmem:[#allocation2 + $0x128] sm:$0xff]  ;;  %713 = vst.msk [vmem:[#allocation3 + $0x138] sm:$0xff] %vm337_vm0, %v5029_v58  ;;  %v5049_v16 = vpack.c.bf16 %v1145_v10, %v1144_v9 }
  0xe9   : > { %625 = vst.msk [vmem:[#allocation2 + $0x51] sm:$0xff] %vm619_vm3, %v534_v59  ;;  %624 = vst.msk [vmem:[#allocation2 + $0x49] sm:$0xff] %vm619_vm3, %v532_v60  ;;  %v5035_v2 = vpack.c.bf16 %v677_v63, %v676_v62  ;;  %v740_v17 = vld [vmem:[#allocation2 + $0x121] sm:$0xff]  ;;  %v741_v18 = vld [vmem:[#allocation2 + $0x129] sm:$0xff] }
  0xea   : > { %v760_v24 = vpack.c.bf16 %v741_v18, %v740_v17  ;;  %v869_v25 = vld [vmem:[#allocation2 + $0x122] sm:$0xff]  ;;  %v870_v26 = vld [vmem:[#allocation2 + $0x12a] sm:$0xff]  ;;  %v1252_v45 = vld [vmem:[#allocation2 + $0x3a] sm:$0xff] }
  0xeb   : > { %1443 = vrot.lane.b32.xlu0 %v1411_v61, %s4601_s10  ;;  %712 = vst.msk [vmem:[#allocation3 + $0x120] sm:$0xff] %vm337_vm0, %v5035_v2  ;;  %v889_v32 = vpack.c.bf16 %v870_v26, %v869_v25  ;;  %v5080_v50 = vpack.c.bf16 %v1252_v45, %v1251_v44 }
  0xec   : > { %1337 = vrot.lane.b32.xlu1 %v5027_v57, %s4599_s29  ;;  %v1403_v3 = vld [vmem:[#allocation2 + $0x150] sm:$0xff]  ;;  %v1404_v4 = vld [vmem:[#allocation2 + $0x158] sm:$0xff]  ;;  %v582_v5 = vpop.permute.xlu1 %581  ;;  %v580_v6 = vpop.permute.xlu0 %579 }
  0xed   : > { %v5042_v8 = vpack.c.bf16 %v1404_v4, %v1403_v3  ;;  %649 = vst.msk [vmem:[#allocation2 + $0x171] sm:$0xff] %vm619_vm3, %v582_v5  ;;  %648 = vst.msk [vmem:[#allocation2 + $0x169] sm:$0xff] %vm619_vm3, %v580_v6  ;;  %v680_v11 = vld [vmem:[#allocation2 + $0x150] sm:$0xff]  ;;  %v681_v12 = vld [vmem:[#allocation2 + $0x158] sm:$0xff] }
  0xee   : > { %v698_v13 = vpack.c.bf16 %v681_v12, %v680_v11  ;;  %v1532_v33 = vld [vmem:[#allocation2 + $0x151] sm:$0xff]  ;;  %v1533_v34 = vld [vmem:[#allocation2 + $0x159] sm:$0xff] }
  0xef   : > { %1062 = vrot.lane.b32.xlu0 %v1018_v7, %s4597_s8  ;;  %v5069_v43 = vpack.c.bf16 %v1533_v34, %v1532_v33  ;;  %v1275_v53 = vld [vmem:[#allocation2 + $0x152] sm:$0xff]  ;;  %v1276_v54 = vld [vmem:[#allocation2 + $0x15a] sm:$0xff] }
  0xf0   : > { %1467 = vrot.lane.b32.xlu1 %v5042_v8, %s4601_s10  ;;  %v538_v14 = vpop.permute.xlu1 %537  ;;  %v536_v15 = vpop.permute.xlu0 %535  ;;  %714 = vst.msk [vmem:[#allocation3 + $0x150] sm:$0xff] %vm337_vm0, %v698_v13  ;;  %v658_v19 = vld [vmem:[#allocation2 + $0x48] sm:$0xff]  ;;  %v659_v20 = vld [vmem:[#allocation2 + $0x50] sm:$0xff]  ;;  %v5088_v0 = vpack.c.bf16 %v1276_v54, %v1275_v53 }
  0xf1   : > { %627 = vst.msk [vmem:[#allocation2 + $0x69] sm:$0xff] %vm619_vm3, %v538_v14  ;;  %626 = vst.msk [vmem:[#allocation2 + $0x61] sm:$0xff] %vm619_vm3, %v536_v15  ;;  %v687_v21 = vpack.c.bf16 %v659_v20, %v658_v19  ;;  %v1510_v39 = vld [vmem:[#allocation2 + $0x49] sm:$0xff]  ;;  %v1511_v40 = vld [vmem:[#allocation2 + $0x51] sm:$0xff] }
  0xf2   : > { %v1381_v46 = vld [vmem:[#allocation2 + $0x48] sm:$0xff]  ;;  %v1382_v47 = vld [vmem:[#allocation2 + $0x50] sm:$0xff] }
  0xf3   : > { %1208 = vrot.lane.b32.xlu0 %v5049_v16, %s4598_s27  ;;  %703 = vst.msk [vmem:[#allocation3 + $0x48] sm:$0xff] %vm337_vm0, %v687_v21 }
  0xf4   : > { %1040 = vrot.lane.b32.xlu1 %v1411_v61, %s4597_s8  ;;  %v586_v22 = vpop.permute.xlu1 %585  ;;  %v584_v23 = vpop.permute.xlu0 %583  ;;  %v682_v27 = vld [vmem:[#allocation2 + $0x168] sm:$0xff]  ;;  %v683_v28 = vld [vmem:[#allocation2 + $0x170] sm:$0xff] }
  0xf5   : > { %651 = vst.msk [vmem:[#allocation2 + $0x189] sm:$0xff] %vm619_vm3, %v586_v22  ;;  %650 = vst.msk [vmem:[#allocation2 + $0x181] sm:$0xff] %vm619_vm3, %v584_v23  ;;  %v699_v29 = vpack.c.bf16 %v683_v28, %v682_v27  ;;  %v1405_v60 = vld [vmem:[#allocation2 + $0x168] sm:$0xff]  ;;  %v1406_v61 = vld [vmem:[#allocation2 + $0x170] sm:$0xff] }
  0xf6   : > { %v5096_v4 = vpack.c.bf16 %v1406_v61, %v1405_v60  ;;  %v1534_v26 = vld [vmem:[#allocation2 + $0x169] sm:$0xff]  ;;  %v1535_v27 = vld [vmem:[#allocation2 + $0x171] sm:$0xff] }
  0xf7   : > { %804 = vrot.lane.b32.xlu0 %v760_v24, %s4595_s26  ;;  %715 = vst.msk [vmem:[#allocation3 + $0x168] sm:$0xff] %vm337_vm0, %v699_v29 }
  0xf8   : > { %1186 = vrot.lane.b32.xlu1 %v5020_v52, %s4598_s27  ;;  %v542_v30 = vpop.permute.xlu1 %541  ;;  %v540_v31 = vpop.permute.xlu0 %539  ;;  %v660_v35 = vld [vmem:[#allocation2 + $0x60] sm:$0xff]  ;;  %v661_v36 = vld [vmem:[#allocation2 + $0x68] sm:$0xff] }
  0xf9   : > { %629 = vst.msk [vmem:[#allocation2 + $0x81] sm:$0xff] %vm619_vm3, %v542_v30  ;;  %628 = vst.msk [vmem:[#allocation2 + $0x79] sm:$0xff] %vm619_vm3, %v540_v31  ;;  %v688_v37 = vpack.c.bf16 %v661_v36, %v660_v35  ;;  %v1513_v28 = vld [vmem:[#allocation2 + $0x69] sm:$0xff]  ;;  %v1553_v30 = vpack.c.bf16 %v1535_v27, %v1534_v26  ;;  %v1383_v33 = vld [vmem:[#allocation2 + $0x60] sm:$0xff] }
  0xfa   : > { %v1253_v31 = vld [vmem:[#allocation2 + $0x4a] sm:$0xff] }
  0xfb   : > { %933 = vrot.lane.b32.xlu0 %v889_v32, %s4596_s12  ;;  %704 = vst.msk [vmem:[#allocation3 + $0x60] sm:$0xff] %vm337_vm0, %v688_v37  ;;  %v1254_v32 = vld [vmem:[#allocation2 + $0x52] sm:$0xff]  ;;  %v1384_v34 = vld [vmem:[#allocation2 + $0x68] sm:$0xff] }
  0xfc   : > { %782 = vrot.lane.b32.xlu1 %v5010_v38, %s4595_s26  ;;  %v546_v41 = vpop.permute.xlu1 %545  ;;  %v544_v42 = vpop.permute.xlu0 %543  ;;  %v5078_v38 = vpack.c.bf16 %v1511_v40, %v1510_v39  ;;  %v5138_v35 = vpack.c.bf16 %v1254_v32, %v1253_v31  ;;  %v1277_v37 = vld [vmem:[#allocation2 + $0x16a] sm:$0xff]  ;;  %v1278_v39 = vld [vmem:[#allocation2 + $0x172] sm:$0xff]  ;;  %v1279_v61 = vld [vmem:[#allocation2 + $0x182] sm:$0xff] }
  0xfd   : > { %631 = vst.msk [vmem:[#allocation2 + $0x99] sm:$0xff] %vm619_vm3, %v546_v41  ;;  %630 = vst.msk [vmem:[#allocation2 + $0x91] sm:$0xff] %vm619_vm3, %v544_v42  ;;  %v1413_v41 = vpack.c.bf16 %v1384_v34, %v1383_v33  ;;  %v1407_v42 = vld [vmem:[#allocation2 + $0x180] sm:$0xff]  ;;  %v1408_v44 = vld [vmem:[#allocation2 + $0x188] sm:$0xff]  ;;  %v1295_v45 = vpack.c.bf16 %v1278_v39, %v1277_v37 }
  0xff   : > { %1596 = vrot.lane.b32.xlu0 %v5069_v43, %s4600_s19 }
 0x100   : > { %911 = vrot.lane.b32.xlu1 %v5018_v51, %s4596_s12  ;;  %v550_v48 = vpop.permute.xlu1 %549  ;;  %v548_v49 = vpop.permute.xlu0 %547  ;;  %v662_v55 = vld [vmem:[#allocation2 + $0x78] sm:$0xff]  ;;  %v663_v56 = vld [vmem:[#allocation2 + $0x80] sm:$0xff]  ;;  %v1412_v51 = vpack.c.bf16 %v1382_v47, %v1381_v46  ;;  %v1425_v46 = vpack.c.bf16 %v1408_v44, %v1407_v42 }
 0x101   : > { %633 = vst.msk [vmem:[#allocation2 + $0xb1] sm:$0xff] %vm619_vm3, %v550_v48  ;;  %632 = vst.msk [vmem:[#allocation2 + $0xa9] sm:$0xff] %vm619_vm3, %v548_v49  ;;  %v689_v59 = vpack.c.bf16 %v663_v56, %v662_v55  ;;  %v1536_v47 = vld [vmem:[#allocation2 + $0x181] sm:$0xff]  ;;  %v1537_v48 = vld [vmem:[#allocation2 + $0x189] sm:$0xff] }
 0x102   : > { %v1514_v49 = vld [vmem:[#allocation2 + $0x79] sm:$0xff]  ;;  %v1515_v53 = vld [vmem:[#allocation2 + $0x81] sm:$0xff]  ;;  %v1554_v54 = vpack.c.bf16 %v1537_v48, %v1536_v47  ;;  %v1256_v56 = vld [vmem:[#allocation2 + $0x6a] sm:$0xff] }
 0x103   : > { %1315 = vrot.lane.b32.xlu0 %v5080_v50, %s4599_s29  ;;  %705 = vst.msk [vmem:[#allocation3 + $0x78] sm:$0xff] %vm337_vm0, %v689_v59  ;;  %v1255_v55 = vld [vmem:[#allocation2 + $0x62] sm:$0xff] }
 0x104   : > { %1574 = vrot.lane.b32.xlu1 %v5078_v38, %s4600_s19  ;;  %v554_v62 = vpop.permute.xlu1 %553  ;;  %v552_v63 = vpop.permute.xlu0 %551  ;;  %v664_v1 = vld [vmem:[#allocation2 + $0x90] sm:$0xff]  ;;  %v665_v3 = vld [vmem:[#allocation2 + $0x98] sm:$0xff]  ;;  %v1386_v59 = vld [vmem:[#allocation2 + $0x80] sm:$0xff]  ;;  %v5166_v60 = vpack.c.bf16 %v1256_v56, %v1255_v55 }
 0x105   : > { %635 = vst.msk [vmem:[#allocation2 + $0xc9] sm:$0xff] %vm619_vm3, %v554_v62  ;;  %634 = vst.msk [vmem:[#allocation2 + $0xc1] sm:$0xff] %vm619_vm3, %v552_v63  ;;  %v690_v5 = vpack.c.bf16 %v665_v3, %v664_v1  ;;  %v1280_v62 = vld [vmem:[#allocation2 + $0x18a] sm:$0xff]  ;;  %v1409_v63 = vld [vmem:[#allocation2 + $0x198] sm:$0xff] }
 0x106   : > { %v1296_v1 = vpack.c.bf16 %v1280_v62, %v1279_v61  ;;  %v1260_v26 = vld [vmem:[#allocation2 + $0x9a] sm:$0xff] }
 0x107   : > { %1445 = vrot.lane.b32.xlu0 %v1412_v51, %s4601_s10  ;;  %706 = vst.msk [vmem:[#allocation3 + $0x90] sm:$0xff] %vm337_vm0, %v690_v5  ;;  %v1539_v5 = vld [vmem:[#allocation2 + $0x1a1] sm:$0xff] }
 0x108   : > { %1339 = vrot.lane.b32.xlu1 %v5088_v0, %s4599_s29  ;;  %v558_v6 = vpop.permute.xlu1 %557  ;;  %v556_v7 = vpop.permute.xlu0 %555  ;;  %v666_v9 = vld [vmem:[#allocation2 + $0xa8] sm:$0xff]  ;;  %v667_v10 = vld [vmem:[#allocation2 + $0xb0] sm:$0xff] }
 0x109   : > { %637 = vst.msk [vmem:[#allocation2 + $0xe1] sm:$0xff] %vm619_vm3, %v558_v6  ;;  %636 = vst.msk [vmem:[#allocation2 + $0xd9] sm:$0xff] %vm619_vm3, %v556_v7  ;;  %v691_v11 = vpack.c.bf16 %v667_v10, %v666_v9  ;;  %v5181_v6 = vld [vmem:[#allocation7 + $0x80] sm:$0xff]   ;;  %v1257_v9 = vld [vmem:[#allocation2 + $0x7a] sm:$0xff] }
 0x10a   : > { %4073 = vmatprep.subr.bf16.mxu1 %v5181_v6  ;;  %v1258_v10 = vld [vmem:[#allocation2 + $0x82] sm:$0xff]  ;;  %v1519_v34 = vld [vmem:[#allocation2 + $0xb1] sm:$0xff] }
 0x10b   : > { %1064 = vrot.lane.b32.xlu0 %v5042_v8, %s4597_s8  ;;  %707 = vst.msk [vmem:[#allocation3 + $0xa8] sm:$0xff] %vm337_vm0, %v691_v11  ;;  %v984_v11 = vld [vmem:[#allocation2 + $0x90] sm:$0xff] }
 0x10c   : > { %1469 = vrot.lane.b32.xlu1 %v5096_v4, %s4601_s10  ;;  %v562_v12 = vpop.permute.xlu1 %561  ;;  %v560_v13 = vpop.permute.xlu0 %559  ;;  %v988_v14 = vld [vmem:[#allocation2 + $0xc0] sm:$0xff]  ;;  %v989_v15 = vld [vmem:[#allocation2 + $0xc8] sm:$0xff] }
 0x10d   : > { %639 = vst.msk [vmem:[#allocation2 + $0xf9] sm:$0xff] %vm619_vm3, %v562_v12  ;;  %638 = vst.msk [vmem:[#allocation2 + $0xf1] sm:$0xff] %vm619_vm3, %v560_v13  ;;  %v5107_v17 = vpack.c.bf16 %v989_v15, %v988_v14  ;;  %v985_v12 = vld [vmem:[#allocation2 + $0x98] sm:$0xff]  ;;  %v5189_v15 = vpack.c.bf16 %v1258_v10, %v1257_v9  ;;  %v1518_v33 = vld [vmem:[#allocation2 + $0xa9] sm:$0xff] }
 0x10e   : > { %v5212_v37 = vpack.c.bf16 %v1519_v34, %v1518_v33  ;;  %v4231_v9 = vld [vmem:[#allocation7 + $0x98] sm:$0xff]  }
 0x10f   : > { %1210 = vrot.lane.b32.xlu0 %v5069_v43, %s4598_s27  ;;  %708 = vst.msk [vmem:[#allocation3 + $0xc0] sm:$0xff] %vm337_vm0, %v5107_v17 }
 0x110   : > { %1042 = vrot.lane.b32.xlu1 %v1412_v51, %s4597_s8  ;;  %v781_v8 = vpop.permute.xlu1 %780  ;;  %v566_v18 = vpop.permute.xlu0 %565  ;;  %v1393_v19 = vld [vmem:[#allocation2 + $0xd8] sm:$0xff]  ;;  %v1394_v20 = vld [vmem:[#allocation2 + $0xe0] sm:$0xff] }
 0x111   : > { %829 = vst.msk [vmem:[#allocation3] sm:$0xff] %vm828_vm4, %v781_v8  ;;  %v5117_v21 = vpack.c.bf16 %v1394_v20, %v1393_v19  ;;  %v1385_v51 = vld [vmem:[#allocation2 + $0x78] sm:$0xff]  ;;  %v1011_v8 = vpack.c.bf16 %v985_v12, %v984_v11 }
 0x112   : > { %641 = vst.msk [vmem:[#allocation2 + $0x111] sm:$0xff] %vm619_vm3, %v566_v18  ;;  %v1130_v18 = vld [vmem:[#allocation2 + $0x91] sm:$0xff]  ;;  %v1131_v19 = vld [vmem:[#allocation2 + $0x99] sm:$0xff] }
 0x113   : > { %806 = vrot.lane.b32.xlu0 %v5049_v16, %s4595_s26  ;;  %709 = vst.msk [vmem:[#allocation3 + $0xd8] sm:$0xff] %vm337_vm0, %v5117_v21  ;;  %v1512_v16 = vld [vmem:[#allocation2 + $0x61] sm:$0xff]  ;;  %v1522_v12 = vld [vmem:[#allocation2 + $0xd9] sm:$0xff] }
 0x114   : > { %1188 = vrot.lane.b32.xlu1 %v5078_v38, %s4598_s27  ;;  %v564_v22 = vpop.permute.xlu1 %563  ;;  %v992_v23 = vld [vmem:[#allocation2 + $0xf0] sm:$0xff]  ;;  %v993_v24 = vld [vmem:[#allocation2 + $0xf8] sm:$0xff] }
 0x115   : > { %640 = vst.msk [vmem:[#allocation2 + $0x109] sm:$0xff] %vm619_vm3, %v564_v22  ;;  %v5126_v25 = vpack.c.bf16 %v993_v24, %v992_v23  ;;  %v1157_v23 = vpack.c.bf16 %v1131_v19, %v1130_v18  ;;  %v1259_v24 = vld [vmem:[#allocation2 + $0x92] sm:$0xff] }
 0x117   : > { %935 = vrot.lane.b32.xlu0 %v5027_v57, %s4596_s12  ;;  %710 = vst.msk [vmem:[#allocation3 + $0xf0] sm:$0xff] %vm337_vm0, %v5126_v25  ;;  %v1542_v57 = vpack.c.bf16 %v1513_v28, %v1512_v16  ;;  %v5201_v28 = vpack.c.bf16 %v1260_v26, %v1259_v24  ;;  %v1669_v24 = vld [vmem:[#allocation2 + $0xe2] sm:$0xff] }
 0x118   : > { %784 = vrot.lane.b32.xlu1 %v5020_v52, %s4595_s26  ;;  %v910_v29 = vpop.permute.xlu1 %909 }
 0x119   : > { %958 = vst.msk [vmem:[#allocation3] sm:$0xff] %vm957_vm5, %v910_v29  ;;  %v1389_v29 = vld [vmem:[#allocation2 + $0xa8] sm:$0xff] }
 0x11b   : > { %1598 = vrot.lane.b32.xlu0 %v1553_v30, %s4600_s19 }
 0x11c   : > { %913 = vrot.lane.b32.xlu1 %v5080_v50, %s4596_s12  ;;  %v994_v52 = vld [vmem:[#allocation2 + $0x108] sm:$0xff]  ;;  %v995_v36 = vld [vmem:[#allocation2 + $0x110] sm:$0xff] }
 0x11d   : > { %v5140_v40 = vpack.c.bf16 %v995_v36, %v994_v52 }
 0x11f   : > { %1317 = vrot.lane.b32.xlu0 %v5138_v35, %s4599_s29  ;;  %711 = vst.msk [vmem:[#allocation3 + $0x108] sm:$0xff] %vm337_vm0, %v5140_v40 }
 0x120   : > { %1576 = vrot.lane.b32.xlu1 %v1542_v57, %s4600_s19 }
 0x123   : > { %1447 = vrot.lane.b32.xlu0 %v1413_v41, %s4601_s10 }
 0x124   : > { %1341 = vrot.lane.b32.xlu1 %v1295_v45, %s4599_s29 }
 0x127   : > { %1066 = vrot.lane.b32.xlu0 %v5096_v4, %s4597_s8  ;;  %v1538_v4 = vld [vmem:[#allocation2 + $0x199] sm:$0xff] }
 0x128   : > { %1471 = vrot.lane.b32.xlu1 %v1425_v46, %s4601_s10  ;;  %v1555_v7 = vpack.c.bf16 %v1539_v5, %v1538_v4 }
 0x12b   : > { %1212 = vrot.lane.b32.xlu0 %v1553_v30, %s4598_s27 }
 0x12c   : > { %1044 = vrot.lane.b32.xlu1 %v1413_v41, %s4597_s8 }
 0x12f   : > { %808 = vrot.lane.b32.xlu0 %v5069_v43, %s4595_s26  ;;  %v5164_v43 = vpack.c.bf16 %v1515_v53, %v1514_v49  ;;  %v1261_v49 = vld [vmem:[#allocation2 + $0xaa] sm:$0xff]  ;;  %v1262_v53 = vld [vmem:[#allocation2 + $0xb2] sm:$0xff] }
 0x130   : > { %1190 = vrot.lane.b32.xlu1 %v1542_v57, %s4598_s27 }
 0x133   : > { %937 = vrot.lane.b32.xlu0 %v5088_v0, %s4596_s12  ;;  %v1410_v0 = vld [vmem:[#allocation2 + $0x1a0] sm:$0xff] }
 0x134   : > { %786 = vrot.lane.b32.xlu1 %v5078_v38, %s4595_s26  ;;  %v1414_v38 = vpack.c.bf16 %v1386_v59, %v1385_v51  ;;  %v1426_v3 = vpack.c.bf16 %v1410_v0, %v1409_v63  ;;  %v1134_v51 = vld [vmem:[#allocation2 + $0xc1] sm:$0xff]  ;;  %v1135_v59 = vld [vmem:[#allocation2 + $0xc9] sm:$0xff] }
 0x135   : > { %v5255_v63 = vpack.c.bf16 %v1135_v59, %v1134_v51  ;;  %v1263_v0 = vld [vmem:[#allocation2 + $0xc2] sm:$0xff] }
 0x137   : > { %1600 = vrot.lane.b32.xlu0 %v1554_v54, %s4600_s19 }
 0x138   : > { %915 = vrot.lane.b32.xlu1 %v5138_v35, %s4596_s12 }
 0x13b   : > { %1319 = vrot.lane.b32.xlu0 %v5166_v60, %s4599_s29 }
 0x13c   : > { %1578 = vrot.lane.b32.xlu1 %v5164_v43, %s4600_s19 }
 0x13f   : > { %1449 = vrot.lane.b32.xlu0 %v1414_v38, %s4601_s10 }
 0x140   : > { %1343 = vrot.lane.b32.xlu1 %v1296_v1, %s4599_s29  ;;  %v1264_v1 = vld [vmem:[#allocation2 + $0xca] sm:$0xff] }
 0x143   : > { %1068 = vrot.lane.b32.xlu0 %v1425_v46, %s4597_s8 }
 0x144   : > { %1473 = vrot.lane.b32.xlu1 %v1426_v3, %s4601_s10  ;;  %v4230_v3 = vld [vmem:[#allocation7 + $0x90] sm:$0xff]  }
 0x147   : > { %1214 = vrot.lane.b32.xlu0 %v1554_v54, %s4598_s27 }
 0x148   : > { %1046 = vrot.lane.b32.xlu1 %v1414_v38, %s4597_s8 }
 0x14b   : > { %810 = vrot.lane.b32.xlu0 %v1553_v30, %s4595_s26  ;;  %v1390_v30 = vld [vmem:[#allocation2 + $0xb0] sm:$0xff] }
 0x14c   : > { %1192 = vrot.lane.b32.xlu1 %v5164_v43, %s4598_s27 }
 0x14f   : > { %939 = vrot.lane.b32.xlu0 %v1295_v45, %s4596_s12 }
 0x150   : > { %788 = vrot.lane.b32.xlu1 %v1542_v57, %s4595_s26  ;;  %v1416_v57 = vpack.c.bf16 %v1390_v30, %v1389_v29 }
 0x153   : > { %1602 = vrot.lane.b32.xlu0 %v1555_v7, %s4600_s19  ;;  %v5263_v7 = vpack.c.bf16 %v1264_v1, %v1263_v0 }
 0x154   : > { %917 = vrot.lane.b32.xlu1 %v5166_v60, %s4596_s12 }
 0x155   : > { %v1039_v13 = vpop.permute.xlu0 %1038 }
 0x156   : > { %v1185_v14 = vpop.permute.xlu1 %1184  ;;  %1087 = vst.msk [vmem:[#allocation3] sm:$0xff] %vm1086_vm6, %v1039_v13 }
 0x157   : > { %1089 = vst.msk [vmem:[#allocation3 + $0x8] sm:$0xff] %vm1088_vm7, %v1039_v13  ;;  %1321 = vrot.lane.b32.xlu0 %v5189_v15, %s4599_s29  ;;  %v1523_v13 = vld [vmem:[#allocation2 + $0xe1] sm:$0xff] }
 0x158   : > { %1233 = vst.msk [vmem:[#allocation3 + $0x8] sm:$0xff] %vm1232_vm8, %v1185_v14  ;;  %1048 = vrot.lane.b32.xlu1 %v1011_v8, %s4597_s8  ;;  %v4232_v14 = vld [vmem:[#allocation7 + $0xa0] ss:$0 sps:$4 sm:$0x33]   ;;  %v5279_v18 = vpack.c.bf16 %v1523_v13, %v1522_v12  ;;  %v1530_v13 = vld [vmem:[#allocation2 + $0x139] sm:$0xff] }
 0x159   : > { %v1314_v20 = vpop.permute.xlu0 %1313  ;;  %v2051_v19 = vsel %vm2049_vm13, %v4232_v14, 0 }
 0x15a   : > { %v1573_v22 = vpop.permute.xlu1 %1572  ;;  %1362 = vst.msk [vmem:[#allocation3 + $0x8] sm:$0xff] %vm1361_vm9, %v1314_v20 }
 0x15b   : > { %1623 = vst.msk [vmem:[#allocation3 + $0x10] sm:$0xff] %vm1622_vm10, %v1573_v22  ;;  %1451 = vrot.lane.b32.xlu0 %v1011_v8, %s4601_s10 }
 0x15c   : > { %1194 = vrot.lane.b32.xlu1 %v1157_v23, %s4598_s27 }
 0x15d   : > { %v1444_v27 = vpop.permute.xlu0 %1443 }
 0x15e   : > { %v1338_v16 = vpop.permute.xlu1 %1337  ;;  %1492 = vst.msk [vmem:[#allocation3 + $0x8] sm:$0xff] %vm1491_vm11, %v1444_v27 }
 0x15f   : > { %1621 = vst.msk [vmem:[#allocation3 + $0x8] sm:$0xff] %vm1620_vm12, %v1573_v22  ;;  %1580 = vrot.lane.b32.xlu0 %v1157_v23, %s4600_s19 }
 0x160   : > { %1323 = vrot.lane.b32.xlu1 %v5201_v28, %s4599_s29 }
 0x161   : > { %v1063_v31 = vpop.permute.xlu0 %1062 }
 0x162   : > { %v1468_v32 = vpop.permute.xlu1 %1467  ;;  %1113 = vst.msk [vmem:[#allocation3 + $0x128] sm:$0xff] %vm1088_vm7, %v1063_v31 }
 0x163   : > { %1718 = vrot.lane.b32.xlu0 %v5080_v50, %s4602_s11  ;;  %v1783_v50 = vld [vmem:[#allocation3] sm:$0xff] }
 0x164   : > { %1453 = vrot.lane.b32.xlu1 %v1416_v57, %s4601_s10 }
 0x165   : > { %v1209_v52 = vpop.permute.xlu0 %1208 }
 0x166   : > { %v1041_v36 = vpop.permute.xlu1 %1040  ;;  %1245 = vst.msk [vmem:[#allocation3 + $0x128] sm:$0xff] %vm1232_vm8, %v1209_v52  ;;  %v1784_v39 = vld [vmem:[#allocation3 + $0x8] sm:$0xff] }
 0x167   : > { %1091 = vst.msk [vmem:[#allocation3 + $0x20] sm:$0xff] %vm1088_vm7, %v1041_v36  ;;  %1720 = vrot.lane.b32.xlu0 %v5138_v35, %s4602_s11  ;;  %2085 = vmatprep.mubr.bf16.mxu0 %v1784_v39  ;;  %v1670_v52 = vld [vmem:[#allocation2 + $0xf2] sm:$0xff] }
 0x168   : > { %1374 = vst.msk [vmem:[#allocation3 + $0x128] sm:$0xff] %vm1361_vm9, %v1338_v16  ;;  %1582 = vrot.lane.b32.xlu1 %v5212_v37, %s4600_s19  ;;  %2086 = vmatmul.mubr.bf16.vlgmr.msra.gmra.mrb[0].mxu0 %v1783_v50 }
 0x169   : > { %1504 = vst.msk [vmem:[#allocation3 + $0x128] sm:$0xff] %vm1491_vm11, %v1468_v32  ;;  %v805_v41 = vpop.permute.xlu0 %804 }
 0x16a   : > { %v1187_v42 = vpop.permute.xlu1 %1186  ;;  %841 = vst.msk [vmem:[#allocation3 + $0x120] sm:$0xff] %vm828_vm4, %v805_v41 }
 0x16b   : > { %1234 = vst.msk [vmem:[#allocation3 + $0x20] sm:$0xff] %vm1232_vm8, %v1187_v42  ;;  %790 = vrot.lane.b32.xlu0 %v5164_v43, %s4595_s26  ;;  %v5247_v43 = vpack.c.bf16 %v1262_v53, %v1261_v49  ;;  %v1524_v42 = vld [vmem:[#allocation2 + $0xf1] sm:$0xff]  ;;  %v1526_v53 = vld [vmem:[#allocation2 + $0x109] sm:$0xff] }
 0x16c   : > { %1722 = vrot.lane.b32.xlu1 %v5166_v60, %s4602_s11  ;;  %v4229_v60 = vld [vmem:[#allocation7 + $0x88] sm:$0xff]  }
 0x16d   : > { %v934_v35 = vpop.permute.xlu0 %933 }
 0x16e   : > { %v783_v44 = vpop.permute.xlu1 %782  ;;  %970 = vst.msk [vmem:[#allocation3 + $0x120] sm:$0xff] %vm957_vm5, %v934_v35  ;;  %v1525_v35 = vld [vmem:[#allocation2 + $0xf9] sm:$0xff] }
 0x16f   : > { %830 = vst.msk [vmem:[#allocation3 + $0x18] sm:$0xff] %vm828_vm4, %v783_v44  ;;  %919 = vrot.lane.b32.xlu0 %v5189_v15, %s4596_s12  ;;  %v1672_v44 = vld [vmem:[#allocation2 + $0x10a] sm:$0xff] }
 0x170   : > { %1112 = vst.msk [vmem:[#allocation3 + $0x120] sm:$0xff] %vm1086_vm6, %v1063_v31  ;;  %1724 = vrot.lane.b32.xlu1 %v5189_v15, %s4602_s11 }
 0x171   : > { %v1597_v45 = vpop.permute.xlu0 %1596 }
 0x172   : > { %v912_v46 = vpop.permute.xlu1 %911  ;;  %1646 = vst.msk [vmem:[#allocation3 + $0x128] sm:$0xff] %vm1620_vm12, %v1597_v45 }
 0x173   : > { %1647 = vst.msk [vmem:[#allocation3 + $0x130] sm:$0xff] %vm1622_vm10, %v1597_v45  ;;  %1050 = vrot.lane.b32.xlu0 %v1416_v57, %s4597_s8  ;;  %v1673_v45 = vld [vmem:[#allocation2 + $0x112] sm:$0xff] }
 0x174   : > { %959 = vst.msk [vmem:[#allocation3 + $0x18] sm:$0xff] %vm957_vm5, %v912_v46  ;;  %792 = vrot.lane.b32.xlu1 %v1157_v23, %s4595_s26  ;;  %v1668_v23 = vld [vmem:[#allocation2 + $0xda] sm:$0xff]  ;;  %v5333_v49 = vpack.c.bf16 %v1673_v45, %v1672_v44  ;;  %v1682_v45 = vld [vmem:[#allocation2 + $0x182] sm:$0xff] }
 0x175   : > { %1090 = vst.msk [vmem:[#allocation3 + $0x18] sm:$0xff] %vm1086_vm6, %v1041_v36  ;;  %v1316_v47 = vpop.permute.xlu0 %1315  ;;  %v5296_v16 = vpack.c.bf16 %v1669_v24, %v1668_v23  ;;  %v1671_v36 = vld [vmem:[#allocation2 + $0xfa] sm:$0xff] }
 0x176   : > { %v1575_v48 = vpop.permute.xlu1 %1574  ;;  %1363 = vst.msk [vmem:[#allocation3 + $0x20] sm:$0xff] %vm1361_vm9, %v1316_v47  ;;  %v5323_v41 = vpack.c.bf16 %v1671_v36, %v1670_v52  ;;  %v1679_v23 = vld [vmem:[#allocation2 + $0x15a] sm:$0xff]  ;;  %v1685_v52 = vld [vmem:[#allocation2 + $0x1a2] sm:$0xff] }
 0x177   : > { %1625 = vst.msk [vmem:[#allocation3 + $0x28] sm:$0xff] %vm1622_vm10, %v1575_v48  ;;  %1196 = vrot.lane.b32.xlu0 %v5212_v37, %s4598_s27  ;;  %v1819_v61 = vld [vmem:[#allocation3 + $0x120] sm:$0xff] }
 0x178   : > { %921 = vrot.lane.b32.xlu1 %v5201_v28, %s4596_s12 }
 0x179   : > { %v1446_v54 = vpop.permute.xlu0 %1445  ;;  %v1820_v56 = vld [vmem:[#allocation3 + $0x128] sm:$0xff] }
 0x17a   : > { %v1340_v55 = vpop.permute.xlu1 %1339  ;;  %1493 = vst.msk [vmem:[#allocation3 + $0x20] sm:$0xff] %vm1491_vm11, %v1446_v54  ;;  %2181 = vmatprep.mubr.bf16.mxu1 %v1820_v56  ;;  %v1527_v54 = vld [vmem:[#allocation2 + $0x111] sm:$0xff] }
 0x17b   : > { %1624 = vst.msk [vmem:[#allocation3 + $0x20] sm:$0xff] %vm1620_vm12, %v1575_v48  ;;  %1325 = vrot.lane.b32.xlu0 %v5247_v43, %s4599_s29  ;;  %2182 = vmatmul.mubr.bf16.vlgmr.msra.gmra.mrb[0].mxu1 %v1819_v61  ;;  %v5331_v48 = vpack.c.bf16 %v1525_v35, %v1524_v42  ;;  %v5342_v56 = vpack.c.bf16 %v1527_v54, %v1526_v53 }
 0x17c   : > { %1052 = vrot.lane.b32.xlu1 %v5107_v17, %s4597_s8  ;;  %4074 = vmatpush3.bf16.msra.mxu1 %v5181_v6 }
 0x17d   : > { %v1065_v62 = vpop.permute.xlu0 %1064  ;;  %4075 = vmatprep.subr.bf16.mxu1 %v4229_v60 }
 0x17e   : > { %v1470_v38 = vpop.permute.xlu1 %1469  ;;  %1115 = vst.msk [vmem:[#allocation3 + $0x140] sm:$0xff] %vm1088_vm7, %v1065_v62 }
 0x17f   : > { %1455 = vrot.lane.b32.xlu0 %v5107_v17, %s4601_s10  ;;  %v1786_v17 = vld [vmem:[#allocation3 + $0x18] sm:$0xff] }
 0x180   : > { %1198 = vrot.lane.b32.xlu1 %v5255_v63, %s4598_s27  ;;  %4076 = vmatpush3.bf16.msra.mxu1 %v4229_v60 }
 0x181   : > { %v1211_v4 = vpop.permute.xlu0 %1210  ;;  %4077 = vmatprep.subr.bf16.mxu1 %v4230_v3 }
 0x182   : > { %v1043_v5 = vpop.permute.xlu1 %1042  ;;  %1246 = vst.msk [vmem:[#allocation3 + $0x140] sm:$0xff] %vm1232_vm8, %v1211_v4  ;;  %v1787_v6 = vld [vmem:[#allocation3 + $0x20] sm:$0xff]  ;;  %v1676_v4 = vld [vmem:[#allocation2 + $0x13a] sm:$0xff] }
 0x183   : > { %1093 = vst.msk [vmem:[#allocation3 + $0x38] sm:$0xff] %vm1088_vm7, %v1043_v5  ;;  %1584 = vrot.lane.b32.xlu0 %v5255_v63, %s4600_s19  ;;  %2093 = vmatprep.mubr.bf16.mxu0 %v1787_v6  ;;  %v1677_v6 = vld [vmem:[#allocation2 + $0x142] sm:$0xff] }
 0x184   : > { %1375 = vst.msk [vmem:[#allocation3 + $0x140] sm:$0xff] %vm1361_vm9, %v1340_v55  ;;  %1327 = vrot.lane.b32.xlu1 %v5263_v7, %s4599_s29  ;;  %2094 = vmatmul.mubr.bf16.gmra.mrb[4].mxu0 %v1786_v17 }
 0x185   : > { %1505 = vst.msk [vmem:[#allocation3 + $0x140] sm:$0xff] %vm1491_vm11, %v1470_v38  ;;  %v807_v10 = vpop.permute.xlu0 %806  ;;  %4078 = vmatpush3.bf16.msra.mxu1 %v4230_v3  ;;  %v1675_v38 = vld [vmem:[#allocation2 + $0x12a] sm:$0xff] }
 0x186   : > { %v1189_v11 = vpop.permute.xlu1 %1188  ;;  %842 = vst.msk [vmem:[#allocation3 + $0x138] sm:$0xff] %vm828_vm4, %v807_v10  ;;  %4079 = vmatprep.subr.bf16.mxu1 %v4231_v9 }
 0x187   : > { %1235 = vst.msk [vmem:[#allocation3 + $0x38] sm:$0xff] %vm1232_vm8, %v1189_v11  ;;  %1726 = vrot.lane.b32.xlu0 %v5201_v28, %s4602_s11  ;;  %v1697_v11 = vpack.c.bf16 %v1677_v6, %v1676_v4 }
 0x188   : > { %1457 = vrot.lane.b32.xlu1 %v5117_v21, %s4601_s10 }
 0x189   : > { %v936_v15 = vpop.permute.xlu0 %935  ;;  %4080 = vmatpush3.bf16.msra.mxu1 %v4231_v9 }
 0x18a   : > { %v785_v8 = vpop.permute.xlu1 %784  ;;  %971 = vst.msk [vmem:[#allocation3 + $0x138] sm:$0xff] %vm957_vm5, %v936_v15  ;;  %4131 = vmatprep.subr.msk.bf16.mxu1 %vm2049_vm13, %v4232_v14  ;;  %v1531_v14 = vld [vmem:[#allocation2 + $0x141] sm:$0xff] }
 0x18b   : > { %831 = vst.msk [vmem:[#allocation3 + $0x30] sm:$0xff] %vm828_vm4, %v785_v8  ;;  %1728 = vrot.lane.b32.xlu0 %v5247_v43, %s4602_s11 }
 0x18c   : > { %1114 = vst.msk [vmem:[#allocation3 + $0x138] sm:$0xff] %vm1086_vm6, %v1065_v62  ;;  %1586 = vrot.lane.b32.xlu1 %v5279_v18, %s4600_s19  ;;  %v1674_v62 = vld [vmem:[#allocation2 + $0x122] sm:$0xff] }
 0x18d   : > { %v1599_v20 = vpop.permute.xlu0 %1598  ;;  %4082 = vmatpush3.bf16.msra.mxu1 %v2051_v19  ;;  %v5364_v3 = vpack.c.bf16 %v1675_v38, %v1674_v62 }
 0x18e   : > { %v914_v22 = vpop.permute.xlu1 %913  ;;  %1648 = vst.msk [vmem:[#allocation3 + $0x140] sm:$0xff] %vm1620_vm12, %v1599_v20 }
 0x18f   : > { %1649 = vst.msk [vmem:[#allocation3 + $0x148] sm:$0xff] %vm1622_vm10, %v1599_v20  ;;  %794 = vrot.lane.b32.xlu0 %v5212_v37, %s4595_s26 }
 0x190   : > { %960 = vst.msk [vmem:[#allocation3 + $0x30] sm:$0xff] %vm957_vm5, %v914_v22  ;;  %1730 = vrot.lane.b32.xlu1 %v5263_v7, %s4602_s11  ;;  %v1678_v22 = vld [vmem:[#allocation2 + $0x152] sm:$0xff] }
 0x191   : > { %1092 = vst.msk [vmem:[#allocation3 + $0x30] sm:$0xff] %vm1086_vm6, %v1043_v5  ;;  %v1318_v26 = vpop.permute.xlu0 %1317  ;;  %v1528_v5 = vld [vmem:[#allocation2 + $0x121] sm:$0xff] }
 0x192   : > { %v1577_v27 = vpop.permute.xlu1 %1576  ;;  %1364 = vst.msk [vmem:[#allocation3 + $0x38] sm:$0xff] %vm1361_vm9, %v1318_v26 }
 0x193   : > { %1627 = vst.msk [vmem:[#allocation3 + $0x40] sm:$0xff] %vm1622_vm10, %v1577_v27  ;;  %923 = vrot.lane.b32.xlu0 %v5247_v43, %s4596_s12  ;;  %v1822_v31 = vld [vmem:[#allocation3 + $0x138] sm:$0xff] }
 0x194   : > { %1732 = vrot.lane.b32.xlu1 %v5296_v16, %s4602_s11 }
 0x195   : > { %v1448_v28 = vpop.permute.xlu0 %1447  ;;  %v1823_v30 = vld [vmem:[#allocation3 + $0x140] sm:$0xff] }
 0x196   : > { %v1342_v29 = vpop.permute.xlu1 %1341  ;;  %1494 = vst.msk [vmem:[#allocation3 + $0x38] sm:$0xff] %vm1491_vm11, %v1448_v28  ;;  %2189 = vmatprep.mubr.bf16.mxu1 %v1823_v30  ;;  %v1681_v28 = vld [vmem:[#allocation2 + $0x172] sm:$0xff] }
 0x197   : > { %1626 = vst.msk [vmem:[#allocation3 + $0x38] sm:$0xff] %vm1620_vm12, %v1577_v27  ;;  %1054 = vrot.lane.b32.xlu0 %v5117_v21, %s4597_s8  ;;  %2190 = vmatmul.mubr.bf16.gmra.mrb[4].mxu1 %v1822_v31  ;;  %v1698_v27 = vpack.c.bf16 %v1679_v23, %v1678_v22 }
 0x198   : > { %796 = vrot.lane.b32.xlu1 %v5255_v63, %s4595_s26  ;;  %v1789_v37 = vld [vmem:[#allocation3 + $0x30] sm:$0xff] }
 0x199   : > { %v1067_v32 = vpop.permute.xlu0 %1066 }
 0x19a   : > { %v1472_v57 = vpop.permute.xlu1 %1471  ;;  %1117 = vst.msk [vmem:[#allocation3 + $0x158] sm:$0xff] %vm1088_vm7, %v1067_v32 }
 0x19b   : > { %1200 = vrot.lane.b32.xlu0 %v5279_v18, %s4598_s27 }
 0x19c   : > { %925 = vrot.lane.b32.xlu1 %v5263_v7, %s4596_s12  ;;  %v1529_v7 = vld [vmem:[#allocation2 + $0x129] sm:$0xff] }
 0x19d   : > { %v1213_v33 = vpop.permute.xlu0 %1212  ;;  %v5371_v10 = vpack.c.bf16 %v1529_v7, %v1528_v5  ;;  %v2647_v5 = vld [vmem:[%s4790_s15 + $0x30] sm:$0xff] }
 0x19e   : > { %v1045_v34 = vpop.permute.xlu1 %1044  ;;  %1247 = vst.msk [vmem:[#allocation3 + $0x158] sm:$0xff] %vm1232_vm8, %v1213_v33  ;;  %v1790_v21 = vld [vmem:[#allocation3 + $0x38] sm:$0xff] }
 0x19f   : > { %1095 = vst.msk [vmem:[#allocation3 + $0x50] sm:$0xff] %vm1088_vm7, %v1045_v34  ;;  %1329 = vrot.lane.b32.xlu0 %v5296_v16, %s4599_s29  ;;  %2101 = vmatprep.mubr.bf16.mxu0 %v1790_v21  ;;  %v1684_v21 = vld [vmem:[#allocation2 + $0x19a] sm:$0xff] }
 0x1a0   : > { %1376 = vst.msk [vmem:[#allocation3 + $0x158] sm:$0xff] %vm1361_vm9, %v1342_v29  ;;  %1056 = vrot.lane.b32.xlu1 %v5126_v25, %s4597_s8  ;;  %2102 = vmatmul.mubr.bf16.gmra.mrb[8].mxu0 %v1789_v37 }
 0x1a1   : > { %1506 = vst.msk [vmem:[#allocation3 + $0x158] sm:$0xff] %vm1491_vm11, %v1472_v57  ;;  %v809_v39 = vpop.permute.xlu0 %808 }
 0x1a2   : > { %v1191_v50 = vpop.permute.xlu1 %1190  ;;  %843 = vst.msk [vmem:[#allocation3 + $0x150] sm:$0xff] %vm828_vm4, %v809_v39 }
 0x1a3   : > { %1236 = vst.msk [vmem:[#allocation3 + $0x50] sm:$0xff] %vm1232_vm8, %v1191_v50  ;;  %1459 = vrot.lane.b32.xlu0 %v5126_v25, %s4601_s10 }
 0x1a4   : > { %1734 = vrot.lane.b32.xlu1 %v5323_v41, %s4602_s11 }
 0x1a5   : > { %v938_v46 = vpop.permute.xlu0 %937 }
 0x1a6   : > { %v787_v47 = vpop.permute.xlu1 %786  ;;  %972 = vst.msk [vmem:[#allocation3 + $0x150] sm:$0xff] %vm957_vm5, %v938_v46  ;;  %v1683_v46 = vld [vmem:[#allocation2 + $0x18a] sm:$0xff] }
 0x1a7   : > { %832 = vst.msk [vmem:[#allocation3 + $0x48] sm:$0xff] %vm828_vm4, %v787_v47  ;;  %1588 = vrot.lane.b32.xlu0 %v5331_v48, %s4600_s19  ;;  %v2642_v47 = vld [vmem:[%s4790_s15 + $0x8] sm:$0xff]  ;;  %v1700_v54 = vpack.c.bf16 %v1683_v46, %v1682_v45 }
 0x1a8   : > { %1116 = vst.msk [vmem:[#allocation3 + $0x150] sm:$0xff] %vm1086_vm6, %v1067_v32  ;;  %1736 = vrot.lane.b32.xlu1 %v5333_v49, %s4602_s11 }
 0x1a9   : > { %v1601_v25 = vpop.permute.xlu0 %1600 }
 0x1aa   : > { %v916_v55 = vpop.permute.xlu1 %915  ;;  %1650 = vst.msk [vmem:[#allocation3 + $0x158] sm:$0xff] %vm1620_vm12, %v1601_v25 }
 0x1ab   : > { %1651 = vst.msk [vmem:[#allocation3 + $0x160] sm:$0xff] %vm1622_vm10, %v1601_v25  ;;  %1590 = vrot.lane.b32.xlu0 %v5342_v56, %s4600_s19  ;;  %v2644_v25 = vld [vmem:[%s4790_s15 + $0x18] sm:$0xff] }
 0x1ac   : > { %961 = vst.msk [vmem:[#allocation3 + $0x48] sm:$0xff] %vm957_vm5, %v916_v55  ;;  %798 = vrot.lane.b32.xlu1 %v5279_v18, %s4595_s26  ;;  %v1551_v18 = vpack.c.bf16 %v1531_v14, %v1530_v13  ;;  %v2649_v13 = vld [vmem:[%s4790_s15 + $0x40] sm:$0xff]  ;;  %v2650_v14 = vld [vmem:[%s4790_s15 + $0x48] sm:$0xff] }
 0x1ad   : > { %1094 = vst.msk [vmem:[#allocation3 + $0x48] sm:$0xff] %vm1086_vm6, %v1045_v34  ;;  %v1320_v43 = vpop.permute.xlu0 %1319 }
 0x1ae   : > { %v1579_v51 = vpop.permute.xlu1 %1578  ;;  %1365 = vst.msk [vmem:[#allocation3 + $0x50] sm:$0xff] %vm1361_vm9, %v1320_v43 }
 0x1af   : > { %1629 = vst.msk [vmem:[#allocation3 + $0x58] sm:$0xff] %vm1622_vm10, %v1579_v51  ;;  %1202 = vrot.lane.b32.xlu0 %v5331_v48, %s4598_s27  ;;  %v1825_v63 = vld [vmem:[#allocation3 + $0x150] sm:$0xff] }
 0x1b0   : > { %927 = vrot.lane.b32.xlu1 %v5296_v16, %s4596_s12  ;;  %v1680_v16 = vld [vmem:[#allocation2 + $0x16a] sm:$0xff] }
 0x1b1   : > { %v1450_v59 = vpop.permute.xlu0 %1449  ;;  %v1826_v61 = vld [vmem:[#allocation3 + $0x158] sm:$0xff]  ;;  %v1699_v31 = vpack.c.bf16 %v1681_v28, %v1680_v16 }
 0x1b2   : > { %v1344_v60 = vpop.permute.xlu1 %1343  ;;  %1495 = vst.msk [vmem:[#allocation3 + $0x50] sm:$0xff] %vm1491_vm11, %v1450_v59  ;;  %2197 = vmatprep.mubr.bf16.mxu1 %v1826_v61  ;;  %v2646_v59 = vld [vmem:[%s4790_s15 + $0x28] sm:$0xff] }
 0x1b3   : > { %1628 = vst.msk [vmem:[#allocation3 + $0x50] sm:$0xff] %vm1620_vm12, %v1579_v51  ;;  %1331 = vrot.lane.b32.xlu0 %v5323_v41, %s4599_s29  ;;  %2198 = vmatmul.mubr.bf16.gmra.mrb[8].mxu1 %v1825_v63  ;;  %v2645_v63 = vld [vmem:[%s4790_s15 + $0x20] sm:$0xff] }
 0x1b4   : > { %1058 = vrot.lane.b32.xlu1 %v5140_v40, %s4597_s8 }
 0x1b5   : > { %v1069_v0 = vpop.permute.xlu0 %1068 }
 0x1b6   : > { %v1474_v1 = vpop.permute.xlu1 %1473  ;;  %1119 = vst.msk [vmem:[#allocation3 + $0x170] sm:$0xff] %vm1088_vm7, %v1069_v0 }
 0x1b7   : > { %1461 = vrot.lane.b32.xlu0 %v5140_v40, %s4601_s10  ;;  %v1792_v40 = vld [vmem:[#allocation3 + $0x48] sm:$0xff] }
 0x1b8   : > { %1738 = vrot.lane.b32.xlu1 %v5364_v3, %s4602_s11 }
 0x1b9   : > { %v1215_v9 = vpop.permute.xlu0 %1214 }
 0x1ba   : > { %v1047_v17 = vpop.permute.xlu1 %1046  ;;  %1248 = vst.msk [vmem:[#allocation3 + $0x170] sm:$0xff] %vm1232_vm8, %v1215_v9  ;;  %v1793_v12 = vld [vmem:[#allocation3 + $0x50] sm:$0xff]  ;;  %v2648_v9 = vld [vmem:[%s4790_s15 + $0x38] sm:$0xff] }
 0x1bb   : > { %1097 = vst.msk [vmem:[#allocation3 + $0x68] sm:$0xff] %vm1088_vm7, %v1047_v17  ;;  %1592 = vrot.lane.b32.xlu0 %v5371_v10, %s4600_s19  ;;  %2109 = vmatprep.mubr.bf16.mxu0 %v1793_v12 }
 0x1bc   : > { %1377 = vst.msk [vmem:[#allocation3 + $0x170] sm:$0xff] %vm1361_vm9, %v1344_v60  ;;  %1740 = vrot.lane.b32.xlu1 %v1697_v11, %s4602_s11  ;;  %2110 = vmatmul.mubr.bf16.gmra.mrb[12].mxu0 %v1792_v40  ;;  %v2643_v60 = vld [vmem:[%s4790_s15 + $0x10] sm:$0xff] }
 0x1bd   : > { %1507 = vst.msk [vmem:[#allocation3 + $0x170] sm:$0xff] %vm1491_vm11, %v1474_v1  ;;  %v811_v15 = vpop.permute.xlu0 %810 }
 0x1be   : > { %v1193_v8 = vpop.permute.xlu1 %1192  ;;  %844 = vst.msk [vmem:[#allocation3 + $0x168] sm:$0xff] %vm828_vm4, %v811_v15 }
 0x1bf   : > { %1237 = vst.msk [vmem:[#allocation3 + $0x68] sm:$0xff] %vm1232_vm8, %v1193_v8  ;;  %1594 = vrot.lane.b32.xlu0 %v1551_v18, %s4600_s19 }
 0x1c0   : > { %800 = vrot.lane.b32.xlu1 %v5331_v48, %s4595_s26 }
 0x1c1   : > { %v940_v19 = vpop.permute.xlu0 %939 }
 0x1c2   : > { %v789_v20 = vpop.permute.xlu1 %788  ;;  %973 = vst.msk [vmem:[#allocation3 + $0x168] sm:$0xff] %vm957_vm5, %v940_v19 }
 0x1c3   : > { %833 = vst.msk [vmem:[#allocation3 + $0x60] sm:$0xff] %vm828_vm4, %v789_v20  ;;  %1204 = vrot.lane.b32.xlu0 %v5342_v56, %s4598_s27 }
 0x1c4   : > { %1118 = vst.msk [vmem:[#allocation3 + $0x168] sm:$0xff] %vm1086_vm6, %v1069_v0  ;;  %929 = vrot.lane.b32.xlu1 %v5323_v41, %s4596_s12 }
 0x1c5   : > { %v1603_v24 = vpop.permute.xlu0 %1602 }
 0x1c6   : > { %v918_v26 = vpop.permute.xlu1 %917  ;;  %1652 = vst.msk [vmem:[#allocation3 + $0x170] sm:$0xff] %vm1620_vm12, %v1603_v24 }
 0x1c7   : > { %1653 = vst.msk [vmem:[#allocation3 + $0x178] sm:$0xff] %vm1622_vm10, %v1603_v24  ;;  %1333 = vrot.lane.b32.xlu0 %v5333_v49, %s4599_s29 }
 0x1c8   : > { %962 = vst.msk [vmem:[#allocation3 + $0x60] sm:$0xff] %vm957_vm5, %v918_v26  ;;  %1742 = vrot.lane.b32.xlu1 %v1698_v27, %s4602_s11 }
 0x1c9   : > { %1096 = vst.msk [vmem:[#allocation3 + $0x60] sm:$0xff] %vm1086_vm6, %v1047_v17  ;;  %v1322_v29 = vpop.permute.xlu0 %1321 }
 0x1ca   : > { %v5399_v30 = vpop.permute.xlu1 %1048  ;;  %1366 = vst.msk [vmem:[#allocation3 + $0x68] sm:$0xff] %vm1361_vm9, %v1322_v29  ;;  %v2651_v29 = vld [vmem:[%s4790_s15 + $0x50] sm:$0xff] }
 0x1cb   : > { %1099 = vst.msk [vmem:[#allocation3 + $0x80] sm:$0xff] %vm1088_vm7, %v5399_v30  ;;  %1463 = vrot.lane.b32.xlu0 %v5035_v2, %s4601_s10  ;;  %v1828_v34 = vld [vmem:[#allocation3 + $0x168] sm:$0xff] }
 0x1cc   : > { %1744 = vrot.lane.b32.xlu1 %v1699_v31, %s4602_s11 }
 0x1cd   : > { %v1452_v32 = vpop.permute.xlu0 %1451  ;;  %v1829_v33 = vld [vmem:[#allocation3 + $0x170] sm:$0xff] }
 0x1ce   : > { %v1195_v57 = vpop.permute.xlu1 %1194  ;;  %1496 = vst.msk [vmem:[#allocation3 + $0x68] sm:$0xff] %vm1491_vm11, %v1452_v32  ;;  %2205 = vmatprep.mubr.bf16.mxu1 %v1829_v33 }
 0x1cf   : > { %1238 = vst.msk [vmem:[#allocation3 + $0x80] sm:$0xff] %vm1232_vm8, %v1195_v57  ;;  %1060 = vrot.lane.b32.xlu0 %v5035_v2, %s4597_s8  ;;  %2206 = vmatmul.mubr.bf16.gmra.mrb[12].mxu1 %v1828_v34  ;;  %v1701_v2 = vpack.c.bf16 %v1685_v52, %v1684_v21  ;;  %v2652_v57 = vld [vmem:[%s4790_s15 + $0x58] sm:$0xff]  ;;  %s6108_s8 = scalar_lea.vmem [#allocation10], %s4786_s17 }
 0x1d0   : > { %802 = vrot.lane.b32.xlu1 %v5342_v56, %s4595_s26  ;;  %v1795_v44 = vld [vmem:[#allocation3 + $0x60] sm:$0xff]  ;;  %s4487_s26 = sshll.u32 %s4605_s30, 4  ;;  %s4488_s26 = int_to_ptr.vmem [resolvable:$false] %s4487_s26 }
 0x1d1   : > { %v1581_v36 = vpop.permute.xlu0 %1580 }
 0x1d2   : > { %v1324_v37 = vpop.permute.xlu1 %1323  ;;  %1630 = vst.msk [vmem:[#allocation3 + $0x68] sm:$0xff] %vm1620_vm12, %v1581_v36 }
 0x1d3   : > { %1631 = vst.msk [vmem:[#allocation3 + $0x70] sm:$0xff] %vm1622_vm10, %v1581_v36  ;;  %1206 = vrot.lane.b32.xlu0 %v5371_v10, %s4598_s27  ;;  %v2653_v36 = vld [vmem:[%s4790_s15 + $0x60] sm:$0xff]  ;;  %s4604_s27 = smov 64  }
 0x1d4   : > { %1367 = vst.msk [vmem:[#allocation3 + $0x80] sm:$0xff] %vm1361_vm9, %v1324_v37  ;;  %931 = vrot.lane.b32.xlu1 %v5333_v49, %s4596_s12  ;;  %s4603_s12 = smov 96  }
 0x1d5   : > { %v1719_v39 = vpop.permute.xlu0 %1718 }
 0x1d6   : > { %v1454_v50 = vpop.permute.xlu1 %1453  ;;  %1767 = vst.msk [vmem:[#allocation3 + $0x10] sm:$0xff] %vm1766_vm14, %v1719_v39  ;;  %v2654_v39 = vld [vmem:[%s4790_s15 + $0x68] sm:$0xff] }
 0x1d7   : > { %1497 = vst.msk [vmem:[#allocation3 + $0x80] sm:$0xff] %vm1491_vm11, %v1454_v50  ;;  %1335 = vrot.lane.b32.xlu0 %v5364_v3, %s4599_s29  ;;  %v2655_v50 = vld [vmem:[%s4790_s15 + $0x70] sm:$0xff]  ;;  %s3938_s29 = sshll.u32 %s4665_s25, 12 }
 0x1d8   : > { %1748 = vrot.lane.b32.xlu1 %v1701_v2, %s4602_s11 }
 0x1d9   : > { %v1721_v41 = vpop.permute.xlu0 %1720  ;;  %v1796_v35 = vld [vmem:[#allocation3 + $0x68] sm:$0xff] }
 0x1da   : > { %v1583_v42 = vpop.permute.xlu1 %1582  ;;  %1768 = vst.msk [vmem:[#allocation3 + $0x28] sm:$0xff] %vm1766_vm14, %v1721_v41  ;;  %2117 = vmatprep.mubr.bf16.mxu0 %v1796_v35  ;;  %v2656_v41 = vld [vmem:[%s4790_s15 + $0x78] sm:$0xff] }
 0x1db   : > { %1632 = vst.msk [vmem:[#allocation3 + $0x80] sm:$0xff] %vm1620_vm12, %v1583_v42  ;;  %1465 = vrot.lane.b32.xlu0 %v5029_v58, %s4601_s10  ;;  %2118 = vmatmul.mubr.bf16.gmra.mrb[16].mxu0 %v1795_v44  ;;  %v2641_v58 = vld [vmem:[%s4790_s15] sm:$0xff] }
 0x1dc   : > { %1633 = vst.msk [vmem:[#allocation3 + $0x88] sm:$0xff] %vm1622_vm10, %v1583_v42  ;;  %2707 = vrot.lane.b32.xlu1 %v2642_v47, %s4602_s11 }
 0x1dd   : > { %v791_v48 = vpop.permute.xlu0 %790  ;;  %v1785_v53 = vld [vmem:[#allocation3 + $0x10] sm:$0xff] }
 0x1de   : > { %v1723_v49 = vpop.permute.xlu1 %1722  ;;  %834 = vst.msk [vmem:[#allocation3 + $0x78] sm:$0xff] %vm828_vm4, %v791_v48  ;;  %4083 = vmatprep.mubr.msk.bf16.mxu1 %vm2000_vm15, %v1785_v53 }
 0x1df   : > { %1769 = vst.msk [vmem:[#allocation3 + $0x40] sm:$0xff] %vm1766_vm14, %v1723_v49  ;;  %1746 = vrot.lane.b32.xlu0 %v1700_v54, %s4602_s11 }
 0x1e0   : > { %2711 = vrot.lane.b32.xlu1 %v2644_v25, %s4602_s11 }
 0x1e1   : > { %v920_v55 = vpop.permute.xlu0 %919  ;;  %v1788_v51 = vld [vmem:[#allocation3 + $0x28] sm:$0xff] }
 0x1e2   : > { %v1725_v56 = vpop.permute.xlu1 %1724  ;;  %v1799_v43 = vld [vmem:[#allocation3 + $0x80] sm:$0xff]  ;;  %963 = vst.msk [vmem:[#allocation3 + $0x78] sm:$0xff] %vm957_vm5, %v920_v55  ;;  %4084 = vmatmul.mubr.msk.bf16.vlgmr.msra.gmra.mrb[16].mxu1 %vm2000_vm15, %v1788_v51  ;;  %v2658_v51 = vld [vmem:[%s4790_s15 + $0x88] sm:$0xff] }
 0x1e3   : > { %1770 = vst.msk [vmem:[#allocation3 + $0x58] sm:$0xff] %vm1766_vm14, %v1725_v56  ;;  %2125 = vmatprep.mubr.bf16.mxu0 %v1799_v43  ;;  %2705 = vrot.lane.b32.xlu0 %v2641_v58, %s4602_s11  ;;  %v2657_v43 = vld [vmem:[%s4790_s15 + $0x80] sm:$0xff] }
 0x1e4   : > { %1098 = vst.msk [vmem:[#allocation3 + $0x78] sm:$0xff] %vm1086_vm6, %v5399_v30  ;;  %2715 = vrot.lane.b32.xlu1 %v2646_v59, %s4602_s11 }
 0x1e5   : > { %v1051_v61 = vpop.permute.xlu0 %1050 }
 0x1e6   : > { %v793_v62 = vpop.permute.xlu1 %792  ;;  %v1791_v38 = vld [vmem:[#allocation3 + $0x40] sm:$0xff]  ;;  %1101 = vst.msk [vmem:[#allocation3 + $0x98] sm:$0xff] %vm1088_vm7, %v1051_v61 }
 0x1e7   : > { %835 = vst.msk [vmem:[#allocation3 + $0x90] sm:$0xff] %vm828_vm4, %v793_v62  ;;  %4087 = vmatprep.mubr.msk.bf16.mxu1 %vm2000_vm15, %v1791_v38  ;;  %2709 = vrot.lane.b32.xlu0 %v2643_v60, %s4602_s11 }
 0x1e8   : > { %2719 = vrot.lane.b32.xlu1 %v2648_v9, %s4602_s11 }
 0x1e9   : > { %v1197_v0 = vpop.permute.xlu0 %1196 }
 0x1ea   : > { %v922_v1 = vpop.permute.xlu1 %921  ;;  %v1794_v3 = vld [vmem:[#allocation3 + $0x58] sm:$0xff]  ;;  %1239 = vst.msk [vmem:[#allocation3 + $0x98] sm:$0xff] %vm1232_vm8, %v1197_v0 }
 0x1eb   : > { %964 = vst.msk [vmem:[#allocation3 + $0x90] sm:$0xff] %vm957_vm5, %v922_v1  ;;  %4088 = vmatmul.mubr.msk.bf16.gmra.mrb[20].mxu1 %vm2000_vm15, %v1794_v3  ;;  %v1798_v4 = vld [vmem:[#allocation3 + $0x78] sm:$0xff]  ;;  %2713 = vrot.lane.b32.xlu0 %v2645_v63, %s4602_s11 }
 0x1ec   : > { %1100 = vst.msk [vmem:[#allocation3 + $0x90] sm:$0xff] %vm1086_vm6, %v1051_v61  ;;  %2126 = vmatmul.mubr.bf16.gmra.mrb[20].mxu0 %v1798_v4  ;;  %2723 = vrot.lane.b32.xlu1 %v2650_v14, %s4602_s11 }
 0x1ed   : > { %v1326_v7 = vpop.permute.xlu0 %1325 }
 0x1ee   : > { %v1053_v6 = vpop.permute.xlu1 %1052  ;;  %1368 = vst.msk [vmem:[#allocation3 + $0x98] sm:$0xff] %vm1361_vm9, %v1326_v7  ;;  %v2659_v7 = vld [vmem:[%s4790_s15 + $0x90] sm:$0xff] }
 0x1ef   : > { %1103 = vst.msk [vmem:[#allocation3 + $0xb0] sm:$0xff] %vm1088_vm7, %v1053_v6  ;;  %2717 = vrot.lane.b32.xlu0 %v2647_v5, %s4602_s11 }
 0x1f0   : > { %2727 = vrot.lane.b32.xlu1 %v2652_v57, %s4602_s11 }
 0x1f1   : > { %v1456_v17 = vpop.permute.xlu0 %1455 }
 0x1f2   : > { %v1199_v10 = vpop.permute.xlu1 %1198  ;;  %1498 = vst.msk [vmem:[#allocation3 + $0x98] sm:$0xff] %vm1491_vm11, %v1456_v17  ;;  %v2660_v17 = vld [vmem:[%s4790_s15 + $0x98] sm:$0xff] }
 0x1f3   : > { %1240 = vst.msk [vmem:[#allocation3 + $0xb0] sm:$0xff] %vm1232_vm8, %v1199_v10  ;;  %2721 = vrot.lane.b32.xlu0 %v2649_v13, %s4602_s11  ;;  %v1801_v20 = vld [vmem:[#allocation3 + $0x90] sm:$0xff] }
 0x1f4   : > { %2731 = vrot.lane.b32.xlu1 %v2654_v39, %s4602_s11 }
 0x1f5   : > { %v1585_v11 = vpop.permute.xlu0 %1584 }
 0x1f6   : > { %v1328_v12 = vpop.permute.xlu1 %1327  ;;  %1634 = vst.msk [vmem:[#allocation3 + $0x98] sm:$0xff] %vm1620_vm12, %v1585_v11 }
 0x1f7   : > { %1635 = vst.msk [vmem:[#allocation3 + $0xa0] sm:$0xff] %vm1622_vm10, %v1585_v11  ;;  %2725 = vrot.lane.b32.xlu0 %v2651_v29, %s4602_s11  ;;  %v2661_v11 = vld [vmem:[%s4790_s15 + $0xa0] sm:$0xff]  ;;  %v2666_v29 = vld [vmem:[%s4790_s15 + $0xc8] sm:$0xff] }
 0x1f8   : > { %1369 = vst.msk [vmem:[#allocation3 + $0xb0] sm:$0xff] %vm1361_vm9, %v1328_v12  ;;  %2735 = vrot.lane.b32.xlu1 %v2656_v41, %s4602_s11 }
 0x1f9   : > { %v1727_v40 = vpop.permute.xlu0 %1726 }
 0x1fa   : > { %v1458_v15 = vpop.permute.xlu1 %1457  ;;  %1771 = vst.msk [vmem:[#allocation3 + $0x70] sm:$0xff] %vm1766_vm14, %v1727_v40  ;;  %v2662_v40 = vld [vmem:[%s4790_s15 + $0xa8] sm:$0xff] }
 0x1fb   : > { %1499 = vst.msk [vmem:[#allocation3 + $0xb0] sm:$0xff] %vm1491_vm11, %v1458_v15  ;;  %2729 = vrot.lane.b32.xlu0 %v2653_v36, %s4602_s11 }
 0x1fc   : > { %2739 = vrot.lane.b32.xlu1 %v2658_v51, %s4602_s11 }
 0x1fd   : > { %v1729_v8 = vpop.permute.xlu0 %1728  ;;  %v1802_v19 = vld [vmem:[#allocation3 + $0x98] sm:$0xff] }
 0x1fe   : > { %v1587_v18 = vpop.permute.xlu1 %1586  ;;  %1772 = vst.msk [vmem:[#allocation3 + $0x88] sm:$0xff] %vm1766_vm14, %v1729_v8  ;;  %2133 = vmatprep.mubr.bf16.mxu0 %v1802_v19 }
 0x1ff   : > { %1636 = vst.msk [vmem:[#allocation3 + $0xb0] sm:$0xff] %vm1620_vm12, %v1587_v18  ;;  %2134 = vmatmul.mubr.bf16.gmra.mrb[24].mxu0 %v1801_v20  ;;  %2733 = vrot.lane.b32.xlu0 %v2655_v50, %s4602_s11  ;;  %v2663_v20 = vld [vmem:[%s4790_s15 + $0xb0] sm:$0xff]  ;;  %v2670_v50 = vld [vmem:[%s4790_s15 + $0xe8] sm:$0xff] }
 0x200   : > { %1637 = vst.msk [vmem:[#allocation3 + $0xb8] sm:$0xff] %vm1622_vm10, %v1587_v18  ;;  %2743 = vrot.lane.b32.xlu1 %v2660_v17, %s4602_s11 }
 0x201   : > { %v795_v22 = vpop.permute.xlu0 %794  ;;  %v1797_v24 = vld [vmem:[#allocation3 + $0x70] sm:$0xff] }
 0x202   : > { %v1731_v23 = vpop.permute.xlu1 %1730  ;;  %836 = vst.msk [vmem:[#allocation3 + $0xa8] sm:$0xff] %vm828_vm4, %v795_v22  ;;  %4091 = vmatprep.mubr.msk.bf16.mxu1 %vm2000_vm15, %v1797_v24 }
 0x203   : > { %1773 = vst.msk [vmem:[#allocation3 + $0xa0] sm:$0xff] %vm1766_vm14, %v1731_v23  ;;  %2737 = vrot.lane.b32.xlu0 %v2657_v43, %s4602_s11 }
 0x204   : > { %2747 = vrot.lane.b32.xlu1 %v2662_v40, %s4602_s11 }
 0x205   : > { %v924_v26 = vpop.permute.xlu0 %923  ;;  %v1800_v28 = vld [vmem:[#allocation3 + $0x88] sm:$0xff] }
 0x206   : > { %v1733_v27 = vpop.permute.xlu1 %1732  ;;  %v1805_v16 = vld [vmem:[#allocation3 + $0xb0] sm:$0xff]  ;;  %965 = vst.msk [vmem:[#allocation3 + $0xa8] sm:$0xff] %vm957_vm5, %v924_v26  ;;  %4092 = vmatmul.mubr.msk.bf16.gmra.mrb[24].mxu1 %vm2000_vm15, %v1800_v28  ;;  %v2664_v26 = vld [vmem:[%s4790_s15 + $0xb8] sm:$0xff] }
 0x207   : > { %1774 = vst.msk [vmem:[#allocation3 + $0xb8] sm:$0xff] %vm1766_vm14, %v1733_v27  ;;  %2141 = vmatprep.mubr.bf16.mxu0 %v1805_v16  ;;  %2741 = vrot.lane.b32.xlu0 %v2659_v7, %s4602_s11  ;;  %v2665_v16 = vld [vmem:[%s4790_s15 + $0xc0] sm:$0xff] }
 0x208   : > { %1102 = vst.msk [vmem:[#allocation3 + $0xa8] sm:$0xff] %vm1086_vm6, %v1053_v6  ;;  %2751 = vrot.lane.b32.xlu1 %v2664_v26, %s4602_s11 }
 0x209   : > { %v1055_v30 = vpop.permute.xlu0 %1054 }
 0x20a   : > { %v797_v31 = vpop.permute.xlu1 %796  ;;  %v1803_v32 = vld [vmem:[#allocation3 + $0xa0] sm:$0xff]  ;;  %1105 = vst.msk [vmem:[#allocation3 + $0xc8] sm:$0xff] %vm1088_vm7, %v1055_v30 }
 0x20b   : > { %837 = vst.msk [vmem:[#allocation3 + $0xc0] sm:$0xff] %vm828_vm4, %v797_v31  ;;  %4095 = vmatprep.mubr.msk.bf16.mxu1 %vm2000_vm15, %v1803_v32  ;;  %2745 = vrot.lane.b32.xlu0 %v2661_v11, %s4602_s11 }
 0x20c   : > { %2755 = vrot.lane.b32.xlu1 %v2666_v29, %s4602_s11 }
 0x20d   : > { %v1201_v33 = vpop.permute.xlu0 %1200 }
 0x20e   : > { %v926_v34 = vpop.permute.xlu1 %925  ;;  %v1806_v21 = vld [vmem:[#allocation3 + $0xb8] sm:$0xff]  ;;  %1241 = vst.msk [vmem:[#allocation3 + $0xc8] sm:$0xff] %vm1232_vm8, %v1201_v33  ;;  %v2667_v33 = vld [vmem:[%s4790_s15 + $0xd0] sm:$0xff] }
 0x20f   : > { %966 = vst.msk [vmem:[#allocation3 + $0xc0] sm:$0xff] %vm957_vm5, %v926_v34  ;;  %4096 = vmatmul.mubr.msk.bf16.gmra.mrb[28].mxu1 %vm2000_vm15, %v1806_v21  ;;  %v1804_v52 = vld [vmem:[#allocation3 + $0xa8] sm:$0xff]  ;;  %2749 = vrot.lane.b32.xlu0 %v2663_v20, %s4602_s11  ;;  %v2668_v21 = vld [vmem:[%s4790_s15 + $0xd8] sm:$0xff] }
 0x210   : > { %1104 = vst.msk [vmem:[#allocation3 + $0xc0] sm:$0xff] %vm1086_vm6, %v1055_v30  ;;  %2142 = vmatmul.mubr.bf16.gmra.mrb[28].mxu0 %v1804_v52  ;;  %2759 = vrot.lane.b32.xlu1 %v2668_v21, %s4602_s11 }
 0x211   : > { %v1330_v37 = vpop.permute.xlu0 %1329 }
 0x212   : > { %v1057_v2 = vpop.permute.xlu1 %1056  ;;  %1370 = vst.msk [vmem:[#allocation3 + $0xc8] sm:$0xff] %vm1361_vm9, %v1330_v37  ;;  %v2669_v37 = vld [vmem:[%s4790_s15 + $0xe0] sm:$0xff] }
 0x213   : > { %1107 = vst.msk [vmem:[#allocation3 + $0xe0] sm:$0xff] %vm1088_vm7, %v1057_v2  ;;  %2753 = vrot.lane.b32.xlu0 %v2665_v16, %s4602_s11 }
 0x214   : > { %2763 = vrot.lane.b32.xlu1 %v2670_v50, %s4602_s11 }
 0x215   : > { %v1460_v42 = vpop.permute.xlu0 %1459 }
 0x216   : > { %v1735_v35 = vpop.permute.xlu1 %1734  ;;  %1500 = vst.msk [vmem:[#allocation3 + $0xc8] sm:$0xff] %vm1491_vm11, %v1460_v42 }
 0x217   : > { %v1807_v54 = vld [vmem:[#allocation3 + $0xc0] sm:$0xff]  ;;  %2757 = vrot.lane.b32.xlu0 %v2667_v33, %s4602_s11  ;;  %v5614_v33 = vld [vmem:[%s6419_s4] ss:$0 sm:$0xff] }
 0x219   : > { %v1589_v44 = vpop.permute.xlu0 %1588 }
 0x21a   : > { %v1737_v45 = vpop.permute.xlu1 %1736  ;;  %1638 = vst.msk [vmem:[#allocation3 + $0xc8] sm:$0xff] %vm1620_vm12, %v1589_v44 }
 0x21b   : > { %1639 = vst.msk [vmem:[#allocation3 + $0xd0] sm:$0xff] %vm1622_vm10, %v1589_v44  ;;  %2761 = vrot.lane.b32.xlu0 %v2669_v37, %s4602_s11 }
 0x21c   : > { %1775 = vst.msk [vmem:[#allocation3 + $0xd0] sm:$0xff] %vm1766_vm14, %v1735_v35 }
 0x21d   : > { %v1591_v46 = vpop.permute.xlu0 %1590 }
 0x21e   : > { %v799_v47 = vpop.permute.xlu1 %798  ;;  %1641 = vst.msk [vmem:[#allocation3 + $0xe8] sm:$0xff] %vm1622_vm10, %v1591_v46 }
 0x21f   : > { %838 = vst.msk [vmem:[#allocation3 + $0xd8] sm:$0xff] %vm828_vm4, %v799_v47  ;;  %v2672_v47 = vld [vmem:[%s4790_s15 + $0xf8] sm:$0xff] }
 0x220   : > { %1776 = vst.msk [vmem:[#allocation3 + $0xe8] sm:$0xff] %vm1766_vm14, %v1737_v45  ;;  %2767 = vrot.lane.b32.xlu1 %v2672_v47, %s4602_s11 }
 0x221   : > { %v1203_v48 = vpop.permute.xlu0 %1202  ;;  %v1808_v53 = vld [vmem:[#allocation3 + $0xc8] sm:$0xff] }
 0x222   : > { %v928_v49 = vpop.permute.xlu1 %927  ;;  %1242 = vst.msk [vmem:[#allocation3 + $0xe0] sm:$0xff] %vm1232_vm8, %v1203_v48  ;;  %2149 = vmatprep.mubr.bf16.mxu0 %v1808_v53 }
 0x223   : > { %967 = vst.msk [vmem:[#allocation3 + $0xd8] sm:$0xff] %vm957_vm5, %v928_v49  ;;  %v1809_v25 = vld [vmem:[#allocation3 + $0xd0] sm:$0xff]  ;;  %2150 = vmatmul.mubr.bf16.gmra.mrb[32].mxu0 %v1807_v54 }
 0x224   : > { %1106 = vst.msk [vmem:[#allocation3 + $0xd8] sm:$0xff] %vm1086_vm6, %v1057_v2  ;;  %4099 = vmatprep.mubr.msk.bf16.mxu1 %vm2000_vm15, %v1809_v25 }
 0x225   : > { %v1332_v58 = vpop.permute.xlu0 %1331 }
 0x226   : > { %v1059_v55 = vpop.permute.xlu1 %1058  ;;  %1371 = vst.msk [vmem:[#allocation3 + $0xe0] sm:$0xff] %vm1361_vm9, %v1332_v58 }
 0x227   : > { %1109 = vst.msk [vmem:[#allocation3 + $0xf8] sm:$0xff] %vm1088_vm7, %v1059_v55  ;;  %v1812_v56 = vld [vmem:[#allocation3 + $0xe8] sm:$0xff] }
 0x228   : > { %4100 = vmatmul.mubr.msk.bf16.gmra.mrb[32].mxu1 %vm2000_vm15, %v1812_v56 }
 0x229   : > { %v1462_v59 = vpop.permute.xlu0 %1461 }
 0x22a   : > { %v1739_v60 = vpop.permute.xlu1 %1738  ;;  %1501 = vst.msk [vmem:[#allocation3 + $0xe0] sm:$0xff] %vm1491_vm11, %v1462_v59 }
 0x22b   : > { %1640 = vst.msk [vmem:[#allocation3 + $0xe0] sm:$0xff] %vm1620_vm12, %v1591_v46  ;;  %v1810_v1 = vld [vmem:[#allocation3 + $0xd8] sm:$0xff]  ;;  %v2671_v46 = vld [vmem:[%s4790_s15 + $0xf0] sm:$0xff]  ;;  %s3700_s15 = sshll.u32 %s6108_s8, 4  ;;  %s6257_s15 = int_to_ptr.vmem [resolvable:$true] %s3700_s15 }
 0x22c   : > { %2765 = vrot.lane.b32.xlu0 %v2671_v46, %s4602_s11  ;;  %s4483_s7 = scalar_lea.vmem %s6257_s15, 4096  ;;  %p4490_p13 = scmp.lt.s32.totalorder %s6257_s15, %s4488_s26 }
 0x22d   : > { %v1593_v61 = vpop.permute.xlu0 %1592  ;;  %p4484_p6 = scmp.ne.s32.totalorder %s6257_s15, %s4483_s7 }
 0x22e   : > { %v1741_v62 = vpop.permute.xlu1 %1740  ;;  %1643 = vst.msk [vmem:[#allocation3 + $0x100] sm:$0xff] %vm1622_vm10, %v1593_v61 }
 0x22f   : > { %1777 = vst.msk [vmem:[#allocation3 + $0x100] sm:$0xff] %vm1766_vm14, %v1739_v60  ;;  %p4485_p8 = pnand %p4484_p6, %p4735_p12 }
 0x231   : > { %v5528_v38 = vpop.permute.xlu0 %1594  ;;  %p4486_p10 = pneg %p4485_p8 }
 0x232   : > { %v801_v63 = vpop.permute.xlu1 %800  ;;  %1645 = vst.msk [vmem:[#allocation3 + $0x118] sm:$0xff] %vm1622_vm10, %v5528_v38  ;;  %v1811_v0 = vld [vmem:[#allocation3 + $0xe0] sm:$0xff] }
 0x233   : > { %839 = vst.msk [vmem:[#allocation3 + $0xf0] sm:$0xff] %vm828_vm4, %v801_v63  ;;  %2157 = vmatprep.mubr.bf16.mxu0 %v1811_v0 }
 0x234   : > { %1778 = vst.msk [vmem:[#allocation3 + $0x118] sm:$0xff] %vm1766_vm14, %v1741_v62  ;;  %2158 = vmatmul.mubr.bf16.gmra.mrb[36].mxu0 %v1810_v1 }
 0x235   : > { %v1205_v3 = vpop.permute.xlu0 %1204 }
 0x236   : > { %v930_v4 = vpop.permute.xlu1 %929  ;;  %1243 = vst.msk [vmem:[#allocation3 + $0xf8] sm:$0xff] %vm1232_vm8, %v1205_v3  ;;  %v1815_v5 = vld [vmem:[#allocation3 + $0x100] sm:$0xff] }
 0x237   : > { %968 = vst.msk [vmem:[#allocation3 + $0xf0] sm:$0xff] %vm957_vm5, %v930_v4  ;;  %4103 = vmatprep.mubr.msk.bf16.mxu1 %vm2000_vm15, %v1815_v5 }
 0x238   : > { %1108 = vst.msk [vmem:[#allocation3 + $0xf0] sm:$0xff] %vm1086_vm6, %v1059_v55 }
 0x239   : > { %v1334_v6 = vpop.permute.xlu0 %1333 }
 0x23a   : > { %v1743_v9 = vpop.permute.xlu1 %1742  ;;  %1372 = vst.msk [vmem:[#allocation3 + $0xf8] sm:$0xff] %vm1361_vm9, %v1334_v6 }
 0x23b   : > { %1779 = vst.msk [vmem:[#allocation3 + $0x130] sm:$0xff] %vm1766_vm14, %v1743_v9  ;;  %v1818_v10 = vld [vmem:[#allocation3 + $0x118] sm:$0xff]  ;;  %v3956_v12 = vpop.f32.mrb[0].mxu0 }
 0x23c   : > { %4104 = vmatmul.mubr.msk.bf16.gmra.mrb[36].mxu1 %vm2000_vm15, %v1818_v10  ;;  %v3957_v13 = vpop.f32.mrb[1].mxu0 }
 0x23d   : > { %v1464_v14 = vpop.permute.xlu0 %1463  ;;  %v5548_v15 = vadd.f32 %v3957_v13, %v3956_v12  ;;  %v3959_v18 = vpop.f32.mrb[2].mxu0 }
 0x23e   : > { %1502 = vst.msk [vmem:[#allocation3 + $0xf8] sm:$0xff] %vm1491_vm11, %v1464_v14  ;;  %v1745_v8 = vpop.permute.xlu1 %1744  ;;  %v3960_v19 = vpop.f32.mrb[3].mxu0 }
 0x23f   : > { %1642 = vst.msk [vmem:[#allocation3 + $0xf8] sm:$0xff] %vm1620_vm12, %v1593_v61  ;;  %v5555_v22 = vadd.f32 %v3960_v19, %v3959_v18  ;;  %v1813_v57 = vld [vmem:[#allocation3 + $0xf0] sm:$0xff] }
 0x240   : > { %1780 = vst.msk [vmem:[#allocation3 + $0x148] sm:$0xff] %vm1766_vm14, %v1745_v8 }
 0x241   : > { %v1061_v23 = vpop.permute.xlu0 %1060 }
 0x242   : > { %v1821_v24 = vld [vmem:[#allocation3 + $0x130] sm:$0xff]  ;;  %1111 = vst.msk [vmem:[#allocation3 + $0x110] sm:$0xff] %vm1088_vm7, %v1061_v23  ;;  %v803_v27 = vpop.permute.xlu1 %802 }
 0x243   : > { %4107 = vmatprep.mubr.msk.bf16.mxu1 %vm2000_vm15, %v1821_v24  ;;  %840 = vst.msk [vmem:[#allocation3 + $0x108] sm:$0xff] %vm828_vm4, %v803_v27 }
 0x245   : > { %v1207_v28 = vpop.permute.xlu0 %1206 }
 0x246   : > { %1244 = vst.msk [vmem:[#allocation3 + $0x110] sm:$0xff] %vm1232_vm8, %v1207_v28  ;;  %v932_v30 = vpop.permute.xlu1 %931  ;;  %v1814_v32 = vld [vmem:[#allocation3 + $0xf8] sm:$0xff] }
 0x247   : > { %v1824_v31 = vld [vmem:[#allocation3 + $0x148] sm:$0xff]  ;;  %969 = vst.msk [vmem:[#allocation3 + $0x108] sm:$0xff] %vm957_vm5, %v932_v30  ;;  %2165 = vmatprep.mubr.bf16.mxu0 %v1814_v32 }
 0x248   : > { %4108 = vmatmul.mubr.msk.bf16.gmra.mrb[40].mxu1 %vm2000_vm15, %v1824_v31  ;;  %1110 = vst.msk [vmem:[#allocation3 + $0x108] sm:$0xff] %vm1086_vm6, %v1061_v23  ;;  %2166 = vmatmul.mubr.bf16.gmra.mrb[40].mxu0 %v1813_v57 }
 0x249   : > { %v1336_v34 = vpop.permute.xlu0 %1335 }
 0x24a   : > { %1373 = vst.msk [vmem:[#allocation3 + $0x110] sm:$0xff] %vm1361_vm9, %v1336_v34  ;;  %v1749_v52 = vpop.permute.xlu1 %1748 }
 0x24b   : > { %1782 = vst.msk [vmem:[#allocation3 + $0x178] sm:$0xff] %vm1766_vm14, %v1749_v52  ;;  %v2088_v52 = vadd.f32 %v5548_v15, %v5614_v33 }
 0x24d   : > { %v1466_v36 = vpop.permute.xlu0 %1465 }
 0x24e   : > { %1503 = vst.msk [vmem:[#allocation3 + $0x110] sm:$0xff] %vm1491_vm11, %v1466_v36  ;;  %v4028_v2 = vpop.f32.mrb[0].mxu1 }
 0x24f   : > { %1644 = vst.msk [vmem:[#allocation3 + $0x110] sm:$0xff] %vm1620_vm12, %v5528_v38  ;;  %v4029_v39 = vpop.f32.mrb[1].mxu1  ;;  %v1816_v49 = vld [vmem:[#allocation3 + $0x108] sm:$0xff] }
 0x250   : > { %v5583_v41 = vadd.f32 %v4029_v39, %v4028_v2  ;;  %v4031_v42 = vpop.f32.mrb[2].mxu1 }
 0x251   : > { %v1747_v35 = vpop.permute.xlu0 %1746  ;;  %v4032_v44 = vpop.f32.mrb[3].mxu1 }
 0x252   : > { %1781 = vst.msk [vmem:[#allocation3 + $0x160] sm:$0xff] %vm1766_vm14, %v1747_v35  ;;  %v5587_v45 = vadd.f32 %v4032_v44, %v4031_v42  ;;  %v1830_v54 = vld [vmem:[#allocation3 + $0x178] sm:$0xff]  ;;  %v2091_v42 = vadd.f32 %v5555_v22, %v5614_v33 }
 0x256   : > { %v1817_v48 = vld [vmem:[#allocation3 + $0x110] sm:$0xff] }
 0x257   : > { %2173 = vmatprep.mubr.bf16.mxu0 %v1817_v48  ;;  %v3962_v53 = vpop.f32.mrb[4].mxu0 }
 0x258   : > { %2174 = vmatmul.mubr.bf16.gmra.mrb[44].mxu0 %v1816_v49  ;;  %v3963_v25 = vpop.f32.mrb[5].mxu0 }
 0x259   : > { %v1827_v58 = vld [vmem:[#allocation3 + $0x160] sm:$0xff]  ;;  %v3964_v55 = vadd.f32 %v3963_v25, %v3962_v53  ;;  %v3965_v56 = vpop.f32.mrb[6].mxu0 }
 0x25a   : > { %4111 = vmatprep.mubr.msk.bf16.mxu1 %vm2000_vm15, %v1827_v58  ;;  %v3966_v43 = vpop.f32.mrb[7].mxu0 }
 0x25b   : > { %4112 = vmatmul.mubr.msk.bf16.gmra.mrb[44].mxu1 %vm2000_vm15, %v1830_v54  ;;  %v3967_v51 = vadd.f32 %v3966_v43, %v3965_v56  ;;  %v2096_v34 = vadd.f32 %v3964_v55, %v5614_v33 }
 0x25d   : > { %v2099_v2 = vadd.f32 %v3967_v51, %v5614_v33 }
 0x26a   : > { %v4034_v59 = vpop.f32.mrb[4].mxu1 }
 0x26b   : > { %v4035_v60 = vpop.f32.mrb[5].mxu1 }
 0x26c   : > { %v5595_v61 = vadd.f32 %v4035_v60, %v4034_v59  ;;  %v4037_v62 = vpop.f32.mrb[6].mxu1 }
 0x26d   : > { %v4038_v38 = vpop.f32.mrb[7].mxu1 }
 0x26e   : > { %v5597_v63 = vadd.f32 %v4038_v38, %v4037_v62 }
 0x273   : > { %v3968_v0 = vpop.f32.mrb[8].mxu0 }
 0x274   : > { %v3969_v1 = vpop.f32.mrb[9].mxu0 }
 0x275   : > { %v3970_v3 = vadd.f32 %v3969_v1, %v3968_v0  ;;  %v3971_v4 = vpop.f32.mrb[10].mxu0 }
 0x276   : > { %v3972_v5 = vpop.f32.mrb[11].mxu0 }
 0x277   : > { %v3973_v7 = vadd.f32 %v3972_v5, %v3971_v4  ;;  %v2104_v25 = vadd.f32 %v3970_v3, %v5614_v33 }
 0x279   : > { %v2107_v60 = vadd.f32 %v3973_v7, %v5614_v33 }
 0x286   : > { %v4040_v6 = vpop.f32.mrb[8].mxu1 }
 0x287   : > { %v4041_v9 = vpop.f32.mrb[9].mxu1 }
 0x288   : > { %v5599_v17 = vadd.f32 %v4041_v9, %v4040_v6  ;;  %v4043_v10 = vpop.f32.mrb[10].mxu1 }
 0x289   : > { %v4044_v11 = vpop.f32.mrb[11].mxu1 }
 0x28a   : > { %v5601_v12 = vadd.f32 %v4044_v11, %v4043_v10 }
 0x28f   : > { %v3974_v13 = vpop.f32.mrb[12].mxu0 }
 0x290   : > { %v3975_v14 = vpop.f32.mrb[13].mxu0 }
 0x291   : > { %v3976_v40 = vadd.f32 %v3975_v14, %v3974_v13  ;;  %v3977_v8 = vpop.f32.mrb[14].mxu0 }
 0x292   : > { %v3978_v18 = vpop.f32.mrb[15].mxu0 }
 0x293   : > { %v3979_v19 = vadd.f32 %v3978_v18, %v3977_v8  ;;  %v2112_v15 = vadd.f32 %v3976_v40, %v5614_v33 }
 0x295   : > { %v2115_v22 = vadd.f32 %v3979_v19, %v5614_v33 }
 0x2a2   : > { %v4046_v20 = vpop.f32.mrb[12].mxu1 }
 0x2a3   : > { %v4047_v23 = vpop.f32.mrb[13].mxu1 }
 0x2a4   : > { %v5603_v24 = vadd.f32 %v4047_v23, %v4046_v20  ;;  %v4049_v26 = vpop.f32.mrb[14].mxu1 }
 0x2a5   : > { %v4050_v27 = vpop.f32.mrb[15].mxu1 }
 0x2a6   : > { %v5605_v16 = vadd.f32 %v4050_v27, %v4049_v26 }
 0x2ae   : > { %v3980_v28 = vpop.f32.mrb[16].mxu0 }
 0x2af   : > { %v3981_v29 = vpop.f32.mrb[17].mxu0 }
 0x2b0   : > { %v5607_v30 = vadd.f32 %v3981_v29, %v3980_v28  ;;  %v3983_v31 = vpop.f32.mrb[18].mxu0 }
 0x2b1   : > { %v3984_v32 = vpop.f32.mrb[19].mxu0 }
 0x2b2   : > { %v5609_v57 = vadd.f32 %v3984_v32, %v3983_v31 }
 0x2b5   : > { %v4085_v21 = vpop.f32.mrb[16].mxu1 }
 0x2b6   : > { %v2257_v36 = vadd.f32 %v4085_v21, %v2096_v34  ;;  %v2248_v37 = vpop.f32.mrb[17].mxu1  ;;  %v5629_v34 = vld [vmem:[%s6419_s4 + $0x1] ss:$0 sm:$0xff] }
 0x2b7   : > { %v2249_v39 = vadd.f32 %v2248_v37, %v2088_v52  ;;  %v4086_v50 = vpop.f32.mrb[18].mxu1 }
 0x2b8   : > { %v3895_v35 = vmul.f32 -1.442695, %v2257_v36  ;;  %v2260_v44 = vadd.f32 %v4086_v50, %v2099_v2  ;;  %v2251_v46 = vpop.f32.mrb[19].mxu1  ;;  %v5634_v36 = vld [vmem:[%s6419_s4 + $0x2] ss:$0 sm:$0xff] }
 0x2b9   : > { %v3893_v47 = vmul.f32 -1.442695, %v2249_v39  ;;  %v2252_v48 = vadd.f32 %v2251_v46, %v2091_v42 }
 0x2ba   : > { %4233 = vpow2.f32 %v3895_v35  ;;  %v3896_v49 = vmul.f32 -1.442695, %v2260_v44 }
 0x2bb   : > { %4235 = vpow2.f32 %v3893_v47  ;;  %v3894_v53 = vmul.f32 -1.442695, %v2252_v48 }
 0x2bc   : > { %4237 = vpow2.f32 %v3896_v49 }
 0x2bd   : > { %4239 = vpow2.f32 %v3894_v53 }
 0x2be   : > { %v4089_v54 = vpop.f32.mrb[20].mxu1 }
 0x2bf   : > { %v2273_v58 = vadd.f32 %v4089_v54, %v2112_v15  ;;  %v3986_v55 = vpop.f32.mrb[20].mxu0  ;;  %v2264_v56 = vpop.f32.mrb[21].mxu1 }
 0x2c0   : > { %v2265_v43 = vadd.f32 %v2264_v56, %v2104_v25  ;;  %v3987_v51 = vpop.f32.mrb[21].mxu0  ;;  %v4090_v59 = vpop.f32.mrb[22].mxu1 }
 0x2c1   : > { %v3899_v62 = vmul.f32 -1.442695, %v2273_v58  ;;  %v3988_v38 = vadd.f32 %v3987_v51, %v3986_v55  ;;  %v2276_v0 = vadd.f32 %v4090_v59, %v2115_v22  ;;  %v3989_v1 = vpop.f32.mrb[22].mxu0  ;;  %v2267_v4 = vpop.f32.mrb[23].mxu1 }
 0x2c2   : > { %v3897_v5 = vmul.f32 -1.442695, %v2265_v43  ;;  %v2268_v6 = vadd.f32 %v2267_v4, %v2107_v60  ;;  %v3990_v9 = vpop.f32.mrb[23].mxu0  ;;  %v2120_v43 = vadd.f32 %v5607_v30, %v5614_v33  ;;  %v2123_v30 = vadd.f32 %v5609_v57, %v5614_v33 }
 0x2c3   : > { %4241 = vpow2.f32 %v3899_v62  ;;  %v3900_v3 = vmul.f32 -1.442695, %v2276_v0  ;;  %v3991_v10 = vadd.f32 %v3990_v9, %v3989_v1  ;;  %v2128_v55 = vadd.f32 %v3988_v38, %v5614_v33 }
 0x2c4   : > { %4243 = vpow2.f32 %v3897_v5  ;;  %v3898_v11 = vmul.f32 -1.442695, %v2268_v6  ;;  %v4234_v13 = vpop.eup %4233 }
 0x2c5   : > { %4245 = vpow2.f32 %v3900_v3  ;;  %v4236_v14 = vpop.eup %4235  ;;  %v2473_v40 = vadd.f32 1.0, %v4234_v13  ;;  %v2131_v0 = vadd.f32 %v3991_v10, %v5614_v33 }
 0x2c6   : > { %4247 = vpow2.f32 %v3898_v11  ;;  %v4238_v8 = vpop.eup %4237  ;;  %v2471_v7 = vadd.f32 1.0, %v4236_v14 }
 0x2c7   : > { %v4240_v18 = vpop.eup %4239  ;;  %4249 = vrcp.f32 %v2473_v40  ;;  %v2474_v19 = vadd.f32 1.0, %v4238_v8 }
 0x2c8   : > { %4251 = vrcp.f32 %v2471_v7  ;;  %v2472_v20 = vadd.f32 1.0, %v4240_v18 }
 0x2c9   : > { %4253 = vrcp.f32 %v2474_v19 }
 0x2ca   : > { %4255 = vrcp.f32 %v2472_v20 }
 0x2cd   : > { %v4242_v23 = vpop.eup %4241 }
 0x2ce   : > { %v4244_v26 = vpop.eup %4243  ;;  %v2477_v27 = vadd.f32 1.0, %v4242_v23 }
 0x2cf   : > { %v4246_v28 = vpop.eup %4245  ;;  %v2475_v29 = vadd.f32 1.0, %v4244_v26 }
 0x2d0   : > { %v4248_v31 = vpop.eup %4247  ;;  %4257 = vrcp.f32 %v2477_v27  ;;  %v2478_v32 = vadd.f32 1.0, %v4246_v28 }
 0x2d1   : > { %4259 = vrcp.f32 %v2475_v29  ;;  %v2476_v21 = vadd.f32 1.0, %v4248_v31  ;;  %v4250_v52 = vpop.eup %4249 }
 0x2d2   : > { %4261 = vrcp.f32 %v2478_v32  ;;  %v4252_v37 = vpop.eup %4251  ;;  %v3992_v2 = vpop.f32.mrb[24].mxu0  ;;  %v2574_v39 = vmul.f32 %v4250_v52, %v5629_v34 }
 0x2d3   : > { %4263 = vrcp.f32 %v2476_v21  ;;  %v4254_v50 = vpop.eup %4253  ;;  %v3993_v42 = vpop.f32.mrb[25].mxu0  ;;  %v2572_v44 = vmul.f32 %v4252_v37, %v5629_v34 }
 0x2d4   : > { %v4256_v35 = vpop.eup %4255  ;;  %v3994_v46 = vadd.f32 %v3993_v42, %v3992_v2  ;;  %v3995_v47 = vpop.f32.mrb[26].mxu0  ;;  %v5639_v48 = vadd.f32 %v5634_v36, %v2574_v39  ;;  %v2575_v49 = vmul.f32 %v4254_v50, %v5629_v34 }
 0x2d5   : > { %v3996_v53 = vpop.f32.mrb[27].mxu0  ;;  %v2573_v15 = vmul.f32 %v4256_v35, %v5629_v34  ;;  %v5649_v58 = vadd.f32 %v5634_v36, %v2572_v44 }
 0x2d6   : > { %v3997_v54 = vadd.f32 %v3996_v53, %v3995_v47  ;;  %2869 = vrot.lane.b32.xlu0 %v5639_v48, %s4602_s11  ;;  %v5646_v25 = vadd.f32 %v5634_v36, %v2575_v49  ;;  %v2136_v26 = vadd.f32 %v3994_v46, %v5614_v33 }
 0x2d7   : > { %v5657_v59 = vadd.f32 %v5634_v36, %v2573_v15 }
 0x2d8   : > { %2871 = vrot.lane.b32.xlu1 %v5646_v25, %s4602_s11  ;;  %v2139_v52 = vadd.f32 %v3997_v54, %v5614_v33 }
 0x2d9   : > { %v4093_v22 = vpop.f32.mrb[24].mxu1 }
 0x2da   : > { %v4258_v56 = vpop.eup %4257  ;;  %v2289_v60 = vadd.f32 %v4093_v22, %v2128_v55  ;;  %v2280_v62 = vpop.f32.mrb[25].mxu1  ;;  %2865 = vrot.lane.b32.xlu0 %v5649_v58, %s4602_s11 }
 0x2db   : > { %v4260_v51 = vpop.eup %4259  ;;  %v2578_v1 = vmul.f32 %v4258_v56, %v5629_v34  ;;  %v2281_v5 = vadd.f32 %v2280_v62, %v2120_v43  ;;  %v4094_v6 = vpop.f32.mrb[26].mxu1 }
 0x2dc   : > { %v4262_v4 = vpop.eup %4261  ;;  %v2576_v38 = vmul.f32 %v4260_v51, %v5629_v34  ;;  %v3903_v3 = vmul.f32 -1.442695, %v2289_v60  ;;  %v2292_v11 = vadd.f32 %v4094_v6, %v2131_v0  ;;  %v2283_v13 = vpop.f32.mrb[27].mxu1  ;;  %2867 = vrot.lane.b32.xlu1 %v5657_v59, %s4602_s11 }
 0x2dd   : > { %v4264_v9 = vpop.eup %4263  ;;  %v5669_v14 = vadd.f32 %v5634_v36, %v2578_v1  ;;  %v2579_v10 = vmul.f32 %v4262_v4, %v5629_v34  ;;  %v3901_v40 = vmul.f32 -1.442695, %v2281_v5  ;;  %v2284_v8 = vadd.f32 %v2283_v13, %v2123_v30 }
 0x2de   : > { %4265 = vpow2.f32 %v3903_v3  ;;  %v3904_v7 = vmul.f32 -1.442695, %v2292_v11  ;;  %v2577_v18 = vmul.f32 %v4264_v9, %v5629_v34  ;;  %v5679_v20 = vadd.f32 %v5634_v36, %v2576_v38 }
 0x2df   : > { %2877 = vrot.lane.b32.xlu0 %v5669_v14, %s4602_s11  ;;  %v5676_v57 = vadd.f32 %v5634_v36, %v2579_v10  ;;  %4267 = vpow2.f32 %v3901_v40  ;;  %v3902_v19 = vmul.f32 -1.442695, %v2284_v8 }
 0x2e0   : > { %4269 = vpow2.f32 %v3904_v7  ;;  %v5685_v27 = vadd.f32 %v5634_v36, %v2577_v18 }
 0x2e1   : > { %2879 = vrot.lane.b32.xlu1 %v5676_v57, %s4602_s11  ;;  %4271 = vpow2.f32 %v3902_v19 }
 0x2e2   : > { %v4097_v23 = vpop.f32.mrb[28].mxu1 }
 0x2e3   : > { %v3998_v28 = vpop.f32.mrb[28].mxu0  ;;  %v2296_v29 = vpop.f32.mrb[29].mxu1  ;;  %2873 = vrot.lane.b32.xlu0 %v5679_v20, %s4602_s11 }
 0x2e4   : > { %v2297_v31 = vadd.f32 %v2296_v29, %v2136_v26  ;;  %v3999_v32 = vpop.f32.mrb[29].mxu0  ;;  %v4098_v21 = vpop.f32.mrb[30].mxu1 }
 0x2e5   : > { %v4000_v37 = vadd.f32 %v3999_v32, %v3998_v28  ;;  %v4001_v2 = vpop.f32.mrb[30].mxu0  ;;  %v2299_v39 = vpop.f32.mrb[31].mxu1  ;;  %2875 = vrot.lane.b32.xlu1 %v5685_v27, %s4602_s11 }
 0x2e6   : > { %v3905_v50 = vmul.f32 -1.442695, %v2297_v31  ;;  %v2300_v42 = vadd.f32 %v2299_v39, %v2139_v52  ;;  %v4002_v35 = vpop.f32.mrb[31].mxu0  ;;  %v5700_v31 = vpop.permute.xlu0 %2705 }
 0x2e7   : > { %v2144_v44 = vadd.f32 %v4000_v37, %v5614_v33  ;;  %v4003_v46 = vadd.f32 %v4002_v35, %v4001_v2 }
 0x2e8   : > { %4273 = vpow2.f32 %v3905_v50  ;;  %v3906_v47 = vmul.f32 -1.442695, %v2300_v42  ;;  %v4266_v49 = vpop.eup %4265 }
 0x2e9   : > { %v2305_v53 = vadd.f32 %v4097_v23, %v2144_v44  ;;  %v2147_v15 = vadd.f32 %v4003_v46, %v5614_v33  ;;  %v4268_v55 = vpop.eup %4267  ;;  %v2481_v54 = vadd.f32 1.0, %v4266_v49  ;;  %v5713_v49 = vpop.permute.xlu1 %2707 }
 0x2ea   : > { %4275 = vpow2.f32 %v3906_v47  ;;  %v4270_v56 = vpop.eup %4269  ;;  %v2479_v22 = vadd.f32 1.0, %v4268_v55 }
 0x2eb   : > { %v2308_v43 = vadd.f32 %v4098_v21, %v2147_v15  ;;  %v4272_v51 = vpop.eup %4271  ;;  %4277 = vrcp.f32 %v2481_v54  ;;  %v2482_v60 = vadd.f32 1.0, %v4270_v56  ;;  %v3907_v62 = vmul.f32 -1.442695, %v2305_v53 }
 0x2ec   : > { %4279 = vrcp.f32 %v2479_v22  ;;  %v2480_v0 = vadd.f32 1.0, %v4272_v51  ;;  %v5723_v51 = vpop.permute.xlu0 %2709 }
 0x2ed   : > { %v3908_v1 = vmul.f32 -1.442695, %v2308_v43  ;;  %4281 = vrcp.f32 %v2482_v60 }
 0x2ee   : > { %4283 = vrcp.f32 %v2480_v0 }
 0x2ef   : > { %4285 = vpow2.f32 %v3907_v62 }
 0x2f0   : > { %4287 = vpow2.f32 %v3908_v1  ;;  %v5731_v1 = vpop.permute.xlu1 %2711 }
 0x2f2   : > { %v4274_v4 = vpop.eup %4273 }
 0x2f3   : > { %v2483_v38 = vadd.f32 1.0, %v4274_v4 }
 0x2f4   : > { %v4276_v5 = vpop.eup %4275 }
 0x2f5   : > { %4289 = vrcp.f32 %v2483_v38  ;;  %v2484_v6 = vadd.f32 1.0, %v4276_v5  ;;  %v4278_v30 = vpop.eup %4277  ;;  %v5740_v5 = vpop.permute.xlu0 %2713 }
 0x2f6   : > { %v4280_v9 = vpop.eup %4279  ;;  %v4004_v3 = vpop.f32.mrb[32].mxu0  ;;  %v2582_v11 = vmul.f32 %v4278_v30, %v5629_v34 }
 0x2f7   : > { %4291 = vrcp.f32 %v2484_v6  ;;  %v4282_v13 = vpop.eup %4281  ;;  %v4005_v10 = vpop.f32.mrb[33].mxu0  ;;  %v2580_v8 = vmul.f32 %v4280_v9, %v5629_v34 }
 0x2f8   : > { %v4284_v40 = vpop.eup %4283  ;;  %v4006_v7 = vadd.f32 %v4005_v10, %v4004_v3  ;;  %v4007_v18 = vpop.f32.mrb[34].mxu0  ;;  %v5697_v19 = vadd.f32 %v5634_v36, %v2582_v11  ;;  %v2583_v23 = vmul.f32 %v4282_v13, %v5629_v34 }
 0x2f9   : > { %v4286_v26 = vpop.eup %4285  ;;  %v4008_v28 = vpop.f32.mrb[35].mxu0  ;;  %v2581_v39 = vmul.f32 %v4284_v40, %v5629_v34  ;;  %v5710_v35 = vadd.f32 %v5634_v36, %v2580_v8 }
 0x2fa   : > { %v4288_v29 = vpop.eup %4287  ;;  %v2485_v32 = vadd.f32 1.0, %v4286_v26  ;;  %v4009_v21 = vadd.f32 %v4008_v28, %v4007_v18  ;;  %2885 = vrot.lane.b32.xlu0 %v5697_v19, %s4602_s11  ;;  %v2152_v37 = vadd.f32 %v4006_v7, %v5614_v33  ;;  %v5707_v42 = vadd.f32 %v5634_v36, %v2583_v23  ;;  %v5744_v13 = vpop.permute.xlu1 %2715 }
 0x2fb   : > { %v4101_v52 = vpop.f32.mrb[32].mxu1  ;;  %v2486_v2 = vadd.f32 1.0, %v4288_v29  ;;  %v5720_v56 = vadd.f32 %v5634_v36, %v2581_v39 }
 0x2fc   : > { %v2312_v50 = vpop.f32.mrb[33].mxu1  ;;  %4293 = vrcp.f32 %v2485_v32  ;;  %v2155_v47 = vadd.f32 %v4009_v21, %v5614_v33  ;;  %2887 = vrot.lane.b32.xlu1 %v5707_v42, %s4602_s11  ;;  %v5755_v21 = vpop.permute.xlu0 %2717 }
 0x2fd   : > { %v2313_v44 = vadd.f32 %v2312_v50, %v2152_v37  ;;  %v4102_v46 = vpop.f32.mrb[34].mxu1  ;;  %4295 = vrcp.f32 %v2486_v2 }
 0x2fe   : > { %v2315_v53 = vpop.f32.mrb[35].mxu1  ;;  %2881 = vrot.lane.b32.xlu0 %v5710_v35, %s4602_s11 }
 0x2ff   : > { %v4290_v15 = vpop.eup %4289  ;;  %v3909_v55 = vmul.f32 -1.442695, %v2313_v44  ;;  %v2316_v54 = vadd.f32 %v2315_v53, %v2155_v47  ;;  %v5762_v44 = vpop.permute.xlu1 %2719 }
 0x300   : > { %v2584_v22 = vmul.f32 %v4290_v15, %v5629_v34  ;;  %2883 = vrot.lane.b32.xlu1 %v5720_v56, %s4602_s11 }
 0x301   : > { %v4292_v43 = vpop.eup %4291  ;;  %4297 = vpow2.f32 %v3909_v55  ;;  %v3910_v60 = vmul.f32 -1.442695, %v2316_v54  ;;  %v5764_v55 = vpop.permute.xlu0 %2721 }
 0x302   : > { %v5728_v62 = vadd.f32 %v5634_v36, %v2584_v22  ;;  %v2585_v0 = vmul.f32 %v4292_v43, %v5629_v34 }
 0x303   : > { %4299 = vpow2.f32 %v3910_v60  ;;  %v5768_v60 = vpop.permute.xlu1 %2723 }
 0x304   : > { %2889 = vrot.lane.b32.xlu0 %v5728_v62, %s4602_s11  ;;  %v5736_v4 = vadd.f32 %v5634_v36, %v2585_v0 }
 0x306   : > { %2891 = vrot.lane.b32.xlu1 %v5736_v4, %s4602_s11  ;;  %v4294_v38 = vpop.eup %4293 }
 0x307   : > { %v4296_v6 = vpop.eup %4295  ;;  %v2586_v30 = vmul.f32 %v4294_v38, %v5629_v34  ;;  %v4010_v9 = vpop.f32.mrb[36].mxu0 }
 0x308   : > { %v4011_v3 = vpop.f32.mrb[37].mxu0  ;;  %v2587_v11 = vmul.f32 %v4296_v6, %v5629_v34 }
 0x309   : > { %v5747_v10 = vadd.f32 %v5634_v36, %v2586_v30  ;;  %v4012_v40 = vadd.f32 %v4011_v3, %v4010_v9  ;;  %v4013_v8 = vpop.f32.mrb[38].mxu0  ;;  %v5773_v30 = vpop.permute.xlu1 %2727 }
 0x30a   : > { %v5750_v18 = vadd.f32 %v5634_v36, %v2587_v11  ;;  %v4014_v23 = vpop.f32.mrb[39].mxu0  ;;  %v2184_v11 = vadd.f32 %v5583_v41, %v5614_v33 }
 0x30b   : > { %v4298_v7 = vpop.eup %4297  ;;  %v2160_v28 = vadd.f32 %v4012_v40, %v5614_v33  ;;  %2893 = vrot.lane.b32.xlu0 %v5747_v10, %s4602_s11  ;;  %v4015_v29 = vadd.f32 %v4014_v23, %v4013_v8 }
 0x30c   : > { %v2487_v26 = vadd.f32 1.0, %v4298_v7  ;;  %2895 = vrot.lane.b32.xlu1 %v5750_v18, %s4602_s11 }
 0x30d   : > { %v4300_v32 = vpop.eup %4299  ;;  %v2321_v2 = vadd.f32 %v4101_v52, %v2160_v28  ;;  %v2163_v39 = vadd.f32 %v4015_v29, %v5614_v33  ;;  %v5770_v52 = vpop.permute.xlu0 %2725  ;;  %v2195_v29 = vadd.f32 %v5597_v63, %v5614_v33 }
 0x30e   : > { %4301 = vrcp.f32 %v2487_v26  ;;  %v2488_v37 = vadd.f32 1.0, %v4300_v32 }
 0x30f   : > { %v5760_v50 = vpop.f32.mrb[36].mxu1  ;;  %v3911_v47 = vmul.f32 -1.442695, %v2321_v2  ;;  %v2324_v53 = vadd.f32 %v4102_v46, %v2163_v39  ;;  %v2192_v46 = vadd.f32 %v5595_v61, %v5614_v33  ;;  %v2187_v39 = vadd.f32 %v5587_v45, %v5614_v33  ;;  %v5796_v45 = vpop.permute.xlu1 %2731 }
 0x310   : > { %4303 = vrcp.f32 %v2488_v37  ;;  %v2328_v15 = vpop.f32.mrb[37].mxu1 }
 0x311   : > { %v5766_v54 = vpop.f32.mrb[38].mxu1  ;;  %4305 = vpow2.f32 %v3911_v47  ;;  %v3912_v22 = vmul.f32 -1.442695, %v2324_v53  ;;  %v5777_v9 = vpop.permute.xlu0 %2729 }
 0x312   : > { %v2331_v43 = vpop.f32.mrb[39].mxu1 }
 0x313   : > { %4307 = vpow2.f32 %v3912_v22 }
 0x318   : > { %v4302_v0 = vpop.eup %4301 }
 0x319   : > { %v2588_v38 = vmul.f32 %v4302_v0, %v5629_v34 }
 0x31a   : > { %v4304_v6 = vpop.eup %4303 }
 0x31b   : > { %v4109_v3 = vpop.f32.mrb[40].mxu1  ;;  %v5782_v40 = vadd.f32 %v5634_v36, %v2588_v38  ;;  %v2589_v8 = vmul.f32 %v4304_v6, %v5629_v34  ;;  %v4306_v7 = vpop.eup %4305 }
 0x31c   : > { %v2353_v23 = vadd.f32 %v4109_v3, %v2192_v46  ;;  %v2344_v26 = vpop.f32.mrb[41].mxu1  ;;  %v4016_v28 = vpop.f32.mrb[40].mxu0  ;;  %v2489_v32 = vadd.f32 1.0, %v4306_v7 }
 0x31d   : > { %v2345_v61 = vadd.f32 %v2344_v26, %v2184_v11  ;;  %v4110_v37 = vpop.f32.mrb[42].mxu1  ;;  %v4017_v2 = vpop.f32.mrb[41].mxu0  ;;  %2897 = vrot.lane.b32.xlu0 %v5782_v40, %s4602_s11  ;;  %v5792_v41 = vadd.f32 %v5634_v36, %v2589_v8 }
 0x31e   : > { %v4308_v47 = vpop.eup %4307  ;;  %v3919_v53 = vmul.f32 -1.442695, %v2353_v23  ;;  %v2356_v22 = vadd.f32 %v4110_v37, %v2195_v29  ;;  %v4018_v0 = vadd.f32 %v4017_v2, %v4016_v28  ;;  %v2347_v38 = vpop.f32.mrb[43].mxu1  ;;  %4309 = vrcp.f32 %v2489_v32 }
 0x31f   : > { %v4019_v6 = vpop.f32.mrb[42].mxu0  ;;  %v2490_v63 = vadd.f32 1.0, %v4308_v47  ;;  %v3917_v46 = vmul.f32 -1.442695, %v2345_v61  ;;  %v2348_v3 = vadd.f32 %v2347_v38, %v2187_v39  ;;  %2899 = vrot.lane.b32.xlu1 %v5792_v41, %s4602_s11  ;;  %v5799_v28 = vpop.permute.xlu0 %2733 }
 0x320   : > { %v4020_v11 = vpop.f32.mrb[43].mxu0  ;;  %4311 = vpow2.f32 %v3919_v53  ;;  %v3920_v7 = vmul.f32 -1.442695, %v2356_v22  ;;  %v2168_v8 = vadd.f32 %v4018_v0, %v5614_v33  ;;  %6436 = vst [vmem:[#allocation16_spill] sm:$0xff] %v5799_v28  ;;  %v5802_v2 = vpop.permute.xlu1 %2735 }
 0x321   : > { %4313 = vrcp.f32 %v2490_v63  ;;  %v3918_v23 = vmul.f32 -1.442695, %v2348_v3  ;;  %v4021_v26 = vadd.f32 %v4020_v11, %v4019_v6  ;;  %6437 = vst [vmem:[#allocation17_spill] sm:$0xff] %v5802_v2 }
 0x322   : > { %4315 = vpow2.f32 %v3917_v46  ;;  %v2329_v29 = vadd.f32 %v2328_v15, %v2168_v8 }
 0x323   : > { %4317 = vpow2.f32 %v3920_v7  ;;  %v2171_v32 = vadd.f32 %v4021_v26, %v5614_v33  ;;  %v5804_v39 = vpop.permute.xlu0 %2737 }
 0x324   : > { %v3913_v61 = vmul.f32 -1.442695, %v2329_v29  ;;  %4319 = vpow2.f32 %v3918_v23  ;;  %6438 = vst [vmem:[#allocation18_spill] sm:$0xff] %v5804_v39  ;;  %v5806_v0 = vpop.permute.xlu1 %2739 }
 0x325   : > { %v2332_v37 = vadd.f32 %v2331_v43, %v2171_v32  ;;  %6439 = vst [vmem:[#allocation19_spill] sm:$0xff] %v5806_v0 }
 0x326   : > { %4321 = vpow2.f32 %v3913_v61 }
 0x327   : > { %v3914_v47 = vmul.f32 -1.442695, %v2332_v37  ;;  %v5808_v38 = vpop.permute.xlu0 %2741 }
 0x328   : > { %v4310_v53 = vpop.eup %4309  ;;  %6440 = vst [vmem:[#allocation20_spill] sm:$0xff] %v5808_v38  ;;  %v5815_v32 = vpop.permute.xlu1 %2743 }
 0x329   : > { %4323 = vpow2.f32 %v3914_v47  ;;  %v2590_v15 = vmul.f32 %v4310_v53, %v5629_v34  ;;  %6441 = vst [vmem:[#allocation21_spill] sm:$0xff] %v5815_v32  ;;  %v2200_v53 = vadd.f32 %v5599_v17, %v5614_v33  ;;  %v2211_v17 = vadd.f32 %v5605_v16, %v5614_v33 }
 0x32a   : > { %v4312_v22 = vpop.eup %4311 }
 0x32b   : > { %v4314_v6 = vpop.eup %4313  ;;  %v2497_v63 = vadd.f32 1.0, %v4312_v22  ;;  %v5812_v43 = vadd.f32 %v5634_v36, %v2590_v15  ;;  %v4022_v11 = vpop.f32.mrb[44].mxu0 }
 0x32c   : > { %v4316_v46 = vpop.eup %4315  ;;  %v2591_v3 = vmul.f32 %v4314_v6, %v5629_v34  ;;  %v4023_v23 = vpop.f32.mrb[45].mxu0  ;;  %v2208_v6 = vadd.f32 %v5603_v24, %v5614_v33 }
 0x32d   : > { %v4318_v7 = vpop.eup %4317  ;;  %4325 = vrcp.f32 %v2497_v63  ;;  %v2495_v8 = vadd.f32 1.0, %v4316_v46  ;;  %v4024_v37 = vadd.f32 %v4023_v23, %v4022_v11  ;;  %v4025_v47 = vpop.f32.mrb[46].mxu0  ;;  %2901 = vrot.lane.b32.xlu0 %v5812_v43, %s4602_s11  ;;  %v2203_v46 = vadd.f32 %v5601_v12, %v5614_v33 }
 0x32e   : > { %v4320_v26 = vpop.eup %4319  ;;  %v2498_v29 = vadd.f32 1.0, %v4318_v7  ;;  %v5818_v61 = vadd.f32 %v5634_v36, %v2591_v3  ;;  %v4026_v15 = vpop.f32.mrb[47].mxu0 }
 0x32f   : > { %4327 = vrcp.f32 %v2495_v8  ;;  %v2496_v22 = vadd.f32 1.0, %v4320_v26  ;;  %v4113_v63 = vpop.f32.mrb[44].mxu1  ;;  %v2176_v11 = vadd.f32 %v4024_v37, %v5614_v33  ;;  %v5829_v7 = vpop.permute.xlu0 %2745  ;;  %v4027_v23 = vadd.f32 %v4026_v15, %v4025_v47 }
 0x330   : > { %v4322_v3 = vpop.eup %4321  ;;  %4329 = vrcp.f32 %v2498_v29  ;;  %6442 = vst [vmem:[#allocation22_spill] sm:$0xff] %v5829_v7  ;;  %v2360_v32 = vpop.f32.mrb[45].mxu1  ;;  %2903 = vrot.lane.b32.xlu1 %v5818_v61, %s4602_s11  ;;  %v2369_v24 = vadd.f32 %v4113_v63, %v2208_v6 }
 0x331   : > { %v2491_v8 = vadd.f32 1.0, %v4322_v3  ;;  %4331 = vrcp.f32 %v2496_v22  ;;  %v2361_v26 = vadd.f32 %v2360_v32, %v2200_v53  ;;  %v4114_v38 = vpop.f32.mrb[46].mxu1  ;;  %v2337_v12 = vadd.f32 %v5760_v50, %v2176_v11  ;;  %v5838_v22 = vpop.permute.xlu1 %2747 }
 0x332   : > { %v2179_v29 = vadd.f32 %v4027_v23, %v5614_v33  ;;  %v2372_v37 = vadd.f32 %v4114_v38, %v2211_v17  ;;  %v2363_v0 = vpop.f32.mrb[47].mxu1  ;;  %v3923_v47 = vmul.f32 -1.442695, %v2369_v24 }
 0x333   : > { %v4324_v7 = vpop.eup %4323  ;;  %4333 = vrcp.f32 %v2491_v8  ;;  %v2364_v15 = vadd.f32 %v2363_v0, %v2203_v46  ;;  %v3915_v2 = vmul.f32 -1.442695, %v2337_v12  ;;  %v3921_v16 = vmul.f32 -1.442695, %v2361_v26  ;;  %v5840_v50 = vpop.permute.xlu0 %2749 }
 0x334   : > { %v2492_v39 = vadd.f32 1.0, %v4324_v7  ;;  %v2340_v28 = vadd.f32 %v5766_v54, %v2179_v29  ;;  %4335 = vpow2.f32 %v3923_v47  ;;  %v3924_v53 = vmul.f32 -1.442695, %v2372_v37  ;;  %6443 = vst [vmem:[#allocation23_spill] sm:$0xff] %v5840_v50 }
 0x335   : > { %v3922_v38 = vmul.f32 -1.442695, %v2364_v15 }
 0x336   : > { %4337 = vrcp.f32 %v2492_v39  ;;  %v3916_v32 = vmul.f32 -1.442695, %v2340_v28  ;;  %v5847_v28 = vpop.permute.xlu1 %2751 }
 0x337   : > { %v4326_v33 = vpop.eup %4325  ;;  %4339 = vpow2.f32 %v3915_v2  ;;  %6444 = vst [vmem:[#allocation24_spill] sm:$0xff] %v5847_v28  ;;  %v5850_v2 = vpop.permute.xlu0 %2753 }
 0x338   : > { %4341 = vpow2.f32 %v3916_v32  ;;  %v2598_v6 = vmul.f32 %v4326_v33, %v5629_v34 }
 0x339   : > { %v4328_v0 = vpop.eup %4327  ;;  %4343 = vpow2.f32 %v3921_v16 }
 0x33a   : > { %v4330_v63 = vpop.eup %4329  ;;  %4345 = vpow2.f32 %v3924_v53  ;;  %v2596_v54 = vmul.f32 %v4328_v0, %v5629_v34  ;;  %v5845_v46 = vadd.f32 %v5634_v36, %v2598_v6  ;;  %v5873_v16 = vpop.permute.xlu1 %2755 }
 0x33b   : > { %v4332_v39 = vpop.eup %4331  ;;  %4347 = vpow2.f32 %v3922_v38  ;;  %v2599_v3 = vmul.f32 %v4330_v63, %v5629_v34  ;;  %v5875_v33 = vpop.permute.xlu0 %2757 }
 0x33c   : > { %2917 = vrot.lane.b32.xlu0 %v5845_v46, %s4602_s11  ;;  %v2597_v7 = vmul.f32 %v4332_v39, %v5629_v34  ;;  %v5860_v8 = vadd.f32 %v5634_v36, %v2596_v54 }
 0x33d   : > { %v4334_v11 = vpop.eup %4333  ;;  %v5856_v23 = vadd.f32 %v5634_v36, %v2599_v3 }
 0x33e   : > { %v2592_v17 = vmul.f32 %v4334_v11, %v5629_v34  ;;  %v4336_v24 = vpop.eup %4335  ;;  %v5871_v15 = vadd.f32 %v5634_v36, %v2597_v7 }
 0x33f   : > { %2919 = vrot.lane.b32.xlu1 %v5856_v23, %s4602_s11  ;;  %v2501_v29 = vadd.f32 1.0, %v4336_v24  ;;  %v5884_v11 = vpop.permute.xlu0 %2761 }
 0x340   : > { %v4338_v26 = vpop.eup %4337  ;;  %v5865_v12 = vadd.f32 %v5634_v36, %v2592_v17  ;;  %2913 = vrot.lane.b32.xlu0 %v5860_v8, %s4602_s11  ;;  %6445 = vst [vmem:[#allocation25_spill] sm:$0xff] %v5884_v11  ;;  %v5886_v17 = vpop.permute.xlu1 %2759 }
 0x341   : > { %v4340_v37 = vpop.eup %4339  ;;  %v2593_v47 = vmul.f32 %v4338_v26, %v5629_v34  ;;  %4349 = vrcp.f32 %v2501_v29 }
 0x342   : > { %v4342_v32 = vpop.eup %4341  ;;  %v2493_v53 = vadd.f32 1.0, %v4340_v37 }
 0x343   : > { %v4344_v38 = vpop.eup %4343  ;;  %v5878_v6 = vadd.f32 %v5634_v36, %v2593_v47  ;;  %2915 = vrot.lane.b32.xlu1 %v5871_v15, %s4602_s11  ;;  %v2494_v7 = vadd.f32 1.0, %v4342_v32  ;;  %v5892_v29 = vpop.permute.xlu0 %2765 }
 0x344   : > { %v4346_v0 = vpop.eup %4345  ;;  %v2499_v63 = vadd.f32 1.0, %v4344_v38  ;;  %2905 = vrot.lane.b32.xlu0 %v5865_v12, %s4602_s11  ;;  %4351 = vrcp.f32 %v2493_v53  ;;  %v5890_v24 = vpop.permute.xlu1 %2763 }
 0x345   : > { %v4348_v54 = vpop.eup %4347  ;;  %v2502_v39 = vadd.f32 1.0, %v4346_v0  ;;  %6446 = vst [vmem:[#allocation26_spill] sm:$0xff] %v5890_v24 }
 0x346   : > { %4353 = vrcp.f32 %v2499_v63  ;;  %v2500_v3 = vadd.f32 1.0, %v4348_v54 }
 0x347   : > { %4355 = vrcp.f32 %v2502_v39  ;;  %2907 = vrot.lane.b32.xlu1 %v5878_v6, %s4602_s11 }
 0x348   : > { %4357 = vrcp.f32 %v2500_v3  ;;  %v5899_v63 = vpop.permute.xlu1 %2767  ;;  %v2870_v3 = vpop.permute.xlu0 %2869 }
 0x349   : > { %4359 = vrcp.f32 %v2494_v7  ;;  %6447 = vst [vmem:[#allocation27_spill] sm:$0xff] %v5899_v63 }
 0x34b   : > { %v4350_v26 = vpop.eup %4349 }
 0x34c   : > { %v2602_v37 = vmul.f32 %v4350_v26, %v5629_v34  ;;  %v2872_v50 = vpop.permute.xlu1 %2871 }
 0x34e   : > { %v4352_v47 = vpop.eup %4351  ;;  %v5896_v53 = vadd.f32 %v5634_v36, %v2602_v37 }
 0x34f   : > { %v2594_v7 = vmul.f32 %v4352_v47, %v5629_v34 }
 0x350   : > { %v4354_v32 = vpop.eup %4353  ;;  %2925 = vrot.lane.b32.xlu0 %v5896_v53, %s4602_s11 }
 0x351   : > { %v4356_v38 = vpop.eup %4355  ;;  %v2600_v0 = vmul.f32 %v4354_v32, %v5629_v34 }
 0x352   : > { %v4358_v54 = vpop.eup %4357  ;;  %v2603_v39 = vmul.f32 %v4356_v38, %v5629_v34  ;;  %v5917_v38 = vadd.f32 %v5634_v36, %v2594_v7  ;;  %v2868_v7 = vpop.permute.xlu1 %2867 }
 0x353   : > { %v5906_v26 = vadd.f32 %v5634_v36, %v2600_v0  ;;  %v2601_v37 = vmul.f32 %v4358_v54, %v5629_v34  ;;  %v4360_v32 = vpop.eup %4359  ;;  %v2866_v54 = vpop.permute.xlu0 %2865 }
 0x354   : > { %v5910_v28 = vadd.f32 %v5634_v36, %v2603_v39  ;;  %v2595_v47 = vmul.f32 %v4360_v32, %v5629_v34  ;;  %v2963_v39 = vmul.f32 %v2870_v3, %v5639_v48  ;;  %v2961_v34 = vmul.f32 %v2866_v54, %v5649_v58 }
 0x355   : > { %2921 = vrot.lane.b32.xlu0 %v5906_v26, %s4602_s11  ;;  %v5921_v0 = vadd.f32 %v5634_v36, %v2601_v37  ;;  %v2964_v37 = vmul.f32 %v2872_v50, %v5646_v25 }
 0x356   : > { %2927 = vrot.lane.b32.xlu1 %v5910_v28, %s4602_s11  ;;  %v5929_v24 = vadd.f32 %v5634_v36, %v2595_v47  ;;  %v2880_v32 = vpop.permute.xlu1 %2879  ;;  %v2962_v36 = vmul.f32 %v2868_v7, %v5657_v59 }
 0x357   : > { %v2878_v63 = vpop.permute.xlu0 %2877  ;;  %v2968_v54 = vmul.f32 %v2880_v32, %v5676_v57 }
 0x358   : > { %v2967_v3 = vmul.f32 %v2878_v63, %v5669_v14 }
 0x359   : > { %2909 = vrot.lane.b32.xlu0 %v5917_v38, %s4602_s11 }
 0x35a   : > { %2923 = vrot.lane.b32.xlu1 %v5921_v0, %s4602_s11  ;;  %v2876_v11 = vpop.permute.xlu1 %2875 }
 0x35b   : > { %v2874_v47 = vpop.permute.xlu0 %2873  ;;  %v2966_v50 = vmul.f32 %v2876_v11, %v5685_v27 }
 0x35d   : > { %3029 = vrot.lane.b32.xlu0 %v2963_v39, %s4602_s11  ;;  %v2965_v39 = vmul.f32 %v2874_v47, %v5679_v20 }
 0x35e   : > { %2911 = vrot.lane.b32.xlu1 %v5929_v24, %s4602_s11 }
 0x361   : > { %3025 = vrot.lane.b32.xlu0 %v2961_v34, %s4602_s11 }
 0x362   : > { %3031 = vrot.lane.b32.xlu1 %v2964_v37, %s4602_s11 }
 0x365   : > { %3037 = vrot.lane.b32.xlu0 %v2967_v3, %s4602_s11 }
 0x366   : > { %3027 = vrot.lane.b32.xlu1 %v2962_v36, %s4602_s11 }
 0x369   : > { %3033 = vrot.lane.b32.xlu0 %v2965_v39, %s4602_s11 }
 0x36a   : > { %3039 = vrot.lane.b32.xlu1 %v2968_v54, %s4602_s11 }
 0x36c   : > { %v2886_v63 = vpop.permute.xlu0 %2885 }
 0x36d   : > { %v2971_v7 = vmul.f32 %v2886_v63, %v5697_v19 }
 0x36e   : > { %3035 = vrot.lane.b32.xlu1 %v2966_v50, %s4602_s11  ;;  %v2888_v34 = vpop.permute.xlu1 %2887 }
 0x36f   : > { %3045 = vrot.lane.b32.xlu0 %v2971_v7, %s4602_s11  ;;  %v2972_v37 = vmul.f32 %v2888_v34, %v5707_v42 }
 0x370   : > { %v2882_v3 = vpop.permute.xlu0 %2881 }
 0x371   : > { %v2969_v32 = vmul.f32 %v2882_v3, %v5710_v35 }
 0x372   : > { %3047 = vrot.lane.b32.xlu1 %v2972_v37, %s4602_s11  ;;  %v2884_v36 = vpop.permute.xlu1 %2883 }
 0x373   : > { %3041 = vrot.lane.b32.xlu0 %v2969_v32, %s4602_s11  ;;  %v2970_v11 = vmul.f32 %v2884_v36, %v5720_v56 }
 0x376   : > { %v2890_v47 = vpop.permute.xlu0 %2889  ;;  %3043 = vrot.lane.b32.xlu1 %v2970_v11, %s4602_s11 }
 0x377   : > { %v2973_v39 = vmul.f32 %v2890_v47, %v5728_v62 }
 0x378   : > { %v2892_v54 = vpop.permute.xlu1 %2891 }
 0x379   : > { %v2974_v50 = vmul.f32 %v2892_v54, %v5736_v4  ;;  %3049 = vrot.lane.b32.xlu0 %v2973_v39, %s4602_s11 }
 0x37b   : > { %3051 = vrot.lane.b32.xlu1 %v2974_v50, %s4602_s11 }
 0x37d   : > { %v2894_v63 = vpop.permute.xlu0 %2893 }
 0x37e   : > { %v2975_v7 = vmul.f32 %v2894_v63, %v5747_v10  ;;  %v2896_v34 = vpop.permute.xlu1 %2895 }
 0x37f   : > { %v2976_v37 = vmul.f32 %v2896_v34, %v5750_v18 }
 0x380   : > { %3053 = vrot.lane.b32.xlu0 %v2975_v7, %s4602_s11 }
 0x381   : > { %3055 = vrot.lane.b32.xlu1 %v2976_v37, %s4602_s11 }
 0x38f   : > { %v2898_v3 = vpop.permute.xlu0 %2897 }
 0x390   : > { %v2977_v32 = vmul.f32 %v2898_v3, %v5782_v40 }
 0x391   : > { %v2900_v36 = vpop.permute.xlu1 %2899 }
 0x392   : > { %v2978_v11 = vmul.f32 %v2900_v36, %v5792_v41  ;;  %3057 = vrot.lane.b32.xlu0 %v2977_v32, %s4602_s11 }
 0x394   : > { %3059 = vrot.lane.b32.xlu1 %v2978_v11, %s4602_s11 }
 0x39f   : > { %v2902_v47 = vpop.permute.xlu0 %2901 }
 0x3a0   : > { %v2979_v39 = vmul.f32 %v2902_v47, %v5812_v43 }
 0x3a2   : > { %v2904_v54 = vpop.permute.xlu1 %2903  ;;  %3061 = vrot.lane.b32.xlu0 %v2979_v39, %s4602_s11 }
 0x3a3   : > { %v2980_v50 = vmul.f32 %v2904_v54, %v5818_v61 }
 0x3a5   : > { %3063 = vrot.lane.b32.xlu1 %v2980_v50, %s4602_s11 }
 0x3ae   : > { %v2918_v63 = vpop.permute.xlu0 %2917 }
 0x3af   : > { %v2987_v7 = vmul.f32 %v2918_v63, %v5845_v46 }
 0x3b1   : > { %v2920_v34 = vpop.permute.xlu1 %2919  ;;  %3077 = vrot.lane.b32.xlu0 %v2987_v7, %s4602_s11 }
 0x3b2   : > { %v2988_v37 = vmul.f32 %v2920_v34, %v5856_v23  ;;  %v2914_v3 = vpop.permute.xlu0 %2913 }
 0x3b3   : > { %v2985_v32 = vmul.f32 %v2914_v3, %v5860_v8 }
 0x3b4   : > { %3079 = vrot.lane.b32.xlu1 %v2988_v37, %s4602_s11 }
 0x3b5   : > { %v2916_v36 = vpop.permute.xlu1 %2915  ;;  %3073 = vrot.lane.b32.xlu0 %v2985_v32, %s4602_s11 }
 0x3b6   : > { %v2986_v11 = vmul.f32 %v2916_v36, %v5871_v15  ;;  %v2906_v47 = vpop.permute.xlu0 %2905 }
 0x3b7   : > { %v2981_v39 = vmul.f32 %v2906_v47, %v5865_v12 }
 0x3b8   : > { %3075 = vrot.lane.b32.xlu1 %v2986_v11, %s4602_s11 }
 0x3b9   : > { %v2908_v54 = vpop.permute.xlu1 %2907  ;;  %3065 = vrot.lane.b32.xlu0 %v2981_v39, %s4602_s11 }
 0x3ba   : > { %v2982_v50 = vmul.f32 %v2908_v54, %v5878_v6  ;;  %v2803_v54 = vmul.f32 %v5723_v51, %v5639_v48 }
 0x3bc   : > { %3067 = vrot.lane.b32.xlu1 %v2982_v50, %s4602_s11 }
 0x3c2   : > { %v2926_v63 = vpop.permute.xlu0 %2925 }
 0x3c3   : > { %v2991_v7 = vmul.f32 %v2926_v63, %v5896_v53 }
 0x3c5   : > { %3085 = vrot.lane.b32.xlu0 %v2991_v7, %s4602_s11 }
 0x3c7   : > { %v2922_v34 = vpop.permute.xlu0 %2921 }
 0x3c8   : > { %v2928_v37 = vpop.permute.xlu1 %2927  ;;  %v2989_v3 = vmul.f32 %v2922_v34, %v5906_v26 }
 0x3c9   : > { %v2992_v32 = vmul.f32 %v2928_v37, %v5910_v28  ;;  %v2801_v37 = vmul.f32 %v5700_v31, %v5649_v58  ;;  %v2802_v31 = vmul.f32 %v5713_v49, %v5657_v59 }
 0x3ca   : > { %3081 = vrot.lane.b32.xlu0 %v2989_v3, %s4602_s11  ;;  %v2804_v3 = vmul.f32 %v5731_v1, %v5646_v25 }
 0x3cb   : > { %3087 = vrot.lane.b32.xlu1 %v2992_v32, %s4602_s11  ;;  %v2910_v36 = vpop.permute.xlu0 %2909 }
 0x3cc   : > { %v2924_v11 = vpop.permute.xlu1 %2923  ;;  %v2983_v47 = vmul.f32 %v2910_v36, %v5917_v38 }
 0x3cd   : > { %v2990_v39 = vmul.f32 %v2924_v11, %v5921_v0 }
 0x3ce   : > { %3069 = vrot.lane.b32.xlu0 %v2983_v47, %s4602_s11  ;;  %v2807_v47 = vmul.f32 %v5755_v21, %v5669_v14  ;;  %v2808_v21 = vmul.f32 %v5762_v44, %v5676_v57 }
 0x3cf   : > { %3083 = vrot.lane.b32.xlu1 %v2990_v39, %s4602_s11  ;;  %v3030_v50 = vpop.permute.xlu0 %3029 }
 0x3d0   : > { %v2912_v63 = vpop.permute.xlu1 %2911  ;;  %v3123_v7 = vadd.f32 %v3030_v50, %v2803_v54 }
 0x3d1   : > { %v2984_v34 = vmul.f32 %v2912_v63, %v5929_v24  ;;  %v2805_v63 = vmul.f32 %v5740_v5, %v5679_v20 }
 0x3d2   : > { %3381 = vrot.lane.b32.xlu0 %v3123_v7, %s4603_s12  ;;  %4361 = vtanh.f32 %v3123_v7 }
 0x3d3   : > { %3071 = vrot.lane.b32.xlu1 %v2984_v34, %s4602_s11  ;;  %v3026_v51 = vpop.permute.xlu0 %3025 }
 0x3d4   : > { %v3032_v32 = vpop.permute.xlu1 %3031  ;;  %v3121_v36 = vadd.f32 %v3026_v51, %v2801_v37 }
 0x3d5   : > { %v3124_v11 = vadd.f32 %v3032_v32, %v2804_v3  ;;  %v2806_v3 = vmul.f32 %v5744_v13, %v5685_v27 }
 0x3d6   : > { %3377 = vrot.lane.b32.xlu0 %v3121_v36, %s4603_s12  ;;  %4363 = vtanh.f32 %v3121_v36 }
 0x3d7   : > { %3383 = vrot.lane.b32.xlu1 %v3124_v11, %s4603_s12  ;;  %v3038_v39 = vpop.permute.xlu0 %3037  ;;  %4365 = vtanh.f32 %v3124_v11 }
 0x3d8   : > { %v3028_v54 = vpop.permute.xlu1 %3027  ;;  %v3127_v1 = vadd.f32 %v3038_v39, %v2807_v47  ;;  %v2811_v47 = vmul.f32 %v5770_v52, %v5697_v19 }
 0x3d9   : > { %v3122_v50 = vadd.f32 %v3028_v54, %v2802_v31 }
 0x3da   : > { %3389 = vrot.lane.b32.xlu0 %v3127_v1, %s4603_s12 }
 0x3db   : > { %3379 = vrot.lane.b32.xlu1 %v3122_v50, %s4603_s12  ;;  %v3034_v34 = vpop.permute.xlu0 %3033  ;;  %4367 = vtanh.f32 %v3122_v50  ;;  %v2809_v50 = vmul.f32 %v5764_v55, %v5710_v35 }
 0x3dc   : > { %v3040_v49 = vpop.permute.xlu1 %3039  ;;  %v3125_v7 = vadd.f32 %v3034_v34, %v2805_v63  ;;  %v4362_v51 = vpop.eup %4361  ;;  %4369 = vtanh.f32 %v3127_v1  ;;  %v2812_v63 = vmul.f32 %v5773_v30, %v5707_v42  ;;  %v2810_v34 = vmul.f32 %v5768_v60, %v5720_v56 }
 0x3dd   : > { %v3128_v37 = vadd.f32 %v3040_v49, %v2808_v21 }
 0x3de   : > { %3385 = vrot.lane.b32.xlu0 %v3125_v7, %s4603_s12  ;;  %4371 = vtanh.f32 %v3125_v7 }
 0x3df   : > { %3391 = vrot.lane.b32.xlu1 %v3128_v37, %s4603_s12  ;;  %4373 = vtanh.f32 %v3128_v37 }
 0x3e0   : > { %v3036_v5 = vpop.permute.xlu1 %3035  ;;  %v4364_v36 = vpop.eup %4363 }
 0x3e1   : > { %v3126_v32 = vadd.f32 %v3036_v5, %v2806_v3  ;;  %v3046_v44 = vpop.permute.xlu0 %3045  ;;  %v4366_v11 = vpop.eup %4365  ;;  %v2813_v3 = vmul.f32 %v5777_v9, %v5728_v62 }
 0x3e2   : > { %3221 = vrot.lane.b32.xlu0 %v4362_v51, %s4602_s11  ;;  %v3131_v13 = vadd.f32 %v3046_v44, %v2811_v47  ;;  %v6448_v47 = vld [vmem:[#allocation16_spill] sm:$0xff] }
 0x3e3   : > { %3387 = vrot.lane.b32.xlu1 %v3126_v32, %s4603_s12  ;;  %4375 = vtanh.f32 %v3126_v32  ;;  %v2814_v32 = vmul.f32 %v5796_v45, %v5736_v4 }
 0x3e4   : > { %v3048_v31 = vpop.permute.xlu1 %3047  ;;  %4377 = vtanh.f32 %v3131_v13 }
 0x3e5   : > { %v3042_v39 = vpop.permute.xlu0 %3041  ;;  %v4368_v54 = vpop.eup %4367  ;;  %v3132_v1 = vadd.f32 %v3048_v31, %v2812_v63 }
 0x3e6   : > { %3217 = vrot.lane.b32.xlu0 %v4364_v36, %s4602_s11  ;;  %v3129_v52 = vadd.f32 %v3042_v39, %v2809_v50  ;;  %v4370_v55 = vpop.eup %4369  ;;  %v6449_v50 = vld [vmem:[#allocation17_spill] sm:$0xff] }
 0x3e7   : > { %3223 = vrot.lane.b32.xlu1 %v4366_v11, %s4602_s11  ;;  %v2816_v63 = vmul.f32 %v6449_v50, %v5750_v18 }
 0x3e8   : > { %v3044_v21 = vpop.permute.xlu1 %3043  ;;  %v4372_v30 = vpop.eup %4371  ;;  %4379 = vtanh.f32 %v3129_v52 }
 0x3e9   : > { %v3130_v49 = vadd.f32 %v3044_v21, %v2810_v34  ;;  %v4374_v37 = vpop.eup %4373  ;;  %4381 = vtanh.f32 %v3132_v1  ;;  %v6450_v34 = vld [vmem:[#allocation18_spill] sm:$0xff] }
 0x3ea   : > { %3397 = vrot.lane.b32.xlu0 %v3131_v13, %s4603_s12  ;;  %v2815_v13 = vmul.f32 %v6448_v47, %v5747_v10 }
 0x3eb   : > { %3219 = vrot.lane.b32.xlu1 %v4368_v54, %s4602_s11  ;;  %v3050_v7 = vpop.permute.xlu0 %3049  ;;  %4383 = vtanh.f32 %v3130_v49 }
 0x3ec   : > { %v3133_v60 = vadd.f32 %v3050_v7, %v2813_v3 }
 0x3ed   : > { %v4376_v5 = vpop.eup %4375  ;;  %v3052_v51 = vpop.permute.xlu1 %3051 }
 0x3ee   : > { %3393 = vrot.lane.b32.xlu0 %v3129_v52, %s4603_s12  ;;  %v4378_v44 = vpop.eup %4377  ;;  %v3134_v36 = vadd.f32 %v3052_v51, %v2814_v32  ;;  %4385 = vtanh.f32 %v3133_v60  ;;  %v6452_v51 = vld [vmem:[#allocation20_spill] sm:$0xff] }
 0x3ef   : > { %3399 = vrot.lane.b32.xlu1 %v3132_v1, %s4603_s12  ;;  %v2819_v32 = vmul.f32 %v6452_v51, %v5812_v43 }
 0x3f0   : > { %4387 = vtanh.f32 %v3134_v36 }
 0x3f2   : > { %3229 = vrot.lane.b32.xlu0 %v4370_v55, %s4602_s11  ;;  %v3054_v9 = vpop.permute.xlu0 %3053  ;;  %v4380_v11 = vpop.eup %4379  ;;  %v2817_v55 = vmul.f32 %v6450_v34, %v5782_v40 }
 0x3f3   : > { %3395 = vrot.lane.b32.xlu1 %v3130_v49, %s4603_s12  ;;  %v4382_v31 = vpop.eup %4381  ;;  %v3135_v39 = vadd.f32 %v3054_v9, %v2815_v13  ;;  %v3056_v45 = vpop.permute.xlu1 %3055  ;;  %v6453_v9 = vld [vmem:[#allocation21_spill] sm:$0xff] }
 0x3f4   : > { %v3136_v52 = vadd.f32 %v3056_v45, %v2816_v63 }
 0x3f5   : > { %v4384_v54 = vpop.eup %4383  ;;  %4389 = vtanh.f32 %v3135_v39 }
 0x3f6   : > { %3225 = vrot.lane.b32.xlu0 %v4372_v30, %s4602_s11  ;;  %4391 = vtanh.f32 %v3136_v52 }
 0x3f7   : > { %3231 = vrot.lane.b32.xlu1 %v4374_v37, %s4602_s11  ;;  %v6451_v37 = vld [vmem:[#allocation19_spill] sm:$0xff] }
 0x3f8   : > { %v4386_v1 = vpop.eup %4385  ;;  %v2818_v3 = vmul.f32 %v6451_v37, %v5792_v41 }
 0x3fa   : > { %3401 = vrot.lane.b32.xlu0 %v3133_v60, %s4603_s12  ;;  %v4388_v7 = vpop.eup %4387 }
 0x3fb   : > { %3227 = vrot.lane.b32.xlu1 %v4376_v5, %s4602_s11 }
 0x3fe   : > { %3237 = vrot.lane.b32.xlu0 %v4378_v44, %s4602_s11 }
 0x3ff   : > { %3403 = vrot.lane.b32.xlu1 %v3134_v36, %s4603_s12  ;;  %v4390_v5 = vpop.eup %4389 }
 0x400   : > { %v4392_v36 = vpop.eup %4391 }
 0x402   : > { %3233 = vrot.lane.b32.xlu0 %v4380_v11, %s4602_s11  ;;  %v2820_v11 = vmul.f32 %v6453_v9, %v5818_v61  ;;  %v6455_v9 = vld [vmem:[#allocation25_spill] sm:$0xff] }
 0x403   : > { %3239 = vrot.lane.b32.xlu1 %v4382_v31, %s4602_s11 }
 0x404   : > { %v3058_v21 = vpop.permute.xlu0 %3057 }
 0x405   : > { %v3137_v49 = vadd.f32 %v3058_v21, %v2817_v55 }
 0x406   : > { %3405 = vrot.lane.b32.xlu0 %v3135_v39, %s4603_s12  ;;  %v3060_v30 = vpop.permute.xlu1 %3059 }
 0x407   : > { %3235 = vrot.lane.b32.xlu1 %v4384_v54, %s4602_s11  ;;  %v3138_v60 = vadd.f32 %v3060_v30, %v2818_v3  ;;  %4393 = vtanh.f32 %v3137_v49  ;;  %v2827_v54 = vmul.f32 %v5875_v33, %v5845_v46  ;;  %v2826_v30 = vmul.f32 %v5873_v16, %v5871_v15  ;;  %v6454_v33 = vld [vmem:[#allocation22_spill] sm:$0xff] }
 0x409   : > { %4395 = vtanh.f32 %v3138_v60 }
 0x40a   : > { %3241 = vrot.lane.b32.xlu0 %v4386_v1, %s4602_s11  ;;  %v2825_v1 = vmul.f32 %v5850_v2, %v5860_v8 }
 0x40b   : > { %3407 = vrot.lane.b32.xlu1 %v3136_v52, %s4603_s12  ;;  %v2828_v52 = vmul.f32 %v5886_v17, %v5856_v23 }
 0x40e   : > { %3409 = vrot.lane.b32.xlu0 %v3137_v49, %s4603_s12 }
 0x40f   : > { %3243 = vrot.lane.b32.xlu1 %v4388_v7, %s4602_s11  ;;  %v2821_v7 = vmul.f32 %v6454_v33, %v5865_v12  ;;  %v6458_v33 = vld [vmem:[#allocation23_spill] sm:$0xff] }
 0x411   : > { %v4394_v39 = vpop.eup %4393 }
 0x412   : > { %3245 = vrot.lane.b32.xlu0 %v4390_v5, %s4602_s11 }
 0x413   : > { %3411 = vrot.lane.b32.xlu1 %v3138_v60, %s4603_s12  ;;  %v4396_v45 = vpop.eup %4395  ;;  %v2822_v60 = vmul.f32 %v5838_v22, %v5878_v6 }
 0x414   : > { %v3062_v44 = vpop.permute.xlu0 %3061 }
 0x415   : > { %v3139_v47 = vadd.f32 %v3062_v44, %v2819_v32  ;;  %v2831_v44 = vmul.f32 %v5892_v29, %v5896_v53  ;;  %v6457_v29 = vld [vmem:[#allocation26_spill] sm:$0xff] }
 0x417   : > { %3247 = vrot.lane.b32.xlu1 %v4392_v36, %s4602_s11  ;;  %v3064_v13 = vpop.permute.xlu1 %3063  ;;  %3413 = vrot.lane.b32.xlu0 %v3139_v47, %s4603_s12  ;;  %4397 = vtanh.f32 %v3139_v47  ;;  %v6456_v47 = vld [vmem:[#allocation27_spill] sm:$0xff] }
 0x418   : > { %v3140_v31 = vadd.f32 %v3064_v13, %v2820_v11  ;;  %v2829_v11 = vmul.f32 %v6455_v9, %v5906_v26  ;;  %v2832_v13 = vmul.f32 %v6456_v47, %v5910_v28 }
 0x41a   : > { %4399 = vtanh.f32 %v3140_v31 }
 0x41b   : > { %3415 = vrot.lane.b32.xlu1 %v3140_v31, %s4603_s12  ;;  %3249 = vrot.lane.b32.xlu0 %v4394_v39, %s4602_s11 }
 0x41f   : > { %3251 = vrot.lane.b32.xlu1 %v4396_v45, %s4602_s11 }
 0x421   : > { %v4398_v51 = vpop.eup %4397 }
 0x423   : > { %v3078_v50 = vpop.permute.xlu0 %3077 }
 0x424   : > { %v3147_v63 = vadd.f32 %v3078_v50, %v2827_v54  ;;  %v4400_v32 = vpop.eup %4399  ;;  %v2830_v50 = vmul.f32 %v6457_v29, %v5921_v0 }
 0x426   : > { %v3080_v21 = vpop.permute.xlu1 %3079  ;;  %3429 = vrot.lane.b32.xlu0 %v3147_v63, %s4603_s12  ;;  %4401 = vtanh.f32 %v3147_v63 }
 0x427   : > { %v3148_v34 = vadd.f32 %v3080_v21, %v2828_v52  ;;  %v3074_v55 = vpop.permute.xlu0 %3073 }
 0x428   : > { %v3145_v49 = vadd.f32 %v3074_v55, %v2825_v1 }
 0x429   : > { %3431 = vrot.lane.b32.xlu1 %v3148_v34, %s4603_s12 }
 0x42a   : > { %v3076_v17 = vpop.permute.xlu1 %3075  ;;  %3425 = vrot.lane.b32.xlu0 %v3145_v49, %s4603_s12  ;;  %4403 = vtanh.f32 %v3145_v49 }
 0x42b   : > { %v3146_v2 = vadd.f32 %v3076_v17, %v2826_v30  ;;  %v3066_v37 = vpop.permute.xlu0 %3065  ;;  %4405 = vtanh.f32 %v3148_v34 }
 0x42c   : > { %v3141_v3 = vadd.f32 %v3066_v37, %v2821_v7  ;;  %v2823_v7 = vmul.f32 %v6458_v33, %v5917_v38 }
 0x42d   : > { %3427 = vrot.lane.b32.xlu1 %v3146_v2, %s4603_s12  ;;  %4407 = vtanh.f32 %v3146_v2 }
 0x42e   : > { %v3068_v5 = vpop.permute.xlu1 %3067  ;;  %3417 = vrot.lane.b32.xlu0 %v3141_v3, %s4603_s12  ;;  %4409 = vtanh.f32 %v3141_v3 }
 0x42f   : > { %v3142_v16 = vadd.f32 %v3068_v5, %v2822_v60  ;;  %v6459_v60 = vld [vmem:[#allocation24_spill] sm:$0xff] }
 0x430   : > { %v4402_v1 = vpop.eup %4401  ;;  %v2824_v5 = vmul.f32 %v6459_v60, %v5929_v24 }
 0x431   : > { %3419 = vrot.lane.b32.xlu1 %v3142_v16, %s4603_s12 }
 0x432   : > { %3253 = vrot.lane.b32.xlu0 %v4398_v51, %s4602_s11 }
 0x434   : > { %v4404_v49 = vpop.eup %4403 }
 0x435   : > { %3255 = vrot.lane.b32.xlu1 %v4400_v32, %s4602_s11  ;;  %v4406_v30 = vpop.eup %4405 }
 0x437   : > { %v3086_v36 = vpop.permute.xlu0 %3085  ;;  %v4408_v3 = vpop.eup %4407 }
 0x438   : > { %v3151_v22 = vadd.f32 %v3086_v36, %v2831_v44  ;;  %v4410_v32 = vpop.eup %4409 }
 0x43a   : > { %3437 = vrot.lane.b32.xlu0 %v3151_v22, %s4603_s12  ;;  %4411 = vtanh.f32 %v3151_v22 }
 0x43b   : > { %4413 = vtanh.f32 %v3142_v16 }
 0x43c   : > { %v3082_v31 = vpop.permute.xlu0 %3081 }
 0x43d   : > { %v3088_v39 = vpop.permute.xlu1 %3087  ;;  %v3149_v45 = vadd.f32 %v3082_v31, %v2829_v11 }
 0x43e   : > { %v3152_v54 = vadd.f32 %v3088_v39, %v2832_v13 }
 0x43f   : > { %3433 = vrot.lane.b32.xlu0 %v3149_v45, %s4603_s12  ;;  %4415 = vtanh.f32 %v3149_v45 }
 0x440   : > { %3439 = vrot.lane.b32.xlu1 %v3152_v54, %s4603_s12  ;;  %v3070_v63 = vpop.permute.xlu0 %3069  ;;  %4417 = vtanh.f32 %v3152_v54 }
 0x441   : > { %v3084_v52 = vpop.permute.xlu1 %3083  ;;  %v3143_v2 = vadd.f32 %v3070_v63, %v2823_v7 }
 0x442   : > { %v3150_v21 = vadd.f32 %v3084_v52, %v2830_v50 }
 0x443   : > { %3269 = vrot.lane.b32.xlu0 %v4402_v1, %s4602_s11  ;;  %4419 = vtanh.f32 %v3143_v2 }
 0x444   : > { %3435 = vrot.lane.b32.xlu1 %v3150_v21, %s4603_s12  ;;  %v3382_v34 = vpop.permute.xlu0 %3381  ;;  %4421 = vtanh.f32 %v3150_v21  ;;  %v4412_v9 = vpop.eup %4411 }
 0x445   : > { %v3072_v55 = vpop.permute.xlu1 %3071  ;;  %3475 = vst.msk [vmem:[%s6108_s8 + $0x10] sm:$0xff] %vm1622_vm10, %v3382_v34  ;;  %v4414_v11 = vpop.eup %4413 }
 0x446   : > { %v3144_v44 = vadd.f32 %v3072_v55, %v2824_v5 }
 0x447   : > { %3265 = vrot.lane.b32.xlu0 %v4404_v49, %s4602_s11 }
 0x448   : > { %3271 = vrot.lane.b32.xlu1 %v4406_v30, %s4602_s11  ;;  %v3378_v17 = vpop.permute.xlu0 %3377  ;;  %4423 = vtanh.f32 %v3144_v44 }
 0x449   : > { %v3384_v37 = vpop.permute.xlu1 %3383  ;;  %3473 = vst.msk [vmem:[%s6108_s8] sm:$0xff] %vm1622_vm10, %v3378_v17  ;;  %v4416_v31 = vpop.eup %4415 }
 0x44a   : > { %3476 = vst.msk [vmem:[%s6108_s8 + $0x18] sm:$0xff] %vm1622_vm10, %v3384_v37  ;;  %v4418_v39 = vpop.eup %4417 }
 0x44b   : > { %3421 = vrot.lane.b32.xlu0 %v3143_v2, %s4603_s12 }
 0x44c   : > { %3267 = vrot.lane.b32.xlu1 %v4408_v3, %s4602_s11  ;;  %v3390_v51 = vpop.permute.xlu0 %3389 }
 0x44d   : > { %v3380_v16 = vpop.permute.xlu1 %3379  ;;  %3479 = vst.msk [vmem:[%s6108_s8 + $0x30] sm:$0xff] %vm1622_vm10, %v3390_v51  ;;  %v4420_v29 = vpop.eup %4419 }
 0x44e   : > { %3474 = vst.msk [vmem:[%s6108_s8 + $0x8] sm:$0xff] %vm1622_vm10, %v3380_v16  ;;  %v4422_v50 = vpop.eup %4421 }
 0x44f   : > { %3257 = vrot.lane.b32.xlu0 %v4410_v32, %s4602_s11 }
 0x450   : > { %3423 = vrot.lane.b32.xlu1 %v3144_v44, %s4603_s12  ;;  %v3386_v36 = vpop.permute.xlu0 %3385  ;;  %s4489_s12 = scalar_lea.vmem %s4488_s26, 8192 }
 0x451   : > { %v3392_v22 = vpop.permute.xlu1 %3391  ;;  %3477 = vst.msk [vmem:[%s6108_s8 + $0x20] sm:$0xff] %vm1622_vm10, %v3386_v36  ;;  %p4491_p3 = scmp.lt.s32.totalorder %s4489_s12, %s4483_s7 }
 0x452   : > { %3480 = vst.msk [vmem:[%s6108_s8 + $0x38] sm:$0xff] %vm1622_vm10, %v3392_v22  ;;  %v4424_v21 = vpop.eup %4423 }
 0x453   : > { %3277 = vrot.lane.b32.xlu0 %v4412_v9, %s4602_s11  ;;  %p4492_p7 = por %p4491_p3, %p4490_p13 }
 0x454   : > { %3259 = vrot.lane.b32.xlu1 %v4414_v11, %s4602_s11  ;;  %v3222_v47 = vpop.permute.xlu0 %3221 }
 0x455   : > { %v3388_v13 = vpop.permute.xlu1 %3387  ;;  %v3315_v52 = vmul.f32 %v3222_v47, %v5639_v48  ;;  %p4493_p9 = pnand %p4492_p7, %p4486_p10 }
 0x456   : > { %3478 = vst.msk [vmem:[%s6108_s8 + $0x28] sm:$0xff] %vm1622_vm10, %v3388_v13 }
 0x457   : > { %3273 = vrot.lane.b32.xlu0 %v4416_v31, %s4602_s11 }
 0x458   : > { %3279 = vrot.lane.b32.xlu1 %v4418_v39, %s4602_s11  ;;  %v3218_v45 = vpop.permute.xlu0 %3217 }
 0x459   : > { %v3224_v54 = vpop.permute.xlu1 %3223  ;;  %v3313_v55 = vmul.f32 %v3218_v45, %v5649_v58 }
 0x45a   : > { %v3316_v30 = vmul.f32 %v3224_v54, %v5646_v25 }
 0x45b   : > { %3261 = vrot.lane.b32.xlu0 %v4420_v29, %s4602_s11 }
 0x45c   : > { %3275 = vrot.lane.b32.xlu1 %v4422_v50, %s4602_s11  ;;  %v3398_v63 = vpop.permute.xlu0 %3397 }
 0x45d   : > { %v3220_v1 = vpop.permute.xlu1 %3219  ;;  %3483 = vst.msk [vmem:[%s6108_s8 + $0x50] sm:$0xff] %vm1622_vm10, %v3398_v63 }
 0x45e   : > { %v3314_v17 = vmul.f32 %v3220_v1, %v5657_v59 }
 0x45f   : > { %3541 = vrot.lane.b32.xlu0 %v3315_v52, %s4604_s27 }
 0x460   : > { %3263 = vrot.lane.b32.xlu1 %v4424_v21, %s4602_s11  ;;  %v3394_v34 = vpop.permute.xlu0 %3393  ;;  %s6253_s11 = scalar_lea.hbm %s6421_s6, %s3938_s29 }
 0x461   : > { %v3400_v49 = vpop.permute.xlu1 %3399  ;;  %3481 = vst.msk [vmem:[%s6108_s8 + $0x40] sm:$0xff] %vm1622_vm10, %v3394_v34 }
 0x462   : > { %3484 = vst.msk [vmem:[%s6108_s8 + $0x58] sm:$0xff] %vm1622_vm10, %v3400_v49 }
 0x463   : > { %3537 = vrot.lane.b32.xlu0 %v3313_v55, %s4604_s27 }
 0x464   : > { %3543 = vrot.lane.b32.xlu1 %v3316_v30, %s4604_s27  ;;  %v3230_v48 = vpop.permute.xlu0 %3229 }
 0x465   : > { %v3396_v33 = vpop.permute.xlu1 %3395  ;;  %v3319_v7 = vmul.f32 %v3230_v48, %v5669_v14 }
 0x466   : > { %3482 = vst.msk [vmem:[%s6108_s8 + $0x48] sm:$0xff] %vm1622_vm10, %v3396_v33 }
 0x467   : > { %3549 = vrot.lane.b32.xlu0 %v3319_v7, %s4604_s27 }
 0x468   : > { %3539 = vrot.lane.b32.xlu1 %v3314_v17, %s4604_s27  ;;  %v3226_v25 = vpop.permute.xlu0 %3225 }
 0x469   : > { %v3232_v58 = vpop.permute.xlu1 %3231  ;;  %v3317_v2 = vmul.f32 %v3226_v25, %v5679_v20 }
 0x46a   : > { %v3320_v37 = vmul.f32 %v3232_v58, %v5676_v57 }
 0x46b   : > { %3545 = vrot.lane.b32.xlu0 %v3317_v2, %s4604_s27 }
 0x46c   : > { %3551 = vrot.lane.b32.xlu1 %v3320_v37, %s4604_s27  ;;  %v3402_v14 = vpop.permute.xlu0 %3401 }
 0x46d   : > { %v3228_v3 = vpop.permute.xlu1 %3227  ;;  %3485 = vst.msk [vmem:[%s6108_s8 + $0x60] sm:$0xff] %vm1622_vm10, %v3402_v14 }
 0x46e   : > { %v3318_v59 = vmul.f32 %v3228_v3, %v5685_v27 }
 0x470   : > { %3547 = vrot.lane.b32.xlu1 %v3318_v59, %s4604_s27  ;;  %v3238_v60 = vpop.permute.xlu0 %3237 }
 0x471   : > { %v3404_v5 = vpop.permute.xlu1 %3403  ;;  %v3323_v51 = vmul.f32 %v3238_v60, %v5697_v19 }
 0x472   : > { %3486 = vst.msk [vmem:[%s6108_s8 + $0x68] sm:$0xff] %vm1622_vm10, %v3404_v5 }
 0x473   : > { %3557 = vrot.lane.b32.xlu0 %v3323_v51, %s4604_s27 }
 0x474   : > { %v3234_v57 = vpop.permute.xlu0 %3233 }
 0x475   : > { %v3240_v20 = vpop.permute.xlu1 %3239  ;;  %v3321_v16 = vmul.f32 %v3234_v57, %v5710_v35 }
 0x476   : > { %v3324_v32 = vmul.f32 %v3240_v20, %v5707_v42 }
 0x477   : > { %3553 = vrot.lane.b32.xlu0 %v3321_v16, %s4604_s27 }
 0x478   : > { %3559 = vrot.lane.b32.xlu1 %v3324_v32, %s4604_s27  ;;  %v3406_v27 = vpop.permute.xlu0 %3405 }
 0x479   : > { %v3236_v44 = vpop.permute.xlu1 %3235  ;;  %3487 = vst.msk [vmem:[%s6108_s8 + $0x70] sm:$0xff] %vm1622_vm10, %v3406_v27 }
 0x47a   : > { %v3322_v19 = vmul.f32 %v3236_v44, %v5720_v56 }
 0x47c   : > { %3555 = vrot.lane.b32.xlu1 %v3322_v19, %s4604_s27  ;;  %v3242_v36 = vpop.permute.xlu0 %3241 }
 0x47d   : > { %v3408_v22 = vpop.permute.xlu1 %3407  ;;  %v3325_v35 = vmul.f32 %v3242_v36, %v5728_v62 }
 0x47e   : > { %3488 = vst.msk [vmem:[%s6108_s8 + $0x78] sm:$0xff] %vm1622_vm10, %v3408_v22 }
 0x47f   : > { %3561 = vrot.lane.b32.xlu0 %v3325_v35, %s4604_s27 }
 0x480   : > { %v3410_v42 = vpop.permute.xlu0 %3409 }
 0x481   : > { %v3244_v9 = vpop.permute.xlu1 %3243  ;;  %3489 = vst.msk [vmem:[%s6108_s8 + $0x80] sm:$0xff] %vm1622_vm10, %v3410_v42 }
 0x482   : > { %v3326_v11 = vmul.f32 %v3244_v9, %v5736_v4 }
 0x484   : > { %3563 = vrot.lane.b32.xlu1 %v3326_v11, %s4604_s27  ;;  %v3246_v56 = vpop.permute.xlu0 %3245 }
 0x485   : > { %v3412_v47 = vpop.permute.xlu1 %3411  ;;  %v3327_v13 = vmul.f32 %v3246_v56, %v5747_v10 }
 0x486   : > { %3490 = vst.msk [vmem:[%s6108_s8 + $0x88] sm:$0xff] %vm1622_vm10, %v3412_v47 }
 0x487   : > { %3565 = vrot.lane.b32.xlu0 %v3327_v13, %s4604_s27 }
 0x489   : > { %v3248_v62 = vpop.permute.xlu1 %3247  ;;  %v3414_v39 = vpop.permute.xlu0 %3413 }
 0x48a   : > { %v3328_v31 = vmul.f32 %v3248_v62, %v5750_v18  ;;  %3491 = vst.msk [vmem:[%s6108_s8 + $0x90] sm:$0xff] %vm1622_vm10, %v3414_v39 }
 0x48c   : > { %3567 = vrot.lane.b32.xlu1 %v3328_v31, %s4604_s27 }
 0x48d   : > { %v3416_v4 = vpop.permute.xlu1 %3415  ;;  %v3250_v10 = vpop.permute.xlu0 %3249 }
 0x48e   : > { %3492 = vst.msk [vmem:[%s6108_s8 + $0x98] sm:$0xff] %vm1622_vm10, %v3416_v4  ;;  %v3329_v45 = vmul.f32 %v3250_v10, %v5782_v40 }
 0x490   : > { %3569 = vrot.lane.b32.xlu0 %v3329_v45, %s4604_s27 }
 0x491   : > { %v3252_v54 = vpop.permute.xlu1 %3251 }
 0x492   : > { %v3330_v18 = vmul.f32 %v3252_v54, %v5792_v41 }
 0x494   : > { %3571 = vrot.lane.b32.xlu1 %v3330_v18, %s4604_s27 }
 0x498   : > { %v3430_v29 = vpop.permute.xlu0 %3429 }
 0x499   : > { %3499 = vst.msk [vmem:[%s6108_s8 + $0xd0] sm:$0xff] %vm1622_vm10, %v3430_v29 }
 0x49b   : > { %v3432_v50 = vpop.permute.xlu1 %3431 }
 0x49c   : > { %3500 = vst.msk [vmem:[%s6108_s8 + $0xd8] sm:$0xff] %vm1622_vm10, %v3432_v50  ;;  %v3426_v63 = vpop.permute.xlu0 %3425 }
 0x49d   : > { %3497 = vst.msk [vmem:[%s6108_s8 + $0xc0] sm:$0xff] %vm1622_vm10, %v3426_v63 }
 0x49f   : > { %v3428_v52 = vpop.permute.xlu1 %3427 }
 0x4a0   : > { %3498 = vst.msk [vmem:[%s6108_s8 + $0xc8] sm:$0xff] %vm1622_vm10, %v3428_v52  ;;  %v3418_v40 = vpop.permute.xlu0 %3417 }
 0x4a1   : > { %3493 = vst.msk [vmem:[%s6108_s8 + $0xa0] sm:$0xff] %vm1622_vm10, %v3418_v40 }
 0x4a3   : > { %v3420_v41 = vpop.permute.xlu1 %3419 }
 0x4a4   : > { %3494 = vst.msk [vmem:[%s6108_s8 + $0xa8] sm:$0xff] %vm1622_vm10, %v3420_v41  ;;  %v3254_v1 = vpop.permute.xlu0 %3253 }
 0x4a5   : > { %v3331_v21 = vmul.f32 %v3254_v1, %v5812_v43 }
 0x4a7   : > { %v3256_v34 = vpop.permute.xlu1 %3255  ;;  %3573 = vrot.lane.b32.xlu0 %v3331_v21, %s4604_s27 }
 0x4a8   : > { %v3332_v55 = vmul.f32 %v3256_v34, %v5818_v61 }
 0x4aa   : > { %3575 = vrot.lane.b32.xlu1 %v3332_v55, %s4604_s27 }
 0x4ac   : > { %v3438_v49 = vpop.permute.xlu0 %3437 }
 0x4ad   : > { %3503 = vst.msk [vmem:[%s6108_s8 + $0xf0] sm:$0xff] %vm1622_vm10, %v3438_v49 }
 0x4b1   : > { %v3434_v30 = vpop.permute.xlu0 %3433 }
 0x4b2   : > { %v3440_v48 = vpop.permute.xlu1 %3439  ;;  %3501 = vst.msk [vmem:[%s6108_s8 + $0xe0] sm:$0xff] %vm1622_vm10, %v3434_v30 }
 0x4b3   : > { %3504 = vst.msk [vmem:[%s6108_s8 + $0xf8] sm:$0xff] %vm1622_vm10, %v3440_v48 }
 0x4b5   : > { %v3270_v33 = vpop.permute.xlu0 %3269 }
 0x4b6   : > { %v3436_v7 = vpop.permute.xlu1 %3435  ;;  %v3339_v43 = vmul.f32 %v3270_v33, %v5845_v46 }
 0x4b7   : > { %3502 = vst.msk [vmem:[%s6108_s8 + $0xe8] sm:$0xff] %vm1622_vm10, %v3436_v7 }
 0x4b8   : > { %3589 = vrot.lane.b32.xlu0 %v3339_v43, %s4604_s27 }
 0x4b9   : > { %v3266_v61 = vpop.permute.xlu0 %3265 }
 0x4ba   : > { %v3272_v17 = vpop.permute.xlu1 %3271  ;;  %v3337_v25 = vmul.f32 %v3266_v61, %v5860_v8 }
 0x4bb   : > { %v3340_v58 = vmul.f32 %v3272_v17, %v5856_v23 }
 0x4bc   : > { %3585 = vrot.lane.b32.xlu0 %v3337_v25, %s4604_s27 }
 0x4bd   : > { %3591 = vrot.lane.b32.xlu1 %v3340_v58, %s4604_s27  ;;  %v3422_v2 = vpop.permute.xlu0 %3421 }
 0x4be   : > { %v3268_v37 = vpop.permute.xlu1 %3267  ;;  %3495 = vst.msk [vmem:[%s6108_s8 + $0xb0] sm:$0xff] %vm1622_vm10, %v3422_v2 }
 0x4bf   : > { %v3338_v46 = vmul.f32 %v3268_v37, %v5871_v15 }
 0x4c1   : > { %3587 = vrot.lane.b32.xlu1 %v3338_v46, %s4604_s27  ;;  %v3258_v14 = vpop.permute.xlu0 %3257 }
 0x4c2   : > { %v3424_v3 = vpop.permute.xlu1 %3423  ;;  %v3333_v59 = vmul.f32 %v3258_v14, %v5865_v12 }
 0x4c3   : > { %3496 = vst.msk [vmem:[%s6108_s8 + $0xb8] sm:$0xff] %vm1622_vm10, %v3424_v3 }
 0x4c4   : > { %3577 = vrot.lane.b32.xlu0 %v3333_v59, %s4604_s27 }
 0x4c5   : > { %v3278_v23 = vpop.permute.xlu0 %3277 }
 0x4c6   : > { %v3260_v8 = vpop.permute.xlu1 %3259 }
 0x4c7   : > { %v3334_v60 = vmul.f32 %v3260_v8, %v5878_v6 }
 0x4c9   : > { %3579 = vrot.lane.b32.xlu1 %v3334_v60, %s4604_s27  ;;  %v3274_v5 = vpop.permute.xlu0 %3273 }
 0x4ca   : > { %v3280_v15 = vpop.permute.xlu1 %3279  ;;  %v3341_v51 = vmul.f32 %v3274_v5, %v5906_v26  ;;  %v3343_v26 = vmul.f32 %v3278_v23, %v5896_v53 }
 0x4cc   : > { %3593 = vrot.lane.b32.xlu0 %v3341_v51, %s4604_s27 }
 0x4cd   : > { %v3262_v12 = vpop.permute.xlu0 %3261 }
 0x4ce   : > { %v3276_v57 = vpop.permute.xlu1 %3275  ;;  %v3335_v20 = vmul.f32 %v3262_v12, %v5917_v38 }
 0x4cf   : > { %v3342_v16 = vmul.f32 %v3276_v57, %v5921_v0 }
 0x4d0   : > { %3581 = vrot.lane.b32.xlu0 %v3335_v20, %s4604_s27 }
 0x4d1   : > { %3595 = vrot.lane.b32.xlu1 %v3342_v16, %s4604_s27  ;;  %v3542_v6 = vpop.permute.xlu0 %3541 }
 0x4d2   : > { %v3264_v38 = vpop.permute.xlu1 %3263  ;;  %3635 = vst.msk [vmem:[%s6262_s20 + $0x10] sm:$0xff] %vm1622_vm10, %v3542_v6 }
 0x4d3   : > { %4496 = shalt.err (!%p4493_p9)
}
 0x4d4   : > { %s4497_s17 = scalar_lea.hbm %s6253_s11, 4096  ;;  %s4501_s10 = scalar_lea.hbm %s6421_s6, 8192 }
 0x4d5   : > { %p4498_p2 = scmp.ne.s32.totalorder %s6253_s11, %s4497_s17  ;;  %p4502_p11 = scmp.lt.u32.totalorder %s6253_s11, %s6421_s6 }
 0x4d6   : > { %p4503_p1 = scmp.lt.u32.totalorder %s4501_s10, %s4497_s17  ;;  %p4505_p6 = scmp.lt.u32.totalorder %s4497_s17, %s6253_s11 }
 0x4d7   : > { %p4499_p0 = pnand %p4498_p2, %p4735_p12 }
 0x4d8   : > { %p4504_p4 = por %p4503_p1, %p4502_p11 }
 0x4d9   : > { %p4500_p5 = pneg %p4499_p0 }
 0x4da   : > { %p4506_p8 = por %p4505_p6, %p4504_p4 }
 0x4dc   : > { %p4507_p10 = pnand %p4506_p8, %p4500_p5 }
 0x4de   : > { %4510 = shalt.err (!%p4507_p10)
}
 0x4df   : > { %s4606_s7 = smov 128   ;;  %s4607_s12 = smov 8   ;;  %v3336_v53 = vmul.f32 %v3264_v38, %v5929_v24  ;;  %3597 = vrot.lane.b32.xlu0 %v3343_v26, %s4604_s27  ;;  %v3538_v0 = vpop.permute.xlu0 %3537  ;;  %v3544_v32 = vpop.permute.xlu1 %3543  ;;  %v3344_v27 = vmul.f32 %v3280_v15, %v5910_v28 }
 0x4e0   : > { %4139 = dma.vmem_to_hbm [thread:$0]  (%p4735_p12), %s6257_s15, 4096, %s6253_s11, %s3671_s18, %s4606_s7, %s4606_s7, %s4607_s12  }
 0x4e1   : > { %3583 = vrot.lane.b32.xlu1 %v3336_v53, %s4604_s27  ;;  %3633 = vst.msk [vmem:[%s6262_s20] sm:$0xff] %vm1622_vm10, %v3538_v0  ;;  %3636 = vst.msk [vmem:[%s6262_s20 + $0x18] sm:$0xff] %vm1622_vm10, %v3544_v32  ;;  %s6364_s18 = scalar_lea.hbm %s6420_s5, %s3938_s29  ;;  %s3666_s17 = scalar_lea.sflag [#allocation6], %s4783_s16 }
 0x4e2   : > { %s4608_s25 = smov [#allocation9]  }
 0x4e3   : > { %v3550_v24 = vpop.permute.xlu0 %3549  ;;  %v3540_v44 = vpop.permute.xlu1 %3539  ;;  %s4515_s19 = sshll.u32 %s4608_s25, 4  ;;  %s4516_s19 = int_to_ptr.vmem [resolvable:$false] %s4515_s19 }
 0x4e4   : > { %3639 = vst.msk [vmem:[%s6262_s20 + $0x30] sm:$0xff] %vm1622_vm10, %v3550_v24  ;;  %3634 = vst.msk [vmem:[%s6262_s20 + $0x8] sm:$0xff] %vm1622_vm10, %v3540_v44  ;;  %s4517_s10 = scalar_lea.vmem %s4516_s19, 8192 }
 0x4e5   : > { %3599 = vrot.lane.b32.xlu1 %v3344_v27, %s4604_s27  ;;  %s3684_s27 = sshll.u32 %s6262_s20, 4  ;;  %s6366_s27 = int_to_ptr.vmem [resolvable:$true] %s3684_s27 }
 0x4e6   : > { %s4511_s8 = scalar_lea.vmem %s6366_s27, 4096  ;;  %p4518_p9 = scmp.lt.s32.totalorder %s6366_s27, %s4516_s19 }
 0x4e7   : > { %v3546_v19 = vpop.permute.xlu0 %3545  ;;  %v3552_v36 = vpop.permute.xlu1 %3551  ;;  %p4512_p13 = scmp.ne.s32.totalorder %s6366_s27, %s4511_s8  ;;  %p4519_p2 = scmp.lt.s32.totalorder %s4517_s10, %s4511_s8 }
 0x4e8   : > { %3637 = vst.msk [vmem:[%s6262_s20 + $0x20] sm:$0xff] %vm1622_vm10, %v3546_v19  ;;  %3640 = vst.msk [vmem:[%s6262_s20 + $0x38] sm:$0xff] %vm1622_vm10, %v3552_v36 }
 0x4e9   : > { %p4513_p3 = pnand %p4512_p13, %p4735_p12  ;;  %p4520_p0 = por %p4519_p2, %p4518_p9 }
 0x4eb   : > { %v3548_v28 = vpop.permute.xlu1 %3547  ;;  %v3558_v22 = vpop.permute.xlu0 %3557  ;;  %p4514_p7 = pneg %p4513_p3 }
 0x4ec   : > { %3638 = vst.msk [vmem:[%s6262_s20 + $0x28] sm:$0xff] %vm1622_vm10, %v3548_v28  ;;  %3643 = vst.msk [vmem:[%s6262_s20 + $0x50] sm:$0xff] %vm1622_vm10, %v3558_v22 }
 0x4ed   : > { %p4521_p5 = pnand %p4520_p0, %p4514_p7 }
 0x4ef   : > { %v3554_v35 = vpop.permute.xlu0 %3553  ;;  %v3560_v42 = vpop.permute.xlu1 %3559 }
 0x4f0   : > { %3641 = vst.msk [vmem:[%s6262_s20 + $0x40] sm:$0xff] %vm1622_vm10, %v3554_v35  ;;  %3644 = vst.msk [vmem:[%s6262_s20 + $0x58] sm:$0xff] %vm1622_vm10, %v3560_v42 }
 0x4f3   : > { %v3556_v9 = vpop.permute.xlu1 %3555  ;;  %v3562_v11 = vpop.permute.xlu0 %3561 }
 0x4f4   : > { %3642 = vst.msk [vmem:[%s6262_s20 + $0x48] sm:$0xff] %vm1622_vm10, %v3556_v9  ;;  %3645 = vst.msk [vmem:[%s6262_s20 + $0x60] sm:$0xff] %vm1622_vm10, %v3562_v11 }
 0x4f7   : > { %v3564_v56 = vpop.permute.xlu1 %3563 }
 0x4f8   : > { %3646 = vst.msk [vmem:[%s6262_s20 + $0x68] sm:$0xff] %vm1622_vm10, %v3564_v56 }
 0x4f9   : > { %v3566_v47 = vpop.permute.xlu0 %3565 }
 0x4fa   : > { %3647 = vst.msk [vmem:[%s6262_s20 + $0x70] sm:$0xff] %vm1622_vm10, %v3566_v47 }
 0x4fe   : > { %v3568_v13 = vpop.permute.xlu1 %3567 }
 0x4ff   : > { %3648 = vst.msk [vmem:[%s6262_s20 + $0x78] sm:$0xff] %vm1622_vm10, %v3568_v13 }
 0x502   : > { %v3570_v62 = vpop.permute.xlu0 %3569 }
 0x503   : > { %3649 = vst.msk [vmem:[%s6262_s20 + $0x80] sm:$0xff] %vm1622_vm10, %v3570_v62 }
 0x506   : > { %v3572_v31 = vpop.permute.xlu1 %3571 }
 0x507   : > { %3650 = vst.msk [vmem:[%s6262_s20 + $0x88] sm:$0xff] %vm1622_vm10, %v3572_v31 }
 0x519   : > { %v3574_v39 = vpop.permute.xlu0 %3573 }
 0x51a   : > { %3651 = vst.msk [vmem:[%s6262_s20 + $0x90] sm:$0xff] %vm1622_vm10, %v3574_v39 }
 0x51c   : > { %v3576_v4 = vpop.permute.xlu1 %3575 }
 0x51d   : > { %3652 = vst.msk [vmem:[%s6262_s20 + $0x98] sm:$0xff] %vm1622_vm10, %v3576_v4 }
 0x52a   : > { %v3590_v10 = vpop.permute.xlu0 %3589 }
 0x52b   : > { %3659 = vst.msk [vmem:[%s6262_s20 + $0xd0] sm:$0xff] %vm1622_vm10, %v3590_v10 }
 0x52e   : > { %v3586_v45 = vpop.permute.xlu0 %3585 }
 0x52f   : > { %v3592_v54 = vpop.permute.xlu1 %3591  ;;  %3657 = vst.msk [vmem:[%s6262_s20 + $0xc0] sm:$0xff] %vm1622_vm10, %v3586_v45 }
 0x530   : > { %3660 = vst.msk [vmem:[%s6262_s20 + $0xd8] sm:$0xff] %vm1622_vm10, %v3592_v54 }
 0x533   : > { %v3588_v18 = vpop.permute.xlu1 %3587 }
 0x534   : > { %3658 = vst.msk [vmem:[%s6262_s20 + $0xc8] sm:$0xff] %vm1622_vm10, %v3588_v18 }
 0x536   : > { %v3578_v29 = vpop.permute.xlu0 %3577 }
 0x537   : > { %3653 = vst.msk [vmem:[%s6262_s20 + $0xa0] sm:$0xff] %vm1622_vm10, %v3578_v29 }
 0x53b   : > { %v3580_v50 = vpop.permute.xlu1 %3579 }
 0x53c   : > { %3654 = vst.msk [vmem:[%s6262_s20 + $0xa8] sm:$0xff] %vm1622_vm10, %v3580_v50 }
 0x53e   : > { %v3594_v63 = vpop.permute.xlu0 %3593 }
 0x53f   : > { %3661 = vst.msk [vmem:[%s6262_s20 + $0xe0] sm:$0xff] %vm1622_vm10, %v3594_v63 }
 0x542   : > { %v3582_v52 = vpop.permute.xlu0 %3581 }
 0x543   : > { %v3596_v40 = vpop.permute.xlu1 %3595  ;;  %3655 = vst.msk [vmem:[%s6262_s20 + $0xb0] sm:$0xff] %vm1622_vm10, %v3582_v52 }
 0x544   : > { %3662 = vst.msk [vmem:[%s6262_s20 + $0xe8] sm:$0xff] %vm1622_vm10, %v3596_v40 }
 0x551   : > { %v3598_v41 = vpop.permute.xlu0 %3597 }
 0x552   : > { %3663 = vst.msk [vmem:[%s6262_s20 + $0xf0] sm:$0xff] %vm1622_vm10, %v3598_v41 }
 0x553   : > { %v3584_v1 = vpop.permute.xlu1 %3583 }
 0x554   : > { %3656 = vst.msk [vmem:[%s6262_s20 + $0xb8] sm:$0xff] %vm1622_vm10, %v3584_v1 }
 0x557   : > { %v3600_v21 = vpop.permute.xlu1 %3599 }
 0x558   : > { %3664 = vst.msk [vmem:[%s6262_s20 + $0xf8] sm:$0xff] %vm1622_vm10, %v3600_v21 }
 0x559   : > { %4524 = shalt.err (!%p4521_p5)
}
 0x55a   : > { %s4525_s29 = scalar_lea.hbm %s6364_s18, 4096  ;;  %s4529_s26 = scalar_lea.hbm %s6420_s5, 8192 }
 0x55b   : > { %p4526_p11 = scmp.ne.s32.totalorder %s6364_s18, %s4525_s29  ;;  %p4530_p6 = scmp.lt.u32.totalorder %s6364_s18, %s6420_s5 }
 0x55c   : > { %p4531_p8 = scmp.lt.u32.totalorder %s4529_s26, %s4525_s29  ;;  %p4533_p13 = scmp.lt.u32.totalorder %s4525_s29, %s6364_s18 }
 0x55d   : > { %p4527_p1 = pnand %p4526_p11, %p4735_p12 }
 0x55e   : > { %p4532_p10 = por %p4531_p8, %p4530_p6 }
 0x55f   : > { %p4528_p4 = pneg %p4527_p1 }
 0x560   : > { %p4534_p3 = por %p4533_p13, %p4532_p10 }
 0x562   : > { %p4535_p7 = pnand %p4534_p3, %p4528_p4 }
 0x564   : > { %4538 = shalt.err (!%p4535_p7)
}
 0x565   : > { %4138 = dma.vmem_to_hbm [thread:$0]  (%p4735_p12), %s6366_s27, 4096, %s6364_s18, %s3666_s17, %s4606_s7, %s4606_s7, %s4607_s12  }
 0x566 PF: > { %s3715_s8 = sand.u32 1, %s4573_s21   ;;  %p6460_p9 = scmp.ne.s32.totalorder %s6426_s28, 0 }
 0x567   : > { %p6461_p2 = scmp.ge.s32.totalorder %s4585_s24, 2  ;;  %s3716_s25 = scalar_lea.sflag [#allocation6], %s3715_s8 }
 0x569   : > { %p4151_p0 = pnand %p6461_p2, %p6460_p9 }
 0x56b   : > { %4564 = dma.done.wait (!%p4151_p0), %s3716_s25, 4096  }
 0x56c   : > { %4566 = vsyncadd (!%p4151_p0), %s3716_s25, 4294963200  ;;  %s3725_s14 = scalar_lea.sflag [#allocation11], %s3715_s8 }
 0x56d   : > { %4568 = dma.done.wait (!%p4151_p0), %s3725_s14, 4096  }
 0x56e   : > { %4570 = vsyncadd (!%p4151_p0), %s3725_s14, 4294963200  ;;  %p24_p12 = scmp.ge.s32.totalorder %s4700_s9, 4   ;;  %s6462_s21 = smov %s4577_s22 }
 0x56f   : > { %s6463_s22 = smov %s4581_s23  ;;  %s6464_s23 = smov %s4731_s13 }
 0x570   : > { %s6465_s24 = smov %s4700_s9  ;;  %26 = sbr.rel (!%p24_p12) target bundleno = 8 (0x8), region = 114 }
 0x577   :  { %3730 = vsyncpa [#allocation5], 1 }
 0x578   :  { %3732 = vsyncpa [#allocation5 + $0x1], 1 }
 0x579   :  { %3733 = vsyncpa [#allocation8], 1 }
 0x57a   :  { %3734 = vsyncpa [#allocation6], 1 }
 0x57b   :  { %3736 = vsyncpa [#allocation6 + $0x1], 1 }
 0x57c   :  { %3737 = vsyncpa [#allocation11], 1 }
 0x57d   :  { %3739 = vsyncpa [#allocation11 + $0x1], 1 }

</bundles_post_ra>
